<compile_context>
chip_gen: v7x
topology: tpu7x:2x2x1
jax: 0.10.0
libtpu: 0.0.40
codegen_flags: <defaults>
</compile_context>

<pallas_src>
import functools

import jax
import jax.numpy as jnp
from jax.experimental import pallas as pl
from jax.experimental.pallas import tpu as pltpu

SEG = 500                 # per-segment feature width (from the module)
SEGP = 512                # lane-aligned window width
CAT = 2 * SEG             # 1000: input width of li_mask* and fc1
DIM2 = 10                 # fc1 output width (module default dim2=10)
DIM2_PAD = 128            # padded to one lane tile
NEG = -1e30               # bias for padded mask-logit columns (exp() -> 0 exactly)
S2_OFF = SEG              # x window start for the s2 block  -> [s2 | ref[:12]]
REF_OFF = 3 * SEG - SEGP  # 988: x window start for the ref block -> [s2[-12:] | ref]
REF_PAD = SEGP - SEG      # 12 zero weight rows covering the ref-window overlap


def _round_up(n, m):
    return (n + m - 1) // m * m


def _masked_rank3_kernel(
    x_ref,                # (TB, 1500) f32 — raw rows [s1 | s2 | ref]
    w1s_ref, w2s_ref,     # (512, 512)  compute dtype (s-side mask weights)
    wr_ref,               # (512, 1024) compute dtype (merged ref-side mask weights)
    b1_ref, b2_ref,       # (1, 512) f32 (cols 500..511 = NEG)
    wf1a_ref, wf1b_ref,   # (512, 128)  compute dtype (fc1 halves)
    bf1_ref,              # (1, 128) f32 (padded cols = 0)
    wf2_ref,              # (1, 128) f32 (fc2 weight row, padded 0)
    bf2_ref,              # (1, 1) f32
    o_ref,                # (1, 1, TB) f32
):
    cd = w1s_ref.dtype
    x = x_ref[...]                                 # (TB, 1500) f32

    # Overlapping 512-wide windows of x.  Columns spilling into the neighbouring
    # segment line up with zero rows in the matching weight, so all matmul operands
    # are fully aligned and contain only real (finite) data.  Only the s2/ref windows
    # need a lane realignment (XLU), which hides under the MXU work.
    s1w = x[:, 0:SEGP]                             # [s1       | s2[:12] ]
    s2w = x[:, S2_OFF:S2_OFF + SEGP]               # [s2       | ref[:12]]
    rfw = x[:, REF_OFF:REF_OFF + SEGP]             # [s2[-12:] | ref     ]

    s1b = s1w.astype(cd)
    s2b = s2w.astype(cd)
    rfb = rfw.astype(cd)

    # Mask projections (two Linear(1000, 500)); the ref-side weights are merged so a
    # single rf matmul feeds both.  f32 accumulation on the MXU.
    projr = jnp.dot(rfb, wr_ref[...], preferred_element_type=jnp.float32)   # (TB,1024)
    proj1 = (jnp.dot(s1b, w1s_ref[...], preferred_element_type=jnp.float32)
             + projr[:, :SEGP] + b1_ref[...])
    proj2 = (jnp.dot(s2b, w2s_ref[...], preferred_element_type=jnp.float32)
             + projr[:, SEGP:] + b2_ref[...])

    # Softmax over the 500 real logits; padded columns carry a -1e30 bias -> exp == 0,
    # so the denominator is exact.  Exact reciprocal (only TB denominators per tile).
    def softmax(p):
        m = jnp.max(p, axis=-1, keepdims=True)
        e = jnp.exp(p - m)
        return e / jnp.sum(e, axis=-1, keepdims=True)

    mask1 = softmax(proj1)      # (TB, 512); cols 500.. are exactly 0
    mask2 = softmax(proj2)

    # Apply masks in f32 (matches the reference), then cast for the fc1 MXU pass.
    # Overlap columns are (exact 0) * (real data) == 0.
    masked1 = (mask1 * s1w).astype(cd)
    masked2 = (mask2 * s2w).astype(cd)

    # fc1 (1000 -> dim2, padded to 128 lanes) + Tanh; Dropout is identity at inference.
    h = jnp.tanh(
        jnp.dot(masked1, wf1a_ref[...], preferred_element_type=jnp.float32)
        + jnp.dot(masked2, wf1b_ref[...], preferred_element_type=jnp.float32)
        + bf1_ref[...])                                        # (TB, 128)

    # fc2 (dim2 -> 1): weight the padded lanes, transpose via XLU, reduce over
    # sublanes -> a lane-dense (1, TB) output row (no 1-lane masked stores).
    hw = h * wf2_ref[...]                                      # (TB, 128)
    row = jnp.sum(hw.T, axis=0, keepdims=True) + bf2_ref[...]  # (1, TB)
    o_ref[...] = row.reshape(o_ref.shape).astype(o_ref.dtype)


def prepare_params(params, compute_dtype=jnp.bfloat16):
    """One-time (hoisted) weight prep: transpose, split, zero-pad, cast.

    `params` uses torch nn.Linear layout: weight (out_features, in_features), bias (out,).
    The zero rows baked into each weight cancel the overlap columns of the in-kernel
    x windows, so the kernel never has to pad its activations.
    """
    cd = compute_dtype
    f32 = jnp.float32

    w1t = params["li_mask1_w"].T.astype(f32)       # (1000, 500)
    w2t = params["li_mask2_w"].T.astype(f32)

    def s_side(wt):                                # window = [seg | 12 overlap cols]
        w = jnp.zeros((SEGP, SEGP), f32)
        w = w.at[:SEG, :SEG].set(wt[:SEG])
        return w.astype(cd)

    w1s = s_side(w1t)
    w2s = s_side(w2t)

    # Merged ref-side weights; window = [12 overlap cols | ref]; output columns are
    # [proj1 ref-part (512) | proj2 ref-part (512)].
    wr = jnp.zeros((SEGP, 2 * SEGP), f32)
    wr = wr.at[REF_PAD:, :SEG].set(w1t[SEG:])
    wr = wr.at[REF_PAD:, SEGP:SEGP + SEG].set(w2t[SEG:])
    wr = wr.astype(cd)

    def mask_bias(b):                              # padded logit columns get NEG
        return jnp.concatenate(
            [b.astype(f32), jnp.full((SEGP - SEG,), NEG, f32)]).reshape(1, SEGP)

    b1 = mask_bias(params["li_mask1_b"])
    b2 = mask_bias(params["li_mask2_b"])

    wf_t = params["fc1_w"].T.astype(f32)           # (1000, 10)

    def fc1_half(w_half):
        w = jnp.zeros((SEGP, DIM2_PAD), f32)
        w = w.at[:SEG, :DIM2].set(w_half)
        return w.astype(cd)

    wf1a = fc1_half(wf_t[:SEG])
    wf1b = fc1_half(wf_t[SEG:])
    bf1 = jnp.pad(params["fc1_b"].astype(f32), (0, DIM2_PAD - DIM2)).reshape(1, DIM2_PAD)

    wf2 = jnp.pad(params["fc2_w"].astype(f32).reshape(1, DIM2),
                  ((0, 0), (0, DIM2_PAD - DIM2)))
    bf2 = params["fc2_b"].astype(f32).reshape(1, 1)

    return dict(w1s=w1s, w2s=w2s, wr=wr, b1=b1, b2=b2,
                wf1a=wf1a, wf1b=wf1b, bf1=bf1, wf2=wf2, bf2=bf2)


@functools.partial(jax.jit, static_argnames=("tile_b",))
def masked_rank3_forward(x, prep, *, tile_b=512):
    """x: (B, 1500) f32; prep: prepare_params(...) output.  Returns scores (B, 1) f32."""
    B = x.shape[0]
    assert x.shape[1] == 3 * SEG

    # Batch tile: multiple of 16 (bf16 sublane packing).  Guarantee >= 2 grid tiles
    # whenever the batch can be split, so the "parallel" axis shards across both v7x
    # TensorCores; grid steps also amortize the ~0.35 us per-step overhead.
    tb = min(_round_up(tile_b, 16), _round_up(B, 16))
    if _round_up(B, tb) == tb and tb >= 32:
        tb = max(16, _round_up(tb // 2, 16))
    b_pad = _round_up(B, tb)
    n_tiles = b_pad // tb

    # Only pad the batch when B is not tile-aligned (no full re-layout / cast of x).
    xp = x if b_pad == B else jnp.pad(x, ((0, b_pad - B), (0, 0)))

    def resident(a):     # constant block index -> stays VMEM-resident across grid steps
        return pl.BlockSpec(a.shape, lambda i: (0,) * a.ndim)

    weight_names = ("w1s", "w2s", "wr", "b1", "b2",
                    "wf1a", "wf1b", "bf1", "wf2", "bf2")
    weights = [prep[n] for n in weight_names]

    def nbytes(a):
        return a.size * a.dtype.itemsize

    cost = pl.CostEstimate(
        flops=b_pad * (2 * SEGP * (4 * SEGP) + 2 * SEGP * DIM2_PAD * 2 + 2 * DIM2_PAD),
        transcendentals=b_pad * (2 * SEGP + DIM2_PAD),
        bytes_accessed=nbytes(xp) + sum(nbytes(a) for a in weights) + b_pad * 4,
    )

    out = pl.pallas_call(
        _masked_rank3_kernel,
        out_shape=jax.ShapeDtypeStruct((n_tiles, 1, tb), jnp.float32),
        grid=(n_tiles,),
        in_specs=[pl.BlockSpec((tb, 3 * SEG), lambda i: (i, 0))]
                 + [resident(a) for a in weights],
        out_specs=pl.BlockSpec((1, 1, tb), lambda i: (i, 0, 0)),
        compiler_params=pltpu.CompilerParams(
            dimension_semantics=("parallel",),
            vmem_limit_bytes=48 * 1024 * 1024,
        ),
        cost_estimate=cost,
    )(xp, *weights)

    return out.reshape(b_pad)[:B].reshape(B, 1)


def init_params(key):
    """Deterministic synthetic parameters matching the torch module's shapes."""
    ks = jax.random.split(key, 8)
    s = 0.05
    return {
        # torch nn.Linear layout: weight (out_features, in_features), bias (out_features,)
        "li_mask1_w": s * jax.random.normal(ks[0], (SEG, CAT), jnp.float32),
        "li_mask1_b": s * jax.random.normal(ks[1], (SEG,), jnp.float32),
        "li_mask2_w": s * jax.random.normal(ks[2], (SEG, CAT), jnp.float32),
        "li_mask2_b": s * jax.random.normal(ks[3], (SEG,), jnp.float32),
        "fc1_w": s * jax.random.normal(ks[4], (DIM2, CAT), jnp.float32),
        "fc1_b": s * jax.random.normal(ks[5], (DIM2,), jnp.float32),
        "fc2_w": s * jax.random.normal(ks[6], (1, DIM2), jnp.float32),
        "fc2_b": s * jax.random.normal(ks[7], (1,), jnp.float32),
    }


def reference(x, p):
    """Pure-JAX f32 reference of the intended torch forward at inference."""
    s1, s2, rf = x[:, :SEG], x[:, SEG:2 * SEG], x[:, 2 * SEG:]
    proj1 = jnp.concatenate([s1, rf], -1) @ p["li_mask1_w"].T + p["li_mask1_b"]
    proj2 = jnp.concatenate([s2, rf], -1) @ p["li_mask2_w"].T + p["li_mask2_b"]
    m1 = jax.nn.softmax(proj1, axis=-1)
    m2 = jax.nn.softmax(proj2, axis=-1)
    masked = jnp.concatenate([m1 * s1, m2 * s2], -1)
    h = jnp.tanh(masked @ p["fc1_w"].T + p["fc1_b"])   # dropout = identity (eval)
    return h @ p["fc2_w"].T + p["fc2_b"]


if __name__ == "__main__":
    key = jax.random.PRNGKey(0)
    k_x, k_p = jax.random.split(key)

    B = 24                                                     # exercises 2 tiles + batch pad
    x = jax.random.normal(k_x, (B, 3 * SEG), jnp.float32)      # (24, 1500)
    params = init_params(k_p)

    # Hoisted one-time weight preparation (transpose / split / zero-pad / bf16 cast).
    prep = prepare_params(params, compute_dtype=jnp.bfloat16)

    out = masked_rank3_forward(x, prep)
    out = jax.block_until_ready(out)

    ref = reference(x, params)
    assert out.shape == (B, 1)
    # bf16 matmul operands -> loose tolerance vs the f32 reference.
    err = jnp.max(jnp.abs(out - ref))
    assert jnp.allclose(out, ref, atol=1e-2, rtol=1e-2), f"mismatch vs reference: {err}"
    print("KERNEL_OK")
</pallas_src>

<mosaic_0001>
module attributes {stable_mosaic.version = 11 : i64} {
  func.func @_masked_rank3_kernel(%arg0: i32, %arg1: memref<16x1500xf32, #tpu.memory_space<vmem>>, %arg2: memref<512x512xbf16, #tpu.memory_space<vmem>>, %arg3: memref<512x512xbf16, #tpu.memory_space<vmem>>, %arg4: memref<512x1024xbf16, #tpu.memory_space<vmem>>, %arg5: memref<1x512xf32, #tpu.memory_space<vmem>>, %arg6: memref<1x512xf32, #tpu.memory_space<vmem>>, %arg7: memref<512x128xbf16, #tpu.memory_space<vmem>>, %arg8: memref<512x128xbf16, #tpu.memory_space<vmem>>, %arg9: memref<1x128xf32, #tpu.memory_space<vmem>>, %arg10: memref<1x128xf32, #tpu.memory_space<vmem>>, %arg11: memref<1x1xf32, #tpu.memory_space<vmem>>, %arg12: memref<1x1x16xf32, #tpu.memory_space<vmem>>) attributes {dimension_semantics = [#tpu.dimension_semantics<parallel>], iteration_bounds = array<i64: 2>, scalar_prefetch = 0 : i64, scratch_operands = 0 : i64, tpu.core_type = #tpu.core_type<tc>, window_params = [{transform_indices = @transform_0, window_bounds = array<i64: 16, 1500>}, {pipeline_mode = #tpu.pipeline_mode<synchronous>, transform_indices = @transform_1, window_bounds = array<i64: 512, 512>}, {pipeline_mode = #tpu.pipeline_mode<synchronous>, transform_indices = @transform_2, window_bounds = array<i64: 512, 512>}, {pipeline_mode = #tpu.pipeline_mode<synchronous>, transform_indices = @transform_3, window_bounds = array<i64: 512, 1024>}, {pipeline_mode = #tpu.pipeline_mode<synchronous>, transform_indices = @transform_4, window_bounds = array<i64: 1, 512>}, {pipeline_mode = #tpu.pipeline_mode<synchronous>, transform_indices = @transform_5, window_bounds = array<i64: 1, 512>}, {pipeline_mode = #tpu.pipeline_mode<synchronous>, transform_indices = @transform_6, window_bounds = array<i64: 512, 128>}, {pipeline_mode = #tpu.pipeline_mode<synchronous>, transform_indices = @transform_7, window_bounds = array<i64: 512, 128>}, {pipeline_mode = #tpu.pipeline_mode<synchronous>, transform_indices = @transform_8, window_bounds = array<i64: 1, 128>}, {pipeline_mode = #tpu.pipeline_mode<synchronous>, transform_indices = @transform_9, window_bounds = array<i64: 1, 128>}, {pipeline_mode = #tpu.pipeline_mode<synchronous>, transform_indices = @transform_10, window_bounds = array<i64: 1, 1>}, {transform_indices = @transform_11, window_bounds = array<i64: 1, 1, 16>}]} {
    %c0 = arith.constant 0 : index
    %c0_0 = arith.constant 0 : index
    %0 = vector.load %arg1[%c0, %c0_0] : memref<16x1500xf32, #tpu.memory_space<vmem>>, vector<16x1500xf32>
    %1 = vector.extract_strided_slice %0 {offsets = [0, 0], sizes = [16, 512], strides = [1, 1]} : vector<16x1500xf32> to vector<16x512xf32>
    %2 = vector.extract_strided_slice %0 {offsets = [0, 500], sizes = [16, 512], strides = [1, 1]} : vector<16x1500xf32> to vector<16x512xf32>
    %3 = vector.extract_strided_slice %0 {offsets = [0, 988], sizes = [16, 512], strides = [1, 1]} : vector<16x1500xf32> to vector<16x512xf32>
    %4 = arith.truncf %1 : vector<16x512xf32> to vector<16x512xbf16>
    %5 = arith.truncf %2 : vector<16x512xf32> to vector<16x512xbf16>
    %6 = arith.truncf %3 : vector<16x512xf32> to vector<16x512xbf16>
    %c0_1 = arith.constant 0 : index
    %c0_2 = arith.constant 0 : index
    %7 = vector.load %arg4[%c0_1, %c0_2] : memref<512x1024xbf16, #tpu.memory_space<vmem>>, vector<512x1024xbf16>
    %cst = arith.constant dense<0.000000e+00> : vector<16x1024xf32>
    %8 = tpu.matmul %6, %7, %cst {dimension_numbers = #tpu.dot_dimension_numbers<[1], [0], [0], [1], [0, 0, 1, 1], [], []>} : vector<16x512xbf16>, vector<512x1024xbf16>, vector<16x1024xf32> -> vector<16x1024xf32>
    %c0_3 = arith.constant 0 : index
    %c0_4 = arith.constant 0 : index
    %9 = vector.load %arg2[%c0_3, %c0_4] : memref<512x512xbf16, #tpu.memory_space<vmem>>, vector<512x512xbf16>
    %cst_5 = arith.constant dense<0.000000e+00> : vector<16x512xf32>
    %10 = tpu.matmul %4, %9, %cst_5 {dimension_numbers = #tpu.dot_dimension_numbers<[1], [0], [0], [1], [0, 0, 1, 1], [], []>} : vector<16x512xbf16>, vector<512x512xbf16>, vector<16x512xf32> -> vector<16x512xf32>
    %11 = vector.extract_strided_slice %8 {offsets = [0, 0], sizes = [16, 512], strides = [1, 1]} : vector<16x1024xf32> to vector<16x512xf32>
    %12 = arith.addf %10, %11 : vector<16x512xf32>
    %c0_6 = arith.constant 0 : index
    %c0_7 = arith.constant 0 : index
    %13 = vector.load %arg5[%c0_6, %c0_7] : memref<1x512xf32, #tpu.memory_space<vmem>>, vector<1x512xf32>
    %14 = vector.broadcast %13 : vector<1x512xf32> to vector<16x512xf32>
    %15 = arith.addf %12, %14 : vector<16x512xf32>
    %c0_8 = arith.constant 0 : index
    %c0_9 = arith.constant 0 : index
    %16 = vector.load %arg3[%c0_8, %c0_9] : memref<512x512xbf16, #tpu.memory_space<vmem>>, vector<512x512xbf16>
    %cst_10 = arith.constant dense<0.000000e+00> : vector<16x512xf32>
    %17 = tpu.matmul %5, %16, %cst_10 {dimension_numbers = #tpu.dot_dimension_numbers<[1], [0], [0], [1], [0, 0, 1, 1], [], []>} : vector<16x512xbf16>, vector<512x512xbf16>, vector<16x512xf32> -> vector<16x512xf32>
    %18 = vector.extract_strided_slice %8 {offsets = [0, 512], sizes = [16, 512], strides = [1, 1]} : vector<16x1024xf32> to vector<16x512xf32>
    %19 = arith.addf %17, %18 : vector<16x512xf32>
    %c0_11 = arith.constant 0 : index
    %c0_12 = arith.constant 0 : index
    %20 = vector.load %arg6[%c0_11, %c0_12] : memref<1x512xf32, #tpu.memory_space<vmem>>, vector<1x512xf32>
    %21 = vector.broadcast %20 : vector<1x512xf32> to vector<16x512xf32>
    %22 = arith.addf %19, %21 : vector<16x512xf32>
    %cst_13 = arith.constant dense<0xFF800000> : vector<16xf32>
    %23 = vector.multi_reduction <maximumf>, %15, %cst_13 [1] : vector<16x512xf32> to vector<16xf32>
    %24 = vector.shape_cast %23 : vector<16xf32> to vector<16x1xf32>
    %25 = vector.broadcast %24 : vector<16x1xf32> to vector<16x512xf32>
    %26 = arith.subf %15, %25 : vector<16x512xf32>
    %27 = math.exp %26 : vector<16x512xf32>
    %cst_14 = arith.constant dense<0.000000e+00> : vector<16xf32>
    %28 = vector.multi_reduction <add>, %27, %cst_14 [1] : vector<16x512xf32> to vector<16xf32>
    %29 = vector.shape_cast %28 : vector<16xf32> to vector<16x1xf32>
    %30 = vector.broadcast %29 : vector<16x1xf32> to vector<16x512xf32>
    %31 = arith.divf %27, %30 : vector<16x512xf32>
    %cst_15 = arith.constant dense<0xFF800000> : vector<16xf32>
    %32 = vector.multi_reduction <maximumf>, %22, %cst_15 [1] : vector<16x512xf32> to vector<16xf32>
    %33 = vector.shape_cast %32 : vector<16xf32> to vector<16x1xf32>
    %34 = vector.broadcast %33 : vector<16x1xf32> to vector<16x512xf32>
    %35 = arith.subf %22, %34 : vector<16x512xf32>
    %36 = math.exp %35 : vector<16x512xf32>
    %cst_16 = arith.constant dense<0.000000e+00> : vector<16xf32>
    %37 = vector.multi_reduction <add>, %36, %cst_16 [1] : vector<16x512xf32> to vector<16xf32>
    %38 = vector.shape_cast %37 : vector<16xf32> to vector<16x1xf32>
    %39 = vector.broadcast %38 : vector<16x1xf32> to vector<16x512xf32>
    %40 = arith.divf %36, %39 : vector<16x512xf32>
    %41 = arith.mulf %31, %1 : vector<16x512xf32>
    %42 = arith.truncf %41 : vector<16x512xf32> to vector<16x512xbf16>
    %43 = arith.mulf %40, %2 : vector<16x512xf32>
    %44 = arith.truncf %43 : vector<16x512xf32> to vector<16x512xbf16>
    %c0_17 = arith.constant 0 : index
    %c0_18 = arith.constant 0 : index
    %45 = vector.load %arg7[%c0_17, %c0_18] : memref<512x128xbf16, #tpu.memory_space<vmem>>, vector<512x128xbf16>
    %cst_19 = arith.constant dense<0.000000e+00> : vector<16x128xf32>
    %46 = tpu.matmul %42, %45, %cst_19 {dimension_numbers = #tpu.dot_dimension_numbers<[1], [0], [0], [1], [0, 0, 1, 1], [], []>} : vector<16x512xbf16>, vector<512x128xbf16>, vector<16x128xf32> -> vector<16x128xf32>
    %c0_20 = arith.constant 0 : index
    %c0_21 = arith.constant 0 : index
    %47 = vector.load %arg8[%c0_20, %c0_21] : memref<512x128xbf16, #tpu.memory_space<vmem>>, vector<512x128xbf16>
    %cst_22 = arith.constant dense<0.000000e+00> : vector<16x128xf32>
    %48 = tpu.matmul %44, %47, %cst_22 {dimension_numbers = #tpu.dot_dimension_numbers<[1], [0], [0], [1], [0, 0, 1, 1], [], []>} : vector<16x512xbf16>, vector<512x128xbf16>, vector<16x128xf32> -> vector<16x128xf32>
    %49 = arith.addf %46, %48 : vector<16x128xf32>
    %c0_23 = arith.constant 0 : index
    %c0_24 = arith.constant 0 : index
    %50 = vector.load %arg9[%c0_23, %c0_24] : memref<1x128xf32, #tpu.memory_space<vmem>>, vector<1x128xf32>
    %51 = vector.broadcast %50 : vector<1x128xf32> to vector<16x128xf32>
    %52 = arith.addf %49, %51 : vector<16x128xf32>
    %53 = math.tanh %52 : vector<16x128xf32>
    %c0_25 = arith.constant 0 : index
    %c0_26 = arith.constant 0 : index
    %54 = vector.load %arg10[%c0_25, %c0_26] : memref<1x128xf32, #tpu.memory_space<vmem>>, vector<1x128xf32>
    %55 = vector.broadcast %54 : vector<1x128xf32> to vector<16x128xf32>
    %56 = arith.mulf %53, %55 : vector<16x128xf32>
    %57 = tpu.transpose %56, [1, 0] : vector<16x128xf32> -> vector<128x16xf32>
    %cst_27 = arith.constant dense<0.000000e+00> : vector<16xf32>
    %58 = vector.multi_reduction <add>, %57, %cst_27 [0] : vector<128x16xf32> to vector<16xf32>
    %59 = vector.shape_cast %58 : vector<16xf32> to vector<1x16xf32>
    %c0_28 = arith.constant 0 : index
    %c0_29 = arith.constant 0 : index
    %60 = vector.load %arg11[%c0_28, %c0_29] : memref<1x1xf32, #tpu.memory_space<vmem>>, vector<1x1xf32>
    %61 = vector.broadcast %60 : vector<1x1xf32> to vector<1x16xf32>
    %62 = arith.addf %59, %61 : vector<1x16xf32>
    %63 = vector.shape_cast %62 : vector<1x16xf32> to vector<1x1x16xf32>
    %c0_30 = arith.constant 0 : index
    %c0_31 = arith.constant 0 : index
    %c0_32 = arith.constant 0 : index
    %64 = vector.load %arg12[%c0_30, %c0_31, %c0_32] : memref<1x1x16xf32, #tpu.memory_space<vmem>>, vector<1x1x16xf32>
    tpu.vector_store %arg12[%c0_30, %c0_31, %c0_32], %63 {strides = array<i32>} : memref<1x1x16xf32, #tpu.memory_space<vmem>>, vector<1x1x16xf32>,
    return
  }
  func.func @transform_0(%arg0: i32) -> (i32, i32) {
    %c0_i32 = arith.constant 0 : i32
    %c0_i32_0 = arith.constant 0 : i32
    return %arg0, %c0_i32 : i32, i32
  }
  func.func @transform_1(%arg0: i32) -> (i32, i32) {
    %c0_i32 = arith.constant 0 : i32
    %c0_i32_0 = arith.constant 0 : i32
    %c0_i32_1 = arith.constant 0 : i32
    return %c0_i32, %c0_i32_0 : i32, i32
  }
  func.func @transform_2(%arg0: i32) -> (i32, i32) {
    %c0_i32 = arith.constant 0 : i32
    %c0_i32_0 = arith.constant 0 : i32
    %c0_i32_1 = arith.constant 0 : i32
    return %c0_i32, %c0_i32_0 : i32, i32
  }
  func.func @transform_3(%arg0: i32) -> (i32, i32) {
    %c0_i32 = arith.constant 0 : i32
    %c0_i32_0 = arith.constant 0 : i32
    %c0_i32_1 = arith.constant 0 : i32
    return %c0_i32, %c0_i32_0 : i32, i32
  }
  func.func @transform_4(%arg0: i32) -> (i32, i32) {
    %c0_i32 = arith.constant 0 : i32
    %c0_i32_0 = arith.constant 0 : i32
    %c0_i32_1 = arith.constant 0 : i32
    return %c0_i32, %c0_i32_0 : i32, i32
  }
  func.func @transform_5(%arg0: i32) -> (i32, i32) {
    %c0_i32 = arith.constant 0 : i32
    %c0_i32_0 = arith.constant 0 : i32
    %c0_i32_1 = arith.constant 0 : i32
    return %c0_i32, %c0_i32_0 : i32, i32
  }
  func.func @transform_6(%arg0: i32) -> (i32, i32) {
    %c0_i32 = arith.constant 0 : i32
    %c0_i32_0 = arith.constant 0 : i32
    %c0_i32_1 = arith.constant 0 : i32
    return %c0_i32, %c0_i32_0 : i32, i32
  }
  func.func @transform_7(%arg0: i32) -> (i32, i32) {
    %c0_i32 = arith.constant 0 : i32
    %c0_i32_0 = arith.constant 0 : i32
    %c0_i32_1 = arith.constant 0 : i32
    return %c0_i32, %c0_i32_0 : i32, i32
  }
  func.func @transform_8(%arg0: i32) -> (i32, i32) {
    %c0_i32 = arith.constant 0 : i32
    %c0_i32_0 = arith.constant 0 : i32
    %c0_i32_1 = arith.constant 0 : i32
    return %c0_i32, %c0_i32_0 : i32, i32
  }
  func.func @transform_9(%arg0: i32) -> (i32, i32) {
    %c0_i32 = arith.constant 0 : i32
    %c0_i32_0 = arith.constant 0 : i32
    %c0_i32_1 = arith.constant 0 : i32
    return %c0_i32, %c0_i32_0 : i32, i32
  }
  func.func @transform_10(%arg0: i32) -> (i32, i32) {
    %c0_i32 = arith.constant 0 : i32
    %c0_i32_0 = arith.constant 0 : i32
    %c0_i32_1 = arith.constant 0 : i32
    return %c0_i32, %c0_i32_0 : i32, i32
  }
  func.func @transform_11(%arg0: i32) -> (i32, i32, i32) {
    %c0_i32 = arith.constant 0 : i32
    %c0_i32_0 = arith.constant 0 : i32
    %c0_i32_1 = arith.constant 0 : i32
    return %arg0, %c0_i32, %c0_i32_0 : i32, i32, i32
  }
}

</mosaic_0001>

<bundles_post_ra>
// kernel: masked_rank3_forward.1
= control target key start
LH: loop header
LB: loop body
LE: loop exit
PB: predicated region body
PF: predicated region fallthrough
CT: control target
= control target key end

     0   :  { %s7450_s0 = inlined_call_operand.vmem [shape: f32[32,1500], index: 0, kind: input, shape index: {}]   ;;  %s7451_s1 = inlined_call_operand.hbm [shape: bf16[512,512], index: 1, kind: input, shape index: {}]   ;;  %s7452_s2 = inlined_call_operand.hbm [shape: bf16[512,512], index: 2, kind: input, shape index: {}]   ;;  %s7453_s3 = inlined_call_operand.hbm [shape: bf16[512,1024], index: 3, kind: input, shape index: {}]   ;;  %s7454_s4 = inlined_call_operand.vmem [shape: f32[1,512], index: 4, kind: input, shape index: {}]   ;;  %s7455_s5 = inlined_call_operand.vmem [shape: f32[1,512], index: 5, kind: input, shape index: {}]   ;;  %s7456_s6 = inlined_call_operand.vmem [shape: bf16[512,128], index: 6, kind: input, shape index: {}]   ;;  %s7457_s7 = inlined_call_operand.vmem [shape: bf16[512,128], index: 7, kind: input, shape index: {}]   ;;  %s7458_s8 = inlined_call_operand.vmem [shape: f32[1,128], index: 8, kind: input, shape index: {}]   ;;  %s7459_s9 = inlined_call_operand.vmem [shape: f32[1,128], index: 9, kind: input, shape index: {}]   ;;  %s7460_s10 = inlined_call_operand.<no memory space> [shape: f32[1,1], index: 10, kind: input, shape index: {}]   ;;  %s7461_s11 = inlined_call_operand.vmem [shape: f32[2,1,16], index: 11, kind: output, shape index: {}]  }
   0x1   :  { %v16_v0 = vstv %s7460_s10 }
   0x2   :  { %17 = vst [vmem:[#allocation2] sm:$0x1] %v16_v0 }
   0x3   :  { %18 = vsyncpa [#allocation4], 0 }
   0x4   :  { %19 = vsyncpa [#allocation6], 0  ;;  %s6834_s19 = smov 0  }
   0x5 LB: > { %s6840_s20 = sadd.s32 4294967295, %s6759_s19   ;;  %p5376_p0 = scmp.ge.s32.totalorder %s6759_s19, 1  ;;  %s6759_s19 = sphi %s6834_s19, %s25_s19  }
   0x6   : > { %p292_p1 = scmp.lt.s32.totalorder %s6759_s19, 3  ;;  %p6126_p2 = scmp.eq.s32.totalorder %s6840_s20, 0 }
   0x7   : > { %s6761_s21 = smov [#allocation5]   ;;  %s6762_s23 = smov [#allocation3]  }
   0x8   : > { %p6845_p3 = pnand %p5376_p0, %p292_p1  ;;  %s317_s22 = sshll.u32 %s6761_s21, 4  ;;  %s6849_s22 = int_to_ptr.vmem [resolvable:$true] %s317_s22 }
   0x9   : > { %s304_s24 = sshll.u32 %s6762_s23, 4  ;;  %s6763_s26 = smov [#allocation7]   ;;  %s6853_s24 = int_to_ptr.vmem [resolvable:$true] %s304_s24 }
   0xa   : > { %p6116_p4 = pneg %p6845_p3  ;;  %s330_s27 = sshll.u32 %s6763_s26, 4  ;;  %s6861_s27 = int_to_ptr.vmem [resolvable:$true] %s330_s27 }
   0xb   : > { %s6661_s30 = scalar_lea.hbm %s7452_s2, 16384 }
   0xc   : > { %p6857_p5 = pnand %p6126_p2, %p6116_p4  ;;  %p6662_p6 = scmp.ne.s32.totalorder %s7452_s2, %s6661_s30 }
   0xd   : > { %p6668_p10 = scmp.lt.u32.totalorder %s6661_s30, %s7452_s2 }
   0xe   : > { %p6871_p7 = pneg %p6857_p5 }
  0x10   : > { %p6664_p8 = pnand %p6871_p7, %p6662_p6 }
  0x12   : > { %p6665_p9 = pneg %p6664_p8 }
  0x14   : > { %p6670_p11 = pnand %p6668_p10, %p6665_p9 }
  0x16   : > { %6673 = shalt.err (!%p6670_p11)
}
  0x17   : > { %s6674_s17 = scalar_lea.vmem %s6849_s22, 16384  ;;  %p6682_p1 = scmp.lt.s32.totalorder %s6849_s22, %s6849_s22 }
  0x18   : > { %p6675_p12 = scmp.ne.s32.totalorder %s6849_s22, %s6674_s17  ;;  %p6683_p4 = scmp.lt.s32.totalorder %s6674_s17, %s6674_s17 }
  0x1a   : > { %p6677_p13 = pnand %p6675_p12, %p6871_p7  ;;  %p6684_p6 = por %p6683_p4, %p6682_p1 }
  0x1c   : > { %p6678_p0 = pneg %p6677_p13 }
  0x1e   : > { %p6685_p8 = pnand %p6684_p6, %p6678_p0 }
  0x20   : > { %6688 = shalt.err (!%p6685_p8)
}
  0x21   : > { %s6764_s18 = smov 256   ;;  %s6765_s21 = smov 16  }
  0x22   : > { %6122 = dma.hbm_to_vmem [thread:$0]  (!%p6857_p5), %s7452_s2, 16384, %s6849_s22, [#allocation6], %s6764_s18, %s6764_s18, %s6765_s21  }
  0x23   : > { %s6689_s30 = scalar_lea.hbm %s7451_s1, 16384 }
  0x24   : > { %p6690_p9 = scmp.ne.s32.totalorder %s7451_s1, %s6689_s30  ;;  %p6696_p12 = scmp.lt.u32.totalorder %s6689_s30, %s7451_s1 }
  0x26   : > { %p6692_p10 = pnand %p6690_p9, %p6871_p7 }
  0x28   : > { %p6693_p11 = pneg %p6692_p10 }
  0x2a   : > { %p6698_p13 = pnand %p6696_p12, %p6693_p11 }
  0x2c   : > { %6701 = shalt.err (!%p6698_p13)
}
  0x2d   : > { %s6702_s22 = scalar_lea.vmem %s6853_s24, 16384  ;;  %p6710_p6 = scmp.lt.s32.totalorder %s6853_s24, %s6853_s24 }
  0x2e   : > { %p6703_p0 = scmp.ne.s32.totalorder %s6853_s24, %s6702_s22  ;;  %p6711_p8 = scmp.lt.s32.totalorder %s6702_s22, %s6702_s22 }
  0x30   : > { %p6705_p1 = pnand %p6703_p0, %p6871_p7  ;;  %p6712_p9 = por %p6711_p8, %p6710_p6 }
  0x32   : > { %p6706_p4 = pneg %p6705_p1 }
  0x34   : > { %p6713_p10 = pnand %p6712_p9, %p6706_p4 }
  0x36   : > { %6716 = shalt.err (!%p6713_p10)
}
  0x37   : > { %6119 = dma.hbm_to_vmem [thread:$0]  (!%p6857_p5), %s7451_s1, 16384, %s6853_s24, [#allocation4], %s6764_s18, %s6764_s18, %s6765_s21  }
  0x38   : > { %s6717_s29 = scalar_lea.hbm %s7453_s3, 32768 }
  0x39   : > { %p6718_p11 = scmp.ne.s32.totalorder %s7453_s3, %s6717_s29  ;;  %p6724_p0 = scmp.lt.u32.totalorder %s6717_s29, %s7453_s3 }
  0x3b   : > { %p6720_p12 = pnand %p6718_p11, %p6871_p7 }
  0x3d   : > { %p6721_p13 = pneg %p6720_p12 }
  0x3f   : > { %p6726_p1 = pnand %p6724_p0, %p6721_p13 }
  0x41   : > { %6729 = shalt.err (!%p6726_p1)
}
  0x42   : > { %s6730_s24 = scalar_lea.vmem %s6861_s27, 32768  ;;  %p6738_p9 = scmp.lt.s32.totalorder %s6861_s27, %s6861_s27 }
  0x43   : > { %p6731_p4 = scmp.ne.s32.totalorder %s6861_s27, %s6730_s24  ;;  %p6739_p10 = scmp.lt.s32.totalorder %s6730_s24, %s6730_s24 }
  0x45   : > { %p6733_p6 = pnand %p6731_p4, %p6871_p7  ;;  %p6740_p11 = por %p6739_p10, %p6738_p9 }
  0x47   : > { %p6734_p8 = pneg %p6733_p6 }
  0x49   : > { %p6741_p12 = pnand %p6740_p11, %p6734_p8 }
  0x4b   : > { %6744 = shalt.err (!%p6741_p12)
}
  0x4c   : > { %s6766_s18 = smov 512   ;;  %s6767_s21 = smov 32  }
  0x4d   : > { %6125 = dma.hbm_to_vmem [thread:$0]  (!%p6857_p5), %s7453_s3, 32768, %s6861_s27, [#allocation6], %s6766_s18, %s6766_s18, %s6767_s21  }
  0x4e   : > { %377 = sbr.rel (%p6845_p3) target bundleno = 1710 (0x6ae), region = 64 }
  0x55   : > { %6750 = dma.done.wait (%p6126_p2), [#allocation4], 16384  }
  0x56   : > { %6752 = vsyncadd (%p6126_p2), [#allocation4], 4294950912 }
  0x57   : > { %6754 = dma.done.wait (%p6126_p2), [#allocation6], 49152  }
  0x58   : > { %6756 = vsyncadd (%p6126_p2), [#allocation6], 4294918144  ;;  %s5385_s25 = sshll.u32 %s6840_s20, 1  ;;  %v471_v1 = vld [vmem:[#allocation7] sm:$0xff]  ;;  %v472_v3 = vld [vmem:[#allocation7 + $0x8] sm:$0xff]  ;;  %s6768_s23 = smov 36  }
  0x59   : > { %p425_p7 = scmp.lt.s32.totalorder %s5385_s25, 3  ;;  %v475_v2 = vld [vmem:[#allocation7 + $0x20] sm:$0xff]  ;;  %v476_v16 = vld [vmem:[#allocation7 + $0x28] sm:$0xff]  ;;  %vm742_vm0 = vcmask 293888   ;;  %s6769_s26 = smov 12   ;;  %vm3487_vm1 = vcmask 97280  }
  0x5a   : > { %v5388_v7 = vcombine.high %v471_v1, %v475_v2  ;;  %v5387_v8 = vcombine.low %v471_v1, %v475_v2  ;;  %v5390_v18 = vcombine.high %v472_v3, %v476_v16  ;;  %v5389_v19 = vcombine.low %v472_v3, %v476_v16  ;;  %v479_v20 = vld [vmem:[#allocation7 + $0x40] sm:$0xff]  ;;  %v480_v22 = vld [vmem:[#allocation7 + $0x48] sm:$0xff]  ;;  %p431_p2 = scmp.lt.s32.totalorder %s6840_s20, 1 }
  0x5b   : > { %s7466_s25 = smov (!%p425_p7, %s5385_s25), 3  ;;  %v483_v21 = vld [vmem:[#allocation7 + $0x60] sm:$0xff]  ;;  %v484_v25 = vld [vmem:[#allocation7 + $0x68] sm:$0xff]  ;;  %vm5245_vm2 = vcmask 130048   ;;  %vm5294_vm3 = vcmask 122880  }
  0x5c   : > { %s6103_s27 = smul.u32 96, %s7466_s25  ;;  %2031 = vmatprep.subr.bf16.mxu0 %v5388_v7  ;;  %v5396_v24 = vcombine.high %v479_v20, %v483_v21  ;;  %v5395_v26 = vcombine.low %v479_v20, %v483_v21  ;;  %v487_v27 = vld [vmem:[#allocation7 + $0x80] sm:$0xff]  ;;  %2117 = vmatprep.subr.bf16.mxu1 %v5390_v18  ;;  %v5398_v29 = vcombine.high %v480_v22, %v484_v25  ;;  %v488_v31 = vld [vmem:[#allocation7 + $0x88] sm:$0xff]  ;;  %s7468_s20 = smov (!%p431_p2, %s6840_s20), 1 }
  0x5d   : > { %2032 = vmatpush1.bf16.msra.mxu0 %v5387_v8  ;;  %v491_v28 = vld [vmem:[#allocation7 + $0xa0] sm:$0xff]  ;;  %v492_v32 = vld [vmem:[#allocation7 + $0xa8] sm:$0xff]  ;;  %2118 = vmatpush1.bf16.msra.mxu1 %v5389_v19  ;;  %v5397_v34 = vcombine.low %v480_v22, %v484_v25 }
  0x5e   : > { %s6952_s17 = scalar_lea.vmem %s7450_s0, %s6103_s27  ;;  %v5404_v30 = vcombine.high %v487_v27, %v491_v28  ;;  %2033 = vmatprep.subr.bf16.mxu0 %v5396_v24  ;;  %v495_v36 = vld [vmem:[#allocation7 + $0xc0] sm:$0xff]  ;;  %2119 = vmatprep.subr.bf16.mxu1 %v5398_v29  ;;  %v5406_v38 = vcombine.high %v488_v31, %v492_v32  ;;  %v5403_v40 = vcombine.low %v487_v27, %v491_v28  ;;  %v496_v41 = vld [vmem:[#allocation7 + $0xc8] sm:$0xff] }
  0x5f   : > { %v443_v4 = vld [vmem:[%s6952_s17 + $0x40] sm:$0xff]  ;;  %v442_v6 = vld [vmem:[%s6952_s17 + $0x38] sm:$0xff]  ;;  %v444_v11 = vld [vmem:[%s6952_s17 + $0x48] sm:$0xff]  ;;  %v5405_v44 = vcombine.low %v488_v31, %v492_v32 }
  0x60   : > { %v455_v5 = vld [vmem:[%s6952_s17 + $0xa0] sm:$0xff]  ;;  %v454_v10 = vld [vmem:[%s6952_s17 + $0x98] sm:$0xff]  ;;  %v456_v12 = vld [vmem:[%s6952_s17 + $0xa8] sm:$0xff] }
  0x61   : > { %v467_v9 = vpack.c.bf16 %v455_v5, %v443_v4  ;;  %v6960_v13 = vpack.c.bf16 %v454_v10, %v442_v6  ;;  %v445_v14 = vld [vmem:[%s6952_s17 + $0x50] sm:$0xff]  ;;  %v468_v17 = vpack.c.bf16 %v456_v12, %v444_v11  ;;  %v446_v33 = vld [vmem:[%s6952_s17 + $0x58] sm:$0xff]  ;;  %v499_v37 = vld [vmem:[#allocation7 + $0xe0] sm:$0xff]  ;;  %2034 = vmatpush1.bf16.msra.mxu0 %v5395_v26  ;;  %2120 = vmatpush1.bf16.msra.mxu1 %v5397_v34 }
  0x62   : > { %v457_v15 = vld [vmem:[%s6952_s17 + $0xb0] sm:$0xff]  ;;  %v458_v35 = vld [vmem:[%s6952_s17 + $0xb8] sm:$0xff]  ;;  %2035 = vmatprep.subr.bf16.mxu0 %v5404_v30  ;;  %v5412_v43 = vcombine.high %v495_v36, %v499_v37  ;;  %v503_v45 = vld [vmem:[#allocation7 + $0x100] sm:$0xff]  ;;  %2121 = vmatprep.subr.bf16.mxu1 %v5406_v38  ;;  %v5411_v48 = vcombine.low %v495_v36, %v499_v37 }
  0x63   : > { %734 = vrot.lane.b32.xlu0 %v467_v9, %s6768_s23  ;;  %732 = vrot.lane.b32.xlu1 %v6960_v13, %s6768_s23  ;;  %v469_v23 = vpack.c.bf16 %v457_v15, %v445_v14  ;;  %v470_v39 = vpack.c.bf16 %v458_v35, %v446_v33  ;;  %v500_v42 = vld [vmem:[#allocation7 + $0xe8] sm:$0xff]  ;;  %v507_v46 = vld [vmem:[#allocation7 + $0x120] sm:$0xff] }
  0x64   : > { %v5414_v47 = vcombine.high %v496_v41, %v500_v42  ;;  %v504_v49 = vld [vmem:[#allocation7 + $0x108] sm:$0xff]  ;;  %v5420_v51 = vcombine.high %v503_v45, %v507_v46  ;;  %v5413_v52 = vcombine.low %v496_v41, %v500_v42  ;;  %v511_v53 = vld [vmem:[#allocation7 + $0x140] sm:$0xff]  ;;  %v5419_v56 = vcombine.low %v503_v45, %v507_v46 }
  0x65   : > { %2036 = vmatpush1.bf16.msra.mxu0 %v5403_v40  ;;  %v508_v50 = vld [vmem:[#allocation7 + $0x128] sm:$0xff]  ;;  %2122 = vmatpush1.bf16.msra.mxu1 %v5405_v44  ;;  %v515_v54 = vld [vmem:[#allocation7 + $0x160] sm:$0xff] }
  0x66   : > { %2037 = vmatprep.subr.bf16.mxu0 %v5412_v43  ;;  %2123 = vmatprep.subr.bf16.mxu1 %v5414_v47  ;;  %v5422_v55 = vcombine.high %v504_v49, %v508_v50  ;;  %v512_v57 = vld [vmem:[#allocation7 + $0x148] sm:$0xff]  ;;  %v5428_v59 = vcombine.high %v511_v53, %v515_v54  ;;  %v5421_v60 = vcombine.low %v504_v49, %v508_v50  ;;  %v519_v61 = vld [vmem:[#allocation7 + $0x180] sm:$0xff] }
  0x67   : > { %736 = vrot.lane.b32.xlu0 %v468_v17, %s6768_s23  ;;  %738 = vrot.lane.b32.xlu1 %v469_v23, %s6768_s23  ;;  %v516_v58 = vld [vmem:[#allocation7 + $0x168] sm:$0xff]  ;;  %v523_v62 = vld [vmem:[#allocation7 + $0x1a0] sm:$0xff]  ;;  %v5427_v0 = vcombine.low %v511_v53, %v515_v54 }
  0x68   : > { %v5430_v63 = vcombine.high %v512_v57, %v516_v58  ;;  %v520_v1 = vld [vmem:[#allocation7 + $0x188] sm:$0xff]  ;;  %v5436_v3 = vcombine.high %v519_v61, %v523_v62  ;;  %v5429_v4 = vcombine.low %v512_v57, %v516_v58  ;;  %v527_v5 = vld [vmem:[#allocation7 + $0x1c0] sm:$0xff]  ;;  %v5435_v8 = vcombine.low %v519_v61, %v523_v62 }
  0x69   : > { %2038 = vmatpush1.bf16.msra.mxu0 %v5411_v48  ;;  %2124 = vmatpush1.bf16.msra.mxu1 %v5413_v52  ;;  %v524_v2 = vld [vmem:[#allocation7 + $0x1a8] sm:$0xff]  ;;  %v531_v6 = vld [vmem:[#allocation7 + $0x1e0] sm:$0xff] }
  0x6a   : > { %2039 = vmatprep.subr.bf16.mxu0 %v5420_v51  ;;  %2125 = vmatprep.subr.bf16.mxu1 %v5422_v55  ;;  %v5438_v7 = vcombine.high %v520_v1, %v524_v2  ;;  %v528_v9 = vld [vmem:[#allocation7 + $0x1c8] sm:$0xff]  ;;  %v5444_v11 = vcombine.high %v527_v5, %v531_v6  ;;  %v5437_v12 = vcombine.low %v520_v1, %v524_v2  ;;  %v535_v14 = vld [vmem:[#allocation7 + $0x200] sm:$0xff] }
  0x6b   : > { %740 = vrot.lane.b32.xlu0 %v470_v39, %s6768_s23  ;;  %v532_v10 = vld [vmem:[#allocation7 + $0x1e8] sm:$0xff]  ;;  %v539_v15 = vld [vmem:[#allocation7 + $0x220] sm:$0xff]  ;;  %v5443_v17 = vcombine.low %v527_v5, %v531_v6 }
  0x6c   : > { %v5446_v16 = vcombine.high %v528_v9, %v532_v10  ;;  %v536_v18 = vld [vmem:[#allocation7 + $0x208] sm:$0xff]  ;;  %v5452_v20 = vcombine.high %v535_v14, %v539_v15  ;;  %v5445_v21 = vcombine.low %v528_v9, %v532_v10  ;;  %v543_v22 = vld [vmem:[#allocation7 + $0x240] sm:$0xff]  ;;  %v5451_v25 = vcombine.low %v535_v14, %v539_v15 }
  0x6d   : > { %2040 = vmatpush1.bf16.msra.mxu0 %v5419_v56  ;;  %2126 = vmatpush1.bf16.msra.mxu1 %v5421_v60  ;;  %v540_v19 = vld [vmem:[#allocation7 + $0x228] sm:$0xff]  ;;  %v547_v23 = vld [vmem:[#allocation7 + $0x260] sm:$0xff] }
  0x6e   : > { %2041 = vmatprep.subr.bf16.mxu0 %v5428_v59  ;;  %2127 = vmatprep.subr.bf16.mxu1 %v5430_v63  ;;  %v5454_v24 = vcombine.high %v536_v18, %v540_v19  ;;  %v544_v26 = vld [vmem:[#allocation7 + $0x248] sm:$0xff]  ;;  %v5460_v28 = vcombine.high %v543_v22, %v547_v23  ;;  %v5453_v29 = vcombine.low %v536_v18, %v540_v19  ;;  %v551_v30 = vld [vmem:[#allocation7 + $0x280] sm:$0xff] }
  0x6f   : > { %v548_v27 = vld [vmem:[#allocation7 + $0x268] sm:$0xff]  ;;  %v555_v31 = vld [vmem:[#allocation7 + $0x2a0] sm:$0xff]  ;;  %v5459_v33 = vcombine.low %v543_v22, %v547_v23 }
  0x70   : > { %v5462_v32 = vcombine.high %v544_v26, %v548_v27  ;;  %v552_v34 = vld [vmem:[#allocation7 + $0x288] sm:$0xff]  ;;  %v5468_v36 = vcombine.high %v551_v30, %v555_v31  ;;  %v5461_v37 = vcombine.low %v544_v26, %v548_v27  ;;  %v559_v38 = vld [vmem:[#allocation7 + $0x2c0] sm:$0xff]  ;;  %v5467_v43 = vcombine.low %v551_v30, %v555_v31 }
  0x71   : > { %2042 = vmatpush1.bf16.msra.mxu0 %v5427_v0  ;;  %2128 = vmatpush1.bf16.msra.mxu1 %v5429_v4  ;;  %v556_v35 = vld [vmem:[#allocation7 + $0x2a8] sm:$0xff]  ;;  %v563_v39 = vld [vmem:[#allocation7 + $0x2e0] sm:$0xff] }
  0x72   : > { %2043 = vmatprep.subr.bf16.mxu0 %v5436_v3  ;;  %2129 = vmatprep.subr.bf16.mxu1 %v5438_v7  ;;  %v5470_v40 = vcombine.high %v552_v34, %v556_v35  ;;  %v560_v41 = vld [vmem:[#allocation7 + $0x2c8] sm:$0xff]  ;;  %v5476_v44 = vcombine.high %v559_v38, %v563_v39  ;;  %v567_v45 = vld [vmem:[#allocation7 + $0x300] sm:$0xff]  ;;  %v5469_v47 = vcombine.low %v552_v34, %v556_v35 }
  0x73   : > { %v564_v42 = vld [vmem:[#allocation7 + $0x2e8] sm:$0xff]  ;;  %v571_v46 = vld [vmem:[#allocation7 + $0x320] sm:$0xff]  ;;  %v5475_v51 = vcombine.low %v559_v38, %v563_v39 }
  0x74   : > { %v568_v48 = vld [vmem:[#allocation7 + $0x308] sm:$0xff]  ;;  %v5478_v50 = vcombine.high %v560_v41, %v564_v42  ;;  %v5484_v52 = vcombine.high %v567_v45, %v571_v46  ;;  %v575_v53 = vld [vmem:[#allocation7 + $0x340] sm:$0xff]  ;;  %v5477_v55 = vcombine.low %v560_v41, %v564_v42  ;;  %v5483_v59 = vcombine.low %v567_v45, %v571_v46 }
  0x75   : > { %2044 = vmatpush1.bf16.msra.mxu0 %v5435_v8  ;;  %2130 = vmatpush1.bf16.msra.mxu1 %v5437_v12  ;;  %v572_v49 = vld [vmem:[#allocation7 + $0x328] sm:$0xff]  ;;  %v579_v54 = vld [vmem:[#allocation7 + $0x360] sm:$0xff] }
  0x76   : > { %2045 = vmatprep.subr.bf16.mxu0 %v5444_v11  ;;  %2131 = vmatprep.subr.bf16.mxu1 %v5446_v16  ;;  %v576_v56 = vld [vmem:[#allocation7 + $0x348] sm:$0xff]  ;;  %v5486_v58 = vcombine.high %v568_v48, %v572_v49  ;;  %v5492_v60 = vcombine.high %v575_v53, %v579_v54  ;;  %v583_v61 = vld [vmem:[#allocation7 + $0x380] sm:$0xff]  ;;  %v5485_v63 = vcombine.low %v568_v48, %v572_v49 }
  0x77   : > { %v580_v57 = vld [vmem:[#allocation7 + $0x368] sm:$0xff]  ;;  %v587_v62 = vld [vmem:[#allocation7 + $0x3a0] sm:$0xff]  ;;  %v5491_v3 = vcombine.low %v575_v53, %v579_v54 }
  0x78   : > { %v584_v0 = vld [vmem:[#allocation7 + $0x388] sm:$0xff]  ;;  %v5494_v2 = vcombine.high %v576_v56, %v580_v57  ;;  %v5500_v4 = vcombine.high %v583_v61, %v587_v62  ;;  %v591_v5 = vld [vmem:[#allocation7 + $0x3c0] sm:$0xff]  ;;  %v5493_v7 = vcombine.low %v576_v56, %v580_v57  ;;  %v5499_v11 = vcombine.low %v583_v61, %v587_v62 }
  0x79   : > { %2046 = vmatpush1.bf16.msra.mxu0 %v5443_v17  ;;  %2132 = vmatpush1.bf16.msra.mxu1 %v5445_v21  ;;  %v588_v1 = vld [vmem:[#allocation7 + $0x3a8] sm:$0xff]  ;;  %v595_v6 = vld [vmem:[#allocation7 + $0x3e0] sm:$0xff] }
  0x7a   : > { %2047 = vmatprep.subr.bf16.mxu0 %v5452_v20  ;;  %2133 = vmatprep.subr.bf16.mxu1 %v5454_v24  ;;  %v592_v8 = vld [vmem:[#allocation7 + $0x3c8] sm:$0xff]  ;;  %v5502_v10 = vcombine.high %v584_v0, %v588_v1  ;;  %v5508_v12 = vcombine.high %v591_v5, %v595_v6  ;;  %v599_v14 = vld [vmem:[#allocation7 + $0x400] sm:$0xff]  ;;  %v5501_v16 = vcombine.low %v584_v0, %v588_v1 }
  0x7b   : > { %v596_v9 = vld [vmem:[#allocation7 + $0x3e8] sm:$0xff]  ;;  %v603_v15 = vld [vmem:[#allocation7 + $0x420] sm:$0xff]  ;;  %v5507_v20 = vcombine.low %v591_v5, %v595_v6 }
  0x7c   : > { %v600_v17 = vld [vmem:[#allocation7 + $0x408] sm:$0xff]  ;;  %v5510_v19 = vcombine.high %v592_v8, %v596_v9  ;;  %v5516_v21 = vcombine.high %v599_v14, %v603_v15  ;;  %v5509_v22 = vcombine.low %v592_v8, %v596_v9  ;;  %v607_v26 = vld [vmem:[#allocation7 + $0x440] sm:$0xff]  ;;  %v5515_v31 = vcombine.low %v599_v14, %v603_v15 }
  0x7d   : > { %2048 = vmatpush1.bf16.msra.mxu0 %v5451_v25  ;;  %2134 = vmatpush1.bf16.msra.mxu1 %v5453_v29  ;;  %v604_v18 = vld [vmem:[#allocation7 + $0x428] sm:$0xff]  ;;  %v611_v27 = vld [vmem:[#allocation7 + $0x460] sm:$0xff] }
  0x7e   : > { %2049 = vmatprep.subr.bf16.mxu0 %v5460_v28  ;;  %2135 = vmatprep.subr.bf16.mxu1 %v5462_v32  ;;  %v5518_v23 = vcombine.high %v600_v17, %v604_v18  ;;  %v608_v28 = vld [vmem:[#allocation7 + $0x448] sm:$0xff]  ;;  %v5517_v32 = vcombine.low %v600_v17, %v604_v18  ;;  %v5524_v35 = vcombine.high %v607_v26, %v611_v27  ;;  %v619_v38 = vld [vmem:[#allocation7 + $0x4a0] sm:$0xff] }
  0x7f   : > { %v612_v29 = vld [vmem:[#allocation7 + $0x468] sm:$0xff]  ;;  %v623_v45 = vld [vmem:[#allocation7 + $0x4c0] sm:$0xff] }
  0x80   : > { %v616_v39 = vld [vmem:[#allocation7 + $0x488] sm:$0xff]  ;;  %v631_v57 = vld [vmem:[#allocation7 + $0x500] sm:$0xff] }
  0x81   : > { %2050 = vmatpush1.bf16.msra.mxu0 %v5459_v33  ;;  %2136 = vmatpush1.bf16.msra.mxu1 %v5461_v37  ;;  %v615_v37 = vld [vmem:[#allocation7 + $0x480] sm:$0xff]  ;;  %v620_v42 = vld [vmem:[#allocation7 + $0x4a8] sm:$0xff] }
  0x82   : > { %2051 = vmatprep.subr.bf16.mxu0 %v5468_v36  ;;  %2137 = vmatprep.subr.bf16.mxu1 %v5470_v40  ;;  %v5526_v36 = vcombine.high %v608_v28, %v612_v29  ;;  %v5534_v48 = vcombine.high %v616_v39, %v620_v42  ;;  %v5531_v53 = vcombine.low %v615_v37, %v619_v38  ;;  %v639_v1 = vld [vmem:[#allocation7 + $0x540] sm:$0xff] }
  0x83   : > { %v5533_v54 = vcombine.low %v616_v39, %v620_v42  ;;  %v647_v9 = vld [vmem:[#allocation7 + $0x580] sm:$0xff] }
  0x84   : > { %v655_v18 = vld [vmem:[#allocation7 + $0x5c0] sm:$0xff] }
  0x85   : > { %2052 = vmatpush1.bf16.msra.mxu0 %v5467_v43  ;;  %2138 = vmatpush1.bf16.msra.mxu1 %v5469_v47  ;;  %v5523_v43 = vcombine.low %v607_v26, %v611_v27  ;;  %v5532_v47 = vcombine.high %v615_v37, %v619_v38  ;;  %v663_v26 = vld [vmem:[#allocation7 + $0x600] sm:$0xff]  ;;  %v672_v37 = vld [vmem:[#allocation7 + $0x648] sm:$0xff] }
  0x86   : > { %2053 = vmatprep.subr.bf16.mxu0 %v5476_v44  ;;  %2139 = vmatprep.subr.bf16.mxu1 %v5478_v50  ;;  %v5525_v44 = vcombine.low %v608_v28, %v612_v29  ;;  %v627_v50 = vld [vmem:[#allocation7 + $0x4e0] sm:$0xff]  ;;  %v664_v28 = vld [vmem:[#allocation7 + $0x608] sm:$0xff] }
  0x87   : > { %v5539_v61 = vcombine.low %v623_v45, %v627_v50  ;;  %v667_v27 = vld [vmem:[#allocation7 + $0x620] sm:$0xff]  ;;  %v668_v29 = vld [vmem:[#allocation7 + $0x628] sm:$0xff] }
  0x88   : > { %v676_v38 = vld [vmem:[#allocation7 + $0x668] sm:$0xff]  ;;  %v5579_v39 = vcombine.low %v663_v26, %v667_v27  ;;  %v5581_v42 = vcombine.low %v664_v28, %v668_v29 }
  0x89   : > { %2054 = vmatpush1.bf16.msra.mxu0 %v5475_v51  ;;  %2140 = vmatpush1.bf16.msra.mxu1 %v5477_v55  ;;  %v624_v51 = vld [vmem:[#allocation7 + $0x4c8] sm:$0xff]  ;;  %v5540_v55 = vcombine.high %v623_v45, %v627_v50  ;;  %v679_v45 = vld [vmem:[#allocation7 + $0x680] sm:$0xff] }
  0x8a   : > { %2055 = vmatprep.subr.bf16.mxu0 %v5484_v52  ;;  %2141 = vmatprep.subr.bf16.mxu1 %v5486_v58  ;;  %v628_v52 = vld [vmem:[#allocation7 + $0x4e8] sm:$0xff]  ;;  %v635_v58 = vld [vmem:[#allocation7 + $0x520] sm:$0xff] }
  0x8b   : > { %v5542_v56 = vcombine.high %v624_v51, %v628_v52  ;;  %v5541_v62 = vcombine.low %v624_v51, %v628_v52  ;;  %v5547_v5 = vcombine.low %v631_v57, %v635_v58  ;;  %v5589_v51 = vcombine.low %v672_v37, %v676_v38 }
  0x8d   : > { %2056 = vmatpush1.bf16.msra.mxu0 %v5483_v59  ;;  %2142 = vmatpush1.bf16.msra.mxu1 %v5485_v63  ;;  %v632_v59 = vld [vmem:[#allocation7 + $0x508] sm:$0xff]  ;;  %v5548_v63 = vcombine.high %v631_v57, %v635_v58 }
  0x8e   : > { %2057 = vmatprep.subr.bf16.mxu0 %v5492_v60  ;;  %2143 = vmatprep.subr.bf16.mxu1 %v5494_v2  ;;  %v636_v60 = vld [vmem:[#allocation7 + $0x528] sm:$0xff]  ;;  %v643_v2 = vld [vmem:[#allocation7 + $0x560] sm:$0xff] }
  0x8f   : > { %v5550_v0 = vcombine.high %v632_v59, %v636_v60  ;;  %v5549_v6 = vcombine.low %v632_v59, %v636_v60  ;;  %v5555_v14 = vcombine.low %v639_v1, %v643_v2  ;;  %v692_v57 = vld [vmem:[#allocation7 + $0x6e8] sm:$0xff] }
  0x91   : > { %2058 = vmatpush1.bf16.msra.mxu0 %v5491_v3  ;;  %2144 = vmatpush1.bf16.msra.mxu1 %v5493_v7  ;;  %v640_v3 = vld [vmem:[#allocation7 + $0x548] sm:$0xff]  ;;  %v5556_v7 = vcombine.high %v639_v1, %v643_v2 }
  0x92   : > { %2059 = vmatprep.subr.bf16.mxu0 %v5500_v4  ;;  %2145 = vmatprep.subr.bf16.mxu1 %v5502_v10  ;;  %v644_v4 = vld [vmem:[#allocation7 + $0x568] sm:$0xff]  ;;  %v651_v10 = vld [vmem:[#allocation7 + $0x5a0] sm:$0xff] }
  0x93   : > { %v5558_v8 = vcombine.high %v640_v3, %v644_v4  ;;  %v5557_v15 = vcombine.low %v640_v3, %v644_v4  ;;  %v700_v1 = vld [vmem:[#allocation7 + $0x728] sm:$0xff] }
  0x95   : > { %2060 = vmatpush1.bf16.msra.mxu0 %v5499_v11  ;;  %2146 = vmatpush1.bf16.msra.mxu1 %v5501_v16  ;;  %v648_v11 = vld [vmem:[#allocation7 + $0x588] sm:$0xff]  ;;  %v5564_v16 = vcombine.high %v647_v9, %v651_v10 }
  0x96   : > { %2061 = vmatprep.subr.bf16.mxu0 %v5508_v12  ;;  %2147 = vmatprep.subr.bf16.mxu1 %v5510_v19  ;;  %v652_v12 = vld [vmem:[#allocation7 + $0x5a8] sm:$0xff]  ;;  %v659_v19 = vld [vmem:[#allocation7 + $0x5e0] sm:$0xff] }
  0x97   : > { %v5566_v17 = vcombine.high %v648_v11, %v652_v12 }
  0x99   : > { %2062 = vmatpush1.bf16.msra.mxu0 %v5507_v20  ;;  %2148 = vmatpush1.bf16.msra.mxu1 %v5509_v22  ;;  %v656_v20 = vld [vmem:[#allocation7 + $0x5c8] sm:$0xff]  ;;  %v5563_v22 = vcombine.low %v647_v9, %v651_v10 }
  0x9a   : > { %2074 = vmatprep.subr.bf16.mxu0 %v5516_v21  ;;  %2160 = vmatprep.subr.bf16.mxu1 %v5518_v23  ;;  %v660_v21 = vld [vmem:[#allocation7 + $0x5e8] sm:$0xff]  ;;  %v5565_v23 = vcombine.low %v648_v11, %v652_v12 }
  0x9b   : > { %v708_v9 = vld [vmem:[#allocation7 + $0x768] sm:$0xff] }
  0xd5   : > { %v735_v24 = vpop.permute.xlu0 %734  ;;  %v733_v25 = vpop.permute.xlu1 %732 }
  0xd6   : > { %v6976_v40 = vsel %vm742_vm0, %v733_v25, %v735_v24  ;;  %v5574_v25 = vcombine.high %v656_v20, %v660_v21 }
  0xd9   : > { %v737_v30 = vpop.permute.xlu0 %736  ;;  %v739_v34 = vpop.permute.xlu1 %738 }
  0xda   : > { %v6973_v33 = vsel %vm742_vm0, %v735_v24, %v737_v30  ;;  %v6979_v41 = vsel %vm742_vm0, %v737_v30, %v739_v34  ;;  %v5572_v24 = vcombine.high %v655_v18, %v659_v19  ;;  %v5571_v30 = vcombine.low %v655_v18, %v659_v19  ;;  %v716_v18 = vld [vmem:[#allocation7 + $0x7a8] sm:$0xff] }
  0xdb   : > { %2063 = vmatprep.mubr.bf16.mxu0 %v6973_v33  ;;  %2149 = vmatprep.mubr.bf16.mxu1 %v6973_v33 }
  0xdc   : > { %2064 = vmatmul.mubr.bf16.vlgmr.msra.gmra.mrb[0].mxu0 %v6976_v40  ;;  %2150 = vmatmul.mubr.bf16.vlgmr.msra.gmra.mrb[0].mxu1 %v6976_v40 }
  0xdd   : > { %2075 = vmatpush1.bf16.msra.mxu0 %v5515_v31  ;;  %2161 = vmatpush1.bf16.msra.mxu1 %v5517_v32  ;;  %v741_v46 = vpop.permute.xlu0 %740  ;;  %v5573_v31 = vcombine.low %v656_v20, %v660_v21  ;;  %v5580_v32 = vcombine.high %v663_v26, %v667_v27  ;;  %v724_v26 = vld [vmem:[#allocation7 + $0x7e8] sm:$0xff] }
  0xde   : > { %2076 = vmatprep.subr.bf16.mxu0 %v5524_v35  ;;  %2162 = vmatprep.subr.bf16.mxu1 %v5526_v36  ;;  %v6986_v49 = vsel %vm742_vm0, %v739_v34, %v741_v46  ;;  %v5582_v34 = vcombine.high %v664_v28, %v668_v29  ;;  %v671_v35 = vld [vmem:[#allocation7 + $0x640] sm:$0xff] }
  0xdf   : > { %2106 = vmatprep.mubr.bf16.mxu0 %v6986_v49  ;;  %2192 = vmatprep.mubr.bf16.mxu1 %v6986_v49  ;;  %v675_v36 = vld [vmem:[#allocation7 + $0x660] sm:$0xff] }
  0xe0   : > { %v683_v46 = vld [vmem:[#allocation7 + $0x6a0] sm:$0xff]  ;;  %v5587_v50 = vcombine.low %v671_v35, %v675_v36 }
  0xe1   : > { %2077 = vmatpush1.bf16.msra.mxu0 %v5523_v43  ;;  %2163 = vmatpush1.bf16.msra.mxu1 %v5525_v44  ;;  %v5588_v43 = vcombine.high %v671_v35, %v675_v36  ;;  %v5590_v44 = vcombine.high %v672_v37, %v676_v38  ;;  %v5596_v52 = vcombine.high %v679_v45, %v683_v46  ;;  %v478_v35 = vld [vmem:[#allocation7 + $0x38] sm:$0xff] }
  0xe2   : > { %2078 = vmatprep.subr.bf16.mxu0 %v5532_v47  ;;  %2164 = vmatprep.subr.bf16.mxu1 %v5534_v48  ;;  %v680_v47 = vld [vmem:[#allocation7 + $0x688] sm:$0xff]  ;;  %v5595_v58 = vcombine.low %v679_v45, %v683_v46  ;;  %v486_v45 = vld [vmem:[#allocation7 + $0x78] sm:$0xff] }
  0xe3   : > { %v684_v48 = vld [vmem:[#allocation7 + $0x6a8] sm:$0xff] }
  0xe4   : > { %v5597_v59 = vcombine.low %v680_v47, %v684_v48 }
  0xe5   : > { %2079 = vmatpush1.bf16.msra.mxu0 %v5531_v53  ;;  %2165 = vmatpush1.bf16.msra.mxu1 %v5533_v54  ;;  %v5598_v53 = vcombine.high %v680_v47, %v684_v48  ;;  %v687_v54 = vld [vmem:[#allocation7 + $0x6c0] sm:$0xff]  ;;  %v489_v47 = vld [vmem:[#allocation7 + $0x90] sm:$0xff] }
  0xe6   : > { %2080 = vmatprep.subr.bf16.mxu0 %v5540_v55  ;;  %2166 = vmatprep.subr.bf16.mxu1 %v5542_v56  ;;  %v691_v55 = vld [vmem:[#allocation7 + $0x6e0] sm:$0xff]  ;;  %v688_v56 = vld [vmem:[#allocation7 + $0x6c8] sm:$0xff]  ;;  %v493_v48 = vld [vmem:[#allocation7 + $0xb0] sm:$0xff] }
  0xe7   : > { %v5604_v60 = vcombine.high %v687_v54, %v691_v55  ;;  %v5603_v2 = vcombine.low %v687_v54, %v691_v55  ;;  %v5605_v3 = vcombine.low %v688_v56, %v692_v57  ;;  %v494_v54 = vld [vmem:[#allocation7 + $0xb8] sm:$0xff] }
  0xe9   : > { %2081 = vmatpush1.bf16.msra.mxu0 %v5539_v61  ;;  %2167 = vmatpush1.bf16.msra.mxu1 %v5541_v62  ;;  %v5606_v61 = vcombine.high %v688_v56, %v692_v57  ;;  %v695_v62 = vld [vmem:[#allocation7 + $0x700] sm:$0xff]  ;;  %v5408_v57 = vcombine.high %v489_v47, %v493_v48 }
  0xea   : > { %2082 = vmatprep.subr.bf16.mxu0 %v5548_v63  ;;  %2168 = vmatprep.subr.bf16.mxu1 %v5550_v0  ;;  %v699_v63 = vld [vmem:[#allocation7 + $0x720] sm:$0xff]  ;;  %v696_v0 = vld [vmem:[#allocation7 + $0x708] sm:$0xff] }
  0xeb   : > { %v5612_v4 = vcombine.high %v695_v62, %v699_v63  ;;  %v5611_v10 = vcombine.low %v695_v62, %v699_v63  ;;  %v5613_v11 = vcombine.low %v696_v0, %v700_v1  ;;  %v502_v62 = vld [vmem:[#allocation7 + $0xf8] sm:$0xff]  ;;  %v5407_v63 = vcombine.low %v489_v47, %v493_v48 }
  0xec   : > { %v546_v47 = vld [vmem:[#allocation7 + $0x258] sm:$0xff] }
  0xed   : > { %2083 = vmatpush1.bf16.msra.mxu0 %v5547_v5  ;;  %2169 = vmatpush1.bf16.msra.mxu1 %v5549_v6  ;;  %v5614_v5 = vcombine.high %v696_v0, %v700_v1  ;;  %v703_v6 = vld [vmem:[#allocation7 + $0x740] sm:$0xff] }
  0xee   : > { %2084 = vmatprep.subr.bf16.mxu0 %v5556_v7  ;;  %2170 = vmatprep.subr.bf16.mxu1 %v5558_v8  ;;  %v707_v7 = vld [vmem:[#allocation7 + $0x760] sm:$0xff]  ;;  %v704_v8 = vld [vmem:[#allocation7 + $0x748] sm:$0xff] }
  0xef   : > { %v5620_v12 = vcombine.high %v703_v6, %v707_v7  ;;  %v5619_v19 = vcombine.low %v703_v6, %v707_v7  ;;  %v5621_v20 = vcombine.low %v704_v8, %v708_v9 }
  0xf1   : > { %2085 = vmatpush1.bf16.msra.mxu0 %v5555_v14  ;;  %2171 = vmatpush1.bf16.msra.mxu1 %v5557_v15  ;;  %v5622_v14 = vcombine.high %v704_v8, %v708_v9  ;;  %v711_v15 = vld [vmem:[#allocation7 + $0x780] sm:$0xff]  ;;  %v513_v9 = vld [vmem:[#allocation7 + $0x150] sm:$0xff] }
  0xf2   : > { %2086 = vmatprep.subr.bf16.mxu0 %v5564_v16  ;;  %2172 = vmatprep.subr.bf16.mxu1 %v5566_v17  ;;  %v715_v16 = vld [vmem:[#allocation7 + $0x7a0] sm:$0xff]  ;;  %v712_v17 = vld [vmem:[#allocation7 + $0x788] sm:$0xff] }
  0xf3   : > { %v5628_v21 = vcombine.high %v711_v15, %v715_v16  ;;  %v5627_v27 = vcombine.low %v711_v15, %v715_v16  ;;  %v5629_v28 = vcombine.low %v712_v17, %v716_v18 }
  0xf5   : > { %2087 = vmatpush1.bf16.msra.mxu0 %v5563_v22  ;;  %2173 = vmatpush1.bf16.msra.mxu1 %v5565_v23  ;;  %v5630_v22 = vcombine.high %v712_v17, %v716_v18  ;;  %v719_v23 = vld [vmem:[#allocation7 + $0x7c0] sm:$0xff]  ;;  %v521_v18 = vld [vmem:[#allocation7 + $0x190] sm:$0xff] }
  0xf6   : > { %2088 = vmatprep.subr.bf16.mxu0 %v5572_v24  ;;  %2174 = vmatprep.subr.bf16.mxu1 %v5574_v25  ;;  %v723_v24 = vld [vmem:[#allocation7 + $0x7e0] sm:$0xff]  ;;  %v720_v25 = vld [vmem:[#allocation7 + $0x7c8] sm:$0xff] }
  0xf7   : > { %v5636_v29 = vcombine.high %v719_v23, %v723_v24  ;;  %v5635_v36 = vcombine.low %v719_v23, %v723_v24  ;;  %v5637_v37 = vcombine.low %v720_v25, %v724_v26 }
  0xf9   : > { %2089 = vmatpush1.bf16.msra.mxu0 %v5571_v30  ;;  %2175 = vmatpush1.bf16.msra.mxu1 %v5573_v31  ;;  %v5638_v30 = vcombine.high %v720_v25, %v724_v26  ;;  %v473_v31 = vld [vmem:[#allocation7 + $0x10] sm:$0xff] }
  0xfa   : > { %2090 = vmatprep.subr.bf16.mxu0 %v5580_v32  ;;  %2176 = vmatprep.subr.bf16.mxu1 %v5582_v34  ;;  %v477_v32 = vld [vmem:[#allocation7 + $0x30] sm:$0xff]  ;;  %v474_v34 = vld [vmem:[#allocation7 + $0x18] sm:$0xff] }
  0xfb   : > { %v5392_v38 = vcombine.high %v473_v31, %v477_v32  ;;  %v5391_v46 = vcombine.low %v473_v31, %v477_v32  ;;  %v529_v26 = vld [vmem:[#allocation7 + $0x1d0] sm:$0xff] }
  0xfd   : > { %2091 = vmatpush1.bf16.msra.mxu0 %v5579_v39  ;;  %2177 = vmatpush1.bf16.msra.mxu1 %v5581_v42  ;;  %v5394_v39 = vcombine.high %v474_v34, %v478_v35  ;;  %v481_v42 = vld [vmem:[#allocation7 + $0x50] sm:$0xff] }
  0xfe   : > { %2092 = vmatprep.subr.bf16.mxu0 %v5588_v43  ;;  %2178 = vmatprep.subr.bf16.mxu1 %v5590_v44  ;;  %v485_v43 = vld [vmem:[#allocation7 + $0x70] sm:$0xff]  ;;  %v482_v44 = vld [vmem:[#allocation7 + $0x58] sm:$0xff] }
  0xff   : > { %v5399_v55 = vcombine.low %v481_v42, %v485_v43  ;;  %v5401_v56 = vcombine.low %v482_v44, %v486_v45 }
 0x101   : > { %2093 = vmatpush1.bf16.msra.mxu0 %v5587_v50  ;;  %2179 = vmatpush1.bf16.msra.mxu1 %v5589_v51  ;;  %v5393_v50 = vcombine.low %v474_v34, %v478_v35  ;;  %v5400_v51 = vcombine.high %v481_v42, %v485_v43  ;;  %v537_v35 = vld [vmem:[#allocation7 + $0x210] sm:$0xff] }
 0x102   : > { %2094 = vmatprep.subr.bf16.mxu0 %v5596_v52  ;;  %2180 = vmatprep.subr.bf16.mxu1 %v5598_v53  ;;  %v5402_v52 = vcombine.high %v482_v44, %v486_v45  ;;  %v490_v53 = vld [vmem:[#allocation7 + $0x98] sm:$0xff]  ;;  %v545_v45 = vld [vmem:[#allocation7 + $0x250] sm:$0xff] }
 0x103   : > { %v5409_v0 = vcombine.low %v490_v53, %v494_v54 }
 0x105   : > { %2095 = vmatpush1.bf16.msra.mxu0 %v5595_v58  ;;  %2181 = vmatpush1.bf16.msra.mxu1 %v5597_v59  ;;  %v497_v58 = vld [vmem:[#allocation7 + $0xd0] sm:$0xff] }
 0x106   : > { %2096 = vmatprep.subr.bf16.mxu0 %v5604_v60  ;;  %2182 = vmatprep.subr.bf16.mxu1 %v5606_v61  ;;  %v501_v59 = vld [vmem:[#allocation7 + $0xf0] sm:$0xff]  ;;  %v498_v60 = vld [vmem:[#allocation7 + $0xd8] sm:$0xff]  ;;  %v5410_v61 = vcombine.high %v490_v53, %v494_v54 }
 0x107   : > { %v5416_v1 = vcombine.high %v497_v58, %v501_v59  ;;  %v5415_v6 = vcombine.low %v497_v58, %v501_v59  ;;  %v5417_v7 = vcombine.low %v498_v60, %v502_v62  ;;  %v553_v54 = vld [vmem:[#allocation7 + $0x290] sm:$0xff]  ;;  %v558_v58 = vld [vmem:[#allocation7 + $0x2b8] sm:$0xff] }
 0x109   : > { %2097 = vmatpush1.bf16.msra.mxu0 %v5603_v2  ;;  %2183 = vmatpush1.bf16.msra.mxu1 %v5605_v3  ;;  %v505_v2 = vld [vmem:[#allocation7 + $0x110] sm:$0xff] }
 0x10a   : > { %2098 = vmatprep.subr.bf16.mxu0 %v5612_v4  ;;  %2184 = vmatprep.subr.bf16.mxu1 %v5614_v5  ;;  %v509_v3 = vld [vmem:[#allocation7 + $0x130] sm:$0xff]  ;;  %v506_v4 = vld [vmem:[#allocation7 + $0x118] sm:$0xff] }
 0x10b   : > { %v510_v5 = vld [vmem:[#allocation7 + $0x138] sm:$0xff]  ;;  %v5424_v8 = vcombine.high %v505_v2, %v509_v3  ;;  %v5423_v15 = vcombine.low %v505_v2, %v509_v3 }
 0x10c   : > { %v5425_v16 = vcombine.low %v506_v4, %v510_v5  ;;  %v566_v2 = vld [vmem:[#allocation7 + $0x2f8] sm:$0xff] }
 0x10d   : > { %2099 = vmatpush1.bf16.msra.mxu0 %v5611_v10  ;;  %2185 = vmatpush1.bf16.msra.mxu1 %v5613_v11  ;;  %v517_v10 = vld [vmem:[#allocation7 + $0x170] sm:$0xff]  ;;  %v514_v11 = vld [vmem:[#allocation7 + $0x158] sm:$0xff] }
 0x10e   : > { %2100 = vmatprep.subr.bf16.mxu0 %v5620_v12  ;;  %2186 = vmatprep.subr.bf16.mxu1 %v5622_v14  ;;  %v5426_v12 = vcombine.high %v506_v4, %v510_v5  ;;  %v518_v14 = vld [vmem:[#allocation7 + $0x178] sm:$0xff]  ;;  %v5432_v17 = vcombine.high %v513_v9, %v517_v10  ;;  %v5431_v23 = vcombine.low %v513_v9, %v517_v10  ;;  %v569_v5 = vld [vmem:[#allocation7 + $0x310] sm:$0xff] }
 0x10f   : > { %v5433_v24 = vcombine.low %v514_v11, %v518_v14  ;;  %v574_v9 = vld [vmem:[#allocation7 + $0x338] sm:$0xff] }
 0x111   : > { %2101 = vmatpush1.bf16.msra.mxu0 %v5619_v19  ;;  %2187 = vmatpush1.bf16.msra.mxu1 %v5621_v20  ;;  %v525_v19 = vld [vmem:[#allocation7 + $0x1b0] sm:$0xff]  ;;  %v522_v20 = vld [vmem:[#allocation7 + $0x198] sm:$0xff] }
 0x112   : > { %2102 = vmatprep.subr.bf16.mxu0 %v5628_v21  ;;  %2188 = vmatprep.subr.bf16.mxu1 %v5630_v22  ;;  %v5434_v21 = vcombine.high %v514_v11, %v518_v14  ;;  %v526_v22 = vld [vmem:[#allocation7 + $0x1b8] sm:$0xff]  ;;  %v5440_v25 = vcombine.high %v521_v18, %v525_v19  ;;  %v5439_v31 = vcombine.low %v521_v18, %v525_v19 }
 0x113   : > { %v5441_v32 = vcombine.low %v522_v20, %v526_v22  ;;  %v582_v18 = vld [vmem:[#allocation7 + $0x378] sm:$0xff] }
 0x115   : > { %2103 = vmatpush1.bf16.msra.mxu0 %v5627_v27  ;;  %2189 = vmatpush1.bf16.msra.mxu1 %v5629_v28  ;;  %v533_v27 = vld [vmem:[#allocation7 + $0x1f0] sm:$0xff]  ;;  %v530_v28 = vld [vmem:[#allocation7 + $0x1d8] sm:$0xff] }
 0x116   : > { %2104 = vmatprep.subr.bf16.mxu0 %v5636_v29  ;;  %2190 = vmatprep.subr.bf16.mxu1 %v5638_v30  ;;  %v5442_v29 = vcombine.high %v522_v20, %v526_v22  ;;  %v534_v30 = vld [vmem:[#allocation7 + $0x1f8] sm:$0xff]  ;;  %v5448_v34 = vcombine.high %v529_v26, %v533_v27  ;;  %v5447_v42 = vcombine.low %v529_v26, %v533_v27 }
 0x117   : > { %v5449_v43 = vcombine.low %v530_v28, %v534_v30  ;;  %v590_v26 = vld [vmem:[#allocation7 + $0x3b8] sm:$0xff] }
 0x119   : > { %2105 = vmatpush1.bf16.msra.mxu0 %v5635_v36  ;;  %2191 = vmatpush1.bf16.msra.mxu1 %v5637_v37  ;;  %v541_v36 = vld [vmem:[#allocation7 + $0x230] sm:$0xff]  ;;  %v538_v37 = vld [vmem:[#allocation7 + $0x218] sm:$0xff] }
 0x11a   : > { %2203 = vmatprep.subr.bf16.mxu0 %v5392_v38  ;;  %2289 = vmatprep.subr.bf16.mxu1 %v5394_v39  ;;  %v5450_v38 = vcombine.high %v530_v28, %v534_v30  ;;  %v542_v39 = vld [vmem:[#allocation7 + $0x238] sm:$0xff]  ;;  %v5456_v44 = vcombine.high %v537_v35, %v541_v36 }
 0x11b   : > { %v5458_v48 = vcombine.high %v538_v37, %v542_v39 }
 0x11c   : > { %2107 = vmatmul.mubr.bf16.vlgmr.msra.gmra.mrb[0].mxu0 %v6979_v41  ;;  %2193 = vmatmul.mubr.bf16.vlgmr.msra.gmra.mrb[0].mxu1 %v6979_v41 }
 0x11d   : > { %2204 = vmatpush1.bf16.msra.mxu0 %v5391_v46  ;;  %2235 = vmatprep.mubr.bf16.mxu0 %v6973_v33  ;;  %v549_v46 = vld [vmem:[#allocation7 + $0x270] sm:$0xff] }
 0x11e   : > { %2290 = vmatpush1.bf16.msra.mxu1 %v5393_v50  ;;  %2321 = vmatprep.mubr.bf16.mxu1 %v6973_v33  ;;  %v5418_v33 = vcombine.high %v498_v60, %v502_v62  ;;  %v550_v50 = vld [vmem:[#allocation7 + $0x278] sm:$0xff]  ;;  %v5464_v53 = vcombine.high %v545_v45, %v549_v46  ;;  %v5463_v59 = vcombine.low %v545_v45, %v549_v46  ;;  %v561_v62 = vld [vmem:[#allocation7 + $0x2d0] sm:$0xff] }
 0x11f   : > { %2205 = vmatprep.subr.bf16.mxu0 %v5400_v51  ;;  %2291 = vmatprep.subr.bf16.mxu1 %v5402_v52  ;;  %v5455_v51 = vcombine.low %v537_v35, %v541_v36  ;;  %v5457_v52 = vcombine.low %v538_v37, %v542_v39  ;;  %v5465_v60 = vcombine.low %v546_v47, %v550_v50  ;;  %v598_v35 = vld [vmem:[#allocation7 + $0x3f8] sm:$0xff] }
 0x120   : > { %v606_v45 = vld [vmem:[#allocation7 + $0x438] sm:$0xff] }
 0x121   : > { %2206 = vmatpush1.bf16.msra.mxu0 %v5399_v55  ;;  %v557_v55 = vld [vmem:[#allocation7 + $0x2b0] sm:$0xff] }
 0x122   : > { %2292 = vmatpush1.bf16.msra.mxu1 %v5401_v56  ;;  %2207 = vmatprep.subr.bf16.mxu0 %v5408_v57  ;;  %v554_v56 = vld [vmem:[#allocation7 + $0x298] sm:$0xff]  ;;  %v5466_v57 = vcombine.high %v546_v47, %v550_v50  ;;  %v5471_v3 = vcombine.low %v553_v54, %v557_v55 }
 0x123   : > { %2293 = vmatprep.subr.bf16.mxu1 %v5410_v61  ;;  %v5472_v61 = vcombine.high %v553_v54, %v557_v55  ;;  %v5473_v4 = vcombine.low %v554_v56, %v558_v58  ;;  %v610_v54 = vld [vmem:[#allocation7 + $0x458] sm:$0xff] }
 0x124   : > { %v614_v55 = vld [vmem:[#allocation7 + $0x478] sm:$0xff] }
 0x125   : > { %2208 = vmatpush1.bf16.msra.mxu0 %v5407_v63  ;;  %v565_v63 = vld [vmem:[#allocation7 + $0x2f0] sm:$0xff] }
 0x126   : > { %2294 = vmatpush1.bf16.msra.mxu1 %v5409_v0  ;;  %2209 = vmatprep.subr.bf16.mxu0 %v5416_v1  ;;  %v562_v0 = vld [vmem:[#allocation7 + $0x2d8] sm:$0xff]  ;;  %v5474_v1 = vcombine.high %v554_v56, %v558_v58  ;;  %v5479_v10 = vcombine.low %v561_v62, %v565_v63  ;;  %v617_v58 = vld [vmem:[#allocation7 + $0x490] sm:$0xff] }
 0x127   : > { %2295 = vmatprep.subr.bf16.mxu1 %v5418_v33  ;;  %v5480_v33 = vcombine.high %v561_v62, %v565_v63  ;;  %v5481_v11 = vcombine.low %v562_v0, %v566_v2  ;;  %v622_v62 = vld [vmem:[#allocation7 + $0x4b8] sm:$0xff] }
 0x129   : > { %2210 = vmatpush1.bf16.msra.mxu0 %v5415_v6  ;;  %v573_v6 = vld [vmem:[#allocation7 + $0x330] sm:$0xff] }
 0x12a   : > { %2296 = vmatpush1.bf16.msra.mxu1 %v5417_v7  ;;  %2211 = vmatprep.subr.bf16.mxu0 %v5424_v8  ;;  %v570_v7 = vld [vmem:[#allocation7 + $0x318] sm:$0xff]  ;;  %v5482_v8 = vcombine.high %v562_v0, %v566_v2  ;;  %v5487_v19 = vcombine.low %v569_v5, %v573_v6  ;;  %v5529_v0 = vcombine.low %v610_v54, %v614_v55  ;;  %v625_v2 = vld [vmem:[#allocation7 + $0x4d0] sm:$0xff] }
 0x12b   : > { %2297 = vmatprep.subr.bf16.mxu1 %v5426_v12  ;;  %v5488_v12 = vcombine.high %v569_v5, %v573_v6  ;;  %v5490_v14 = vcombine.high %v570_v7, %v574_v9  ;;  %v5489_v20 = vcombine.low %v570_v7, %v574_v9  ;;  %v451_v5 = vld [vmem:[%s6952_s17 + $0x80] sm:$0xff] }
 0x12c   : > { %v626_v6 = vld [vmem:[#allocation7 + $0x4d8] sm:$0xff] }
 0x12d   : > { %2212 = vmatpush1.bf16.msra.mxu0 %v5423_v15  ;;  %v577_v15 = vld [vmem:[#allocation7 + $0x350] sm:$0xff] }
 0x12e   : > { %2298 = vmatpush1.bf16.msra.mxu1 %v5425_v16  ;;  %2213 = vmatprep.subr.bf16.mxu0 %v5432_v17  ;;  %v581_v16 = vld [vmem:[#allocation7 + $0x370] sm:$0xff]  ;;  %v578_v17 = vld [vmem:[#allocation7 + $0x358] sm:$0xff] }
 0x12f   : > { %2299 = vmatprep.subr.bf16.mxu1 %v5434_v21  ;;  %v5496_v21 = vcombine.high %v577_v15, %v581_v16  ;;  %v5498_v22 = vcombine.high %v578_v17, %v582_v18  ;;  %v5495_v27 = vcombine.low %v577_v15, %v581_v16  ;;  %v5497_v28 = vcombine.low %v578_v17, %v582_v18  ;;  %v637_v15 = vld [vmem:[#allocation7 + $0x530] sm:$0xff]  ;;  %v634_v16 = vld [vmem:[#allocation7 + $0x518] sm:$0xff] }
 0x130   : > { %v638_v18 = vld [vmem:[#allocation7 + $0x538] sm:$0xff] }
 0x131   : > { %2214 = vmatpush1.bf16.msra.mxu0 %v5431_v23  ;;  %v585_v23 = vld [vmem:[#allocation7 + $0x390] sm:$0xff] }
 0x132   : > { %2300 = vmatpush1.bf16.msra.mxu1 %v5433_v24  ;;  %2215 = vmatprep.subr.bf16.mxu0 %v5440_v25  ;;  %v589_v24 = vld [vmem:[#allocation7 + $0x3b0] sm:$0xff]  ;;  %v586_v25 = vld [vmem:[#allocation7 + $0x398] sm:$0xff] }
 0x133   : > { %2301 = vmatprep.subr.bf16.mxu1 %v5442_v29  ;;  %v5504_v29 = vcombine.high %v585_v23, %v589_v24  ;;  %v5506_v30 = vcombine.high %v586_v25, %v590_v26  ;;  %v5503_v36 = vcombine.low %v585_v23, %v589_v24  ;;  %v5505_v37 = vcombine.low %v586_v25, %v590_v26  ;;  %v441_v25 = vld [vmem:[%s6952_s17 + $0x30] sm:$0xff] }
 0x134   : > { %v453_v26 = vld [vmem:[%s6952_s17 + $0x90] sm:$0xff] }
 0x135   : > { %2216 = vmatpush1.bf16.msra.mxu0 %v5439_v31  ;;  %v593_v31 = vld [vmem:[#allocation7 + $0x3d0] sm:$0xff] }
 0x136   : > { %2302 = vmatpush1.bf16.msra.mxu1 %v5441_v32  ;;  %2217 = vmatprep.subr.bf16.mxu0 %v5448_v34  ;;  %v597_v32 = vld [vmem:[#allocation7 + $0x3f0] sm:$0xff]  ;;  %v594_v34 = vld [vmem:[#allocation7 + $0x3d8] sm:$0xff] }
 0x137   : > { %2303 = vmatprep.subr.bf16.mxu1 %v5450_v38  ;;  %v5512_v38 = vcombine.high %v593_v31, %v597_v32  ;;  %v5514_v39 = vcombine.high %v594_v34, %v598_v35  ;;  %v5511_v46 = vcombine.low %v593_v31, %v597_v32  ;;  %v5513_v47 = vcombine.low %v594_v34, %v598_v35  ;;  %v642_v31 = vld [vmem:[#allocation7 + $0x558] sm:$0xff] }
 0x138   : > { %v646_v32 = vld [vmem:[#allocation7 + $0x578] sm:$0xff]  ;;  %v5553_v35 = vcombine.low %v634_v16, %v638_v18 }
 0x139   : > { %2218 = vmatpush1.bf16.msra.mxu0 %v5447_v42  ;;  %v601_v42 = vld [vmem:[#allocation7 + $0x410] sm:$0xff] }
 0x13a   : > { %2304 = vmatpush1.bf16.msra.mxu1 %v5449_v43  ;;  %2219 = vmatprep.subr.bf16.mxu0 %v5456_v44  ;;  %v605_v43 = vld [vmem:[#allocation7 + $0x430] sm:$0xff]  ;;  %v602_v44 = vld [vmem:[#allocation7 + $0x418] sm:$0xff] }
 0x13b   : > { %2305 = vmatprep.subr.bf16.mxu1 %v5458_v48  ;;  %v5520_v48 = vcombine.high %v601_v42, %v605_v43  ;;  %v5522_v50 = vcombine.high %v602_v44, %v606_v45  ;;  %v5521_v56 = vcombine.low %v602_v44, %v606_v45  ;;  %v5561_v45 = vcombine.low %v642_v31, %v646_v32 }
 0x13d   : > { %2220 = vmatpush1.bf16.msra.mxu0 %v5455_v51  ;;  %v609_v51 = vld [vmem:[#allocation7 + $0x450] sm:$0xff] }
 0x13e   : > { %2306 = vmatpush1.bf16.msra.mxu1 %v5457_v52  ;;  %2221 = vmatprep.subr.bf16.mxu0 %v5464_v53  ;;  %v613_v52 = vld [vmem:[#allocation7 + $0x470] sm:$0xff]  ;;  %v5519_v53 = vcombine.low %v601_v42, %v605_v43  ;;  %v650_v42 = vld [vmem:[#allocation7 + $0x598] sm:$0xff] }
 0x13f   : > { %2307 = vmatprep.subr.bf16.mxu1 %v5466_v57  ;;  %v5528_v57 = vcombine.high %v609_v51, %v613_v52  ;;  %v5527_v63 = vcombine.low %v609_v51, %v613_v52  ;;  %v654_v43 = vld [vmem:[#allocation7 + $0x5b8] sm:$0xff] }
 0x140   : > { %v658_v51 = vld [vmem:[#allocation7 + $0x5d8] sm:$0xff] }
 0x141   : > { %2222 = vmatpush1.bf16.msra.mxu0 %v5463_v59  ;;  %v621_v59 = vld [vmem:[#allocation7 + $0x4b0] sm:$0xff]  ;;  %v662_v52 = vld [vmem:[#allocation7 + $0x5f8] sm:$0xff] }
 0x142   : > { %2308 = vmatpush1.bf16.msra.mxu1 %v5465_v60  ;;  %2223 = vmatprep.subr.bf16.mxu0 %v5472_v61  ;;  %v5530_v60 = vcombine.high %v610_v54, %v614_v55  ;;  %v618_v61 = vld [vmem:[#allocation7 + $0x498] sm:$0xff]  ;;  %v5569_v54 = vcombine.low %v650_v42, %v654_v43  ;;  %v5578_v55 = vcombine.high %v658_v51, %v662_v52 }
 0x143   : > { %2309 = vmatprep.subr.bf16.mxu1 %v5474_v1  ;;  %v5536_v1 = vcombine.high %v617_v58, %v621_v59  ;;  %v5537_v9 = vcombine.low %v618_v61, %v622_v62 }
 0x145   : > { %2224 = vmatpush1.bf16.msra.mxu0 %v5471_v3  ;;  %v5538_v3 = vcombine.high %v618_v61, %v622_v62  ;;  %v5577_v61 = vcombine.low %v658_v51, %v662_v52  ;;  %v721_v51 = vld [vmem:[#allocation7 + $0x7d0] sm:$0xff] }
 0x146   : > { %2310 = vmatpush1.bf16.msra.mxu1 %v5473_v4  ;;  %2225 = vmatprep.subr.bf16.mxu0 %v5480_v33  ;;  %v629_v4 = vld [vmem:[#allocation7 + $0x4f0] sm:$0xff]  ;;  %v439_v33 = vld [vmem:[%s6952_s17 + $0x20] sm:$0xff] }
 0x147   : > { %2311 = vmatprep.subr.bf16.mxu1 %v5482_v8  ;;  %v463_v7 = vpack.c.bf16 %v451_v5, %v439_v33  ;;  %v5535_v8 = vcombine.low %v617_v58, %v621_v59  ;;  %v666_v58 = vld [vmem:[#allocation7 + $0x618] sm:$0xff]  ;;  %v725_v52 = vld [vmem:[#allocation7 + $0x7f0] sm:$0xff] }
 0x148   : > { %v670_v59 = vld [vmem:[#allocation7 + $0x638] sm:$0xff] }
 0x149   : > { %2226 = vmatpush1.bf16.msra.mxu0 %v5479_v10  ;;  %v5544_v10 = vcombine.high %v625_v2, %v629_v4  ;;  %3479 = vrot.lane.b32.xlu1 %v463_v7, %s6769_s26  ;;  %v5585_v33 = vcombine.low %v666_v58, %v670_v59  ;;  %v685_v7 = vld [vmem:[#allocation7 + $0x6b0] sm:$0xff] }
 0x14a   : > { %2312 = vmatpush1.bf16.msra.mxu1 %v5481_v11  ;;  %2227 = vmatprep.subr.bf16.mxu0 %v5488_v12  ;;  %v452_v11 = vld [vmem:[%s6952_s17 + $0x88] sm:$0xff] }
 0x14b   : > { %2313 = vmatprep.subr.bf16.mxu1 %v5490_v14  ;;  %v633_v14 = vld [vmem:[#allocation7 + $0x510] sm:$0xff] }
 0x14c   : > { %v5552_v24 = vcombine.high %v633_v14, %v637_v15  ;;  %v5551_v34 = vcombine.low %v633_v14, %v637_v15  ;;  %v689_v14 = vld [vmem:[#allocation7 + $0x6d0] sm:$0xff] }
 0x14d   : > { %2228 = vmatpush1.bf16.msra.mxu0 %v5487_v19  ;;  %v438_v19 = vld [vmem:[%s6952_s17 + $0x18] sm:$0xff] }
 0x14e   : > { %2314 = vmatpush1.bf16.msra.mxu1 %v5489_v20  ;;  %2229 = vmatprep.subr.bf16.mxu0 %v5496_v21  ;;  %v450_v20 = vld [vmem:[%s6952_s17 + $0x78] sm:$0xff]  ;;  %v5543_v21 = vcombine.low %v625_v2, %v629_v4 }
 0x14f   : > { %2315 = vmatprep.subr.bf16.mxu1 %v5498_v22  ;;  %v7006_v22 = vpack.c.bf16 %v450_v20, %v438_v19  ;;  %v674_v2 = vld [vmem:[#allocation7 + $0x658] sm:$0xff]  ;;  %v693_v15 = vld [vmem:[#allocation7 + $0x6f0] sm:$0xff] }
 0x150   : > { %v5608_v20 = vcombine.high %v689_v14, %v693_v15 }
 0x151   : > { %2230 = vmatpush1.bf16.msra.mxu0 %v5495_v27  ;;  %v5554_v27 = vcombine.high %v634_v16, %v638_v18  ;;  %3477 = vrot.lane.b32.xlu1 %v7006_v22, %s6769_s26  ;;  %v690_v16 = vld [vmem:[#allocation7 + $0x6d8] sm:$0xff] }
 0x152   : > { %2316 = vmatpush1.bf16.msra.mxu1 %v5497_v28  ;;  %2231 = vmatprep.subr.bf16.mxu0 %v5504_v29  ;;  %v641_v28 = vld [vmem:[#allocation7 + $0x550] sm:$0xff] }
 0x153   : > { %2317 = vmatprep.subr.bf16.mxu1 %v5506_v30  ;;  %v645_v29 = vld [vmem:[#allocation7 + $0x570] sm:$0xff]  ;;  %v465_v30 = vpack.c.bf16 %v453_v26, %v441_v25  ;;  %v698_v25 = vld [vmem:[#allocation7 + $0x718] sm:$0xff] }
 0x154   : > { %v5559_v44 = vcombine.low %v641_v28, %v645_v29  ;;  %v702_v26 = vld [vmem:[#allocation7 + $0x738] sm:$0xff] }
 0x155   : > { %2232 = vmatpush1.bf16.msra.mxu0 %v5503_v36  ;;  %v5560_v36 = vcombine.high %v641_v28, %v645_v29  ;;  %3485 = vrot.lane.b32.xlu1 %v6960_v13, %s6769_s26 }
 0x156   : > { %2318 = vmatpush1.bf16.msra.mxu1 %v5505_v37  ;;  %2233 = vmatprep.subr.bf16.mxu0 %v5512_v38  ;;  %v5562_v37 = vcombine.high %v642_v31, %v646_v32  ;;  %v649_v38 = vld [vmem:[#allocation7 + $0x590] sm:$0xff] }
 0x157   : > { %2319 = vmatprep.subr.bf16.mxu1 %v5514_v39  ;;  %v653_v39 = vld [vmem:[#allocation7 + $0x5b0] sm:$0xff] }
 0x158   : > { %v705_v31 = vld [vmem:[#allocation7 + $0x750] sm:$0xff] }
 0x159   : > { %2234 = vmatpush1.bf16.msra.mxu0 %v5511_v46  ;;  %v5568_v46 = vcombine.high %v649_v38, %v653_v39  ;;  %v709_v32 = vld [vmem:[#allocation7 + $0x770] sm:$0xff] }
 0x15a   : > { %2320 = vmatpush1.bf16.msra.mxu1 %v5513_v47  ;;  %2246 = vmatprep.subr.bf16.mxu0 %v5520_v48  ;;  %v5570_v47 = vcombine.high %v650_v42, %v654_v43  ;;  %v657_v48 = vld [vmem:[#allocation7 + $0x5d0] sm:$0xff] }
 0x15b   : > { %2332 = vmatprep.subr.bf16.mxu1 %v5522_v50  ;;  %v661_v50 = vld [vmem:[#allocation7 + $0x5f0] sm:$0xff] }
 0x15c   : > { %2236 = vmatmul.mubr.bf16.vlgmr.msra.gmra.mrb[4].mxu0 %v6976_v40  ;;  %v5576_v13 = vcombine.high %v657_v48, %v661_v50  ;;  %v713_v42 = vld [vmem:[#allocation7 + $0x790] sm:$0xff] }
 0x15d   : > { %2322 = vmatmul.mubr.bf16.vlgmr.msra.gmra.mrb[4].mxu1 %v6976_v40  ;;  %2247 = vmatpush1.bf16.msra.mxu0 %v5519_v53  ;;  %v630_v40 = vld [vmem:[#allocation7 + $0x4f8] sm:$0xff]  ;;  %v5567_v53 = vcombine.low %v649_v38, %v653_v39  ;;  %v5624_v38 = vcombine.high %v705_v31, %v709_v32  ;;  %v717_v43 = vld [vmem:[#allocation7 + $0x7b0] sm:$0xff] }
 0x15e   : > { %2278 = vmatprep.mubr.bf16.mxu0 %v6986_v49  ;;  %2333 = vmatpush1.bf16.msra.mxu1 %v5521_v56  ;;  %v5546_v12 = vcombine.high %v626_v6, %v630_v40  ;;  %v5545_v23 = vcombine.low %v626_v6, %v630_v40  ;;  %v665_v56 = vld [vmem:[#allocation7 + $0x610] sm:$0xff] }
 0x15f   : > { %2364 = vmatprep.mubr.bf16.mxu1 %v6986_v49  ;;  %2248 = vmatprep.subr.bf16.mxu0 %v5528_v57  ;;  %v440_v49 = vld [vmem:[%s6952_s17 + $0x28] sm:$0xff]  ;;  %v669_v57 = vld [vmem:[#allocation7 + $0x630] sm:$0xff] }
 0x160   : > { %2334 = vmatprep.subr.bf16.mxu1 %v5530_v60  ;;  %v464_v17 = vpack.c.bf16 %v452_v11, %v440_v49  ;;  %v5575_v60 = vcombine.low %v657_v48, %v661_v50  ;;  %v5584_v62 = vcombine.high %v665_v56, %v669_v57  ;;  %v5583_v4 = vcombine.low %v665_v56, %v669_v57  ;;  %v681_v40 = vld [vmem:[#allocation7 + $0x690] sm:$0xff] }
 0x161   : > { %2249 = vmatpush1.bf16.msra.mxu0 %v5527_v63  ;;  %v5586_v63 = vcombine.high %v666_v58, %v670_v59  ;;  %v5600_v11 = vcombine.high %v681_v40, %v685_v7  ;;  %v5599_v18 = vcombine.low %v681_v40, %v685_v7  ;;  %v5632_v48 = vcombine.high %v713_v42, %v717_v43  ;;  %v6170_v40 = vld [vmem:[#allocation3 + $0x4c] ss:$16 sps:$4 sm:$0xff]   ;;  %v6165_v7 = vld [vmem:[#allocation3 + $0x40] ss:$16 sps:$4 sm:$0xff]  }
 0x162   : > { %2335 = vmatpush1.bf16.msra.mxu1 %v5529_v0  ;;  %2250 = vmatprep.subr.bf16.mxu0 %v5536_v1  ;;  %v673_v0 = vld [vmem:[#allocation7 + $0x650] sm:$0xff]  ;;  %v5640_v56 = vcombine.high %v721_v51, %v725_v52  ;;  %v5639_v58 = vcombine.low %v721_v51, %v725_v52  ;;  %v6228_v52 = vld [vmem:[#allocation3 + $0x188] ss:$16 sps:$4 sm:$0xff]  }
 0x163   : > { %2336 = vmatprep.subr.bf16.mxu1 %v5538_v3  ;;  %3481 = vrot.lane.b32.xlu0 %v464_v17, %s6769_s26  ;;  %v677_v1 = vld [vmem:[#allocation7 + $0x670] sm:$0xff]  ;;  %v678_v3 = vld [vmem:[#allocation7 + $0x678] sm:$0xff] }
 0x164   : > { %v5592_v5 = vcombine.high %v673_v0, %v677_v1  ;;  %v5594_v6 = vcombine.high %v674_v2, %v678_v3  ;;  %v5593_v49 = vcombine.low %v674_v2, %v678_v3  ;;  %v694_v17 = vld [vmem:[#allocation7 + $0x6f8] sm:$0xff]  ;;  %v6161_v2 = vld [vmem:[#allocation3 + $0x24] ss:$16 sps:$4 sm:$0xff]   ;;  %v6225_v51 = vld [vmem:[#allocation3 + $0x180] ss:$16 sps:$4 sm:$0xff]  }
 0x165   : > { %2251 = vmatpush1.bf16.msra.mxu0 %v5535_v8  ;;  %v682_v8 = vld [vmem:[#allocation7 + $0x698] sm:$0xff]  ;;  %v5609_v28 = vcombine.low %v690_v16, %v694_v17 }
 0x166   : > { %2337 = vmatpush1.bf16.msra.mxu1 %v5537_v9  ;;  %2252 = vmatprep.subr.bf16.mxu0 %v5544_v10  ;;  %v686_v9 = vld [vmem:[#allocation7 + $0x6b8] sm:$0xff]  ;;  %v5591_v10 = vcombine.low %v673_v0, %v677_v1  ;;  %v6153_v0 = vld [vmem:[#allocation3] ss:$16 sps:$4 sm:$0xff]  }
 0x167   : > { %2338 = vmatprep.subr.bf16.mxu1 %v5546_v12  ;;  %3483 = vrot.lane.b32.xlu0 %v465_v30, %s6769_s26  ;;  %v5602_v12 = vcombine.high %v682_v8, %v686_v9  ;;  %v5601_v19 = vcombine.low %v682_v8, %v686_v9  ;;  %v5618_v30 = vcombine.high %v698_v25, %v702_v26  ;;  %v6156_v1 = vld [vmem:[#allocation3 + $0x8] ss:$16 sps:$4 sm:$0xff]   ;;  %v6164_v3 = vld [vmem:[#allocation3 + $0x2c] ss:$16 sps:$4 sm:$0xff]   ;;  %v6173_v9 = vld [vmem:[#allocation3 + $0x64] ss:$16 sps:$4 sm:$0xff]  }
 0x168   : > { %v6168_v8 = vld [vmem:[#allocation3 + $0x48] ss:$16 sps:$4 sm:$0xff]  }
 0x169   : > { %2253 = vmatpush1.bf16.msra.mxu0 %v5543_v21  ;;  %v5610_v21 = vcombine.high %v690_v16, %v694_v17  ;;  %v6185_v16 = vld [vmem:[#allocation3 + $0xa4] ss:$16 sps:$4 sm:$0xff]   ;;  %v6188_v17 = vld [vmem:[#allocation3 + $0xac] ss:$16 sps:$4 sm:$0xff]  }
 0x16a   : > { %2339 = vmatpush1.bf16.msra.mxu1 %v5545_v23  ;;  %2254 = vmatprep.subr.bf16.mxu0 %v5552_v24  ;;  %v697_v23 = vld [vmem:[#allocation7 + $0x710] sm:$0xff] }
 0x16b   : > { %2340 = vmatprep.subr.bf16.mxu1 %v5554_v27  ;;  %v701_v24 = vld [vmem:[#allocation7 + $0x730] sm:$0xff]  ;;  %v5607_v27 = vcombine.low %v689_v14, %v693_v15  ;;  %v6180_v15 = vld [vmem:[#allocation3 + $0x88] ss:$16 sps:$4 sm:$0xff]  }
 0x16c   : > { %v5616_v29 = vcombine.high %v697_v23, %v701_v24  ;;  %v6177_v14 = vld [vmem:[#allocation3 + $0x80] ss:$16 sps:$4 sm:$0xff]  }
 0x16d   : > { %2255 = vmatpush1.bf16.msra.mxu0 %v5551_v34  ;;  %v706_v34 = vld [vmem:[#allocation7 + $0x758] sm:$0xff] }
 0x16e   : > { %2341 = vmatpush1.bf16.msra.mxu1 %v5553_v35  ;;  %2256 = vmatprep.subr.bf16.mxu0 %v5560_v36  ;;  %v710_v35 = vld [vmem:[#allocation7 + $0x778] sm:$0xff]  ;;  %v5615_v36 = vcombine.low %v697_v23, %v701_v24  ;;  %v6189_v23 = vld [vmem:[#allocation3 + $0xc0] ss:$16 sps:$4 sm:$0xff]  }
 0x16f   : > { %2342 = vmatprep.subr.bf16.mxu1 %v5562_v37  ;;  %v5617_v37 = vcombine.low %v698_v25, %v702_v26  ;;  %v5626_v39 = vcombine.high %v706_v34, %v710_v35  ;;  %v6192_v24 = vld [vmem:[#allocation3 + $0xc8] ss:$16 sps:$4 sm:$0xff]   ;;  %v6197_v25 = vld [vmem:[#allocation3 + $0xe4] ss:$16 sps:$4 sm:$0xff]   ;;  %v6200_v26 = vld [vmem:[#allocation3 + $0xec] ss:$16 sps:$4 sm:$0xff]  }
 0x171   : > { %2257 = vmatpush1.bf16.msra.mxu0 %v5559_v44  ;;  %v714_v44 = vld [vmem:[#allocation7 + $0x798] sm:$0xff] }
 0x172   : > { %2343 = vmatpush1.bf16.msra.mxu1 %v5561_v45  ;;  %2258 = vmatprep.subr.bf16.mxu0 %v5568_v46  ;;  %v718_v45 = vld [vmem:[#allocation7 + $0x7b8] sm:$0xff]  ;;  %v5623_v46 = vcombine.low %v705_v31, %v709_v32  ;;  %v6201_v31 = vld [vmem:[#allocation3 + $0x100] ss:$16 sps:$4 sm:$0xff]  }
 0x173   : > { %2344 = vmatprep.subr.bf16.mxu1 %v5570_v47  ;;  %v5625_v47 = vcombine.low %v706_v34, %v710_v35  ;;  %v5634_v50 = vcombine.high %v714_v44, %v718_v45  ;;  %v6204_v32 = vld [vmem:[#allocation3 + $0x108] ss:$16 sps:$4 sm:$0xff]   ;;  %v6209_v34 = vld [vmem:[#allocation3 + $0x124] ss:$16 sps:$4 sm:$0xff]   ;;  %v6212_v35 = vld [vmem:[#allocation3 + $0x12c] ss:$16 sps:$4 sm:$0xff]  }
 0x175   : > { %2259 = vmatpush1.bf16.msra.mxu0 %v5567_v53  ;;  %v722_v53 = vld [vmem:[#allocation7 + $0x7d8] sm:$0xff] }
 0x176   : > { %2345 = vmatpush1.bf16.msra.mxu1 %v5569_v54  ;;  %2260 = vmatprep.subr.bf16.mxu0 %v5576_v13  ;;  %v726_v54 = vld [vmem:[#allocation7 + $0x7f8] sm:$0xff]  ;;  %v5631_v13 = vcombine.low %v713_v42, %v717_v43  ;;  %v6213_v42 = vld [vmem:[#allocation3 + $0x140] ss:$16 sps:$4 sm:$0xff]  }
 0x177   : > { %2346 = vmatprep.subr.bf16.mxu1 %v5578_v55  ;;  %v5633_v55 = vcombine.low %v714_v44, %v718_v45  ;;  %v5642_v57 = vcombine.high %v722_v53, %v726_v54  ;;  %v5641_v59 = vcombine.low %v722_v53, %v726_v54  ;;  %v6216_v43 = vld [vmem:[#allocation3 + $0x148] ss:$16 sps:$4 sm:$0xff]   ;;  %v6221_v44 = vld [vmem:[#allocation3 + $0x164] ss:$16 sps:$4 sm:$0xff]   ;;  %v6224_v45 = vld [vmem:[#allocation3 + $0x16c] ss:$16 sps:$4 sm:$0xff]  }
 0x178   : > { %v6233_v53 = vld [vmem:[#allocation3 + $0x1a4] ss:$16 sps:$4 sm:$0xff]   ;;  %v6236_v54 = vld [vmem:[#allocation3 + $0x1ac] ss:$16 sps:$4 sm:$0xff]  }
 0x179   : > { %2261 = vmatpush1.bf16.msra.mxu0 %v5575_v60  ;;  %v6155_v60 = vld [vmem:[#allocation3 + $0x4] ss:$16 sps:$4 sm:$0xff]  }
 0x17a   : > { %2347 = vmatpush1.bf16.msra.mxu1 %v5577_v61  ;;  %2262 = vmatprep.subr.bf16.mxu0 %v5584_v62  ;;  %v6158_v61 = vld [vmem:[#allocation3 + $0xc] ss:$16 sps:$4 sm:$0xff]  }
 0x17b   : > { %2348 = vmatprep.subr.bf16.mxu1 %v5586_v63  ;;  %v436_v62 = vld [vmem:[%s6952_s17 + $0x8] sm:$0xff] }
 0x17c   : > { %v448_v63 = vld [vmem:[%s6952_s17 + $0x68] sm:$0xff] }
 0x17d   : > { %2263 = vmatpush1.bf16.msra.mxu0 %v5583_v4  ;;  %v460_v4 = vpack.c.bf16 %v448_v63, %v436_v62  ;;  %v6243_v62 = vld [vmem:[#allocation3 + $0x1e0] ss:$16 sps:$4 sm:$0xff]  }
 0x17e   : > { %2349 = vmatpush1.bf16.msra.mxu1 %v5585_v33  ;;  %2264 = vmatprep.subr.bf16.mxu0 %v5592_v5  ;;  %v6159_v33 = vld [vmem:[#allocation3 + $0x20] ss:$16 sps:$4 sm:$0xff]   ;;  %v6162_v5 = vld [vmem:[#allocation3 + $0x28] ss:$16 sps:$4 sm:$0xff]  }
 0x17f   : > { %2350 = vmatprep.subr.bf16.mxu1 %v5594_v6  ;;  %v6167_v6 = vld [vmem:[#allocation3 + $0x44] ss:$16 sps:$4 sm:$0xff]  }
 0x180   : > { %v435_v63 = vld [vmem:[%s6952_s17] sm:$0xff] }
 0x181   : > { %2265 = vmatpush1.bf16.msra.mxu0 %v5591_v10  ;;  %v6176_v10 = vld [vmem:[#allocation3 + $0x6c] ss:$16 sps:$4 sm:$0xff]  }
 0x182   : > { %2351 = vmatpush1.bf16.msra.mxu1 %v5593_v49  ;;  %2266 = vmatprep.subr.bf16.mxu0 %v5600_v11  ;;  %v6174_v49 = vld [vmem:[#allocation3 + $0x68] ss:$16 sps:$4 sm:$0xff]   ;;  %v6179_v11 = vld [vmem:[#allocation3 + $0x84] ss:$16 sps:$4 sm:$0xff]  }
 0x183   : > { %2352 = vmatprep.subr.bf16.mxu1 %v5602_v12  ;;  %v6182_v12 = vld [vmem:[#allocation3 + $0x8c] ss:$16 sps:$4 sm:$0xff]  }
 0x185   : > { %2267 = vmatpush1.bf16.msra.mxu0 %v5599_v18  ;;  %v6183_v18 = vld [vmem:[#allocation3 + $0xa0] ss:$16 sps:$4 sm:$0xff]  }
 0x186   : > { %2353 = vmatpush1.bf16.msra.mxu1 %v5601_v19  ;;  %2268 = vmatprep.subr.bf16.mxu0 %v5608_v20  ;;  %v6186_v19 = vld [vmem:[#allocation3 + $0xa8] ss:$16 sps:$4 sm:$0xff]   ;;  %v6191_v20 = vld [vmem:[#allocation3 + $0xc4] ss:$16 sps:$4 sm:$0xff]  }
 0x187   : > { %2354 = vmatprep.subr.bf16.mxu1 %v5610_v21  ;;  %v6194_v21 = vld [vmem:[#allocation3 + $0xcc] ss:$16 sps:$4 sm:$0xff]  }
 0x189   : > { %2269 = vmatpush1.bf16.msra.mxu0 %v5607_v27  ;;  %v6195_v27 = vld [vmem:[#allocation3 + $0xe0] ss:$16 sps:$4 sm:$0xff]  }
 0x18a   : > { %2355 = vmatpush1.bf16.msra.mxu1 %v5609_v28  ;;  %2270 = vmatprep.subr.bf16.mxu0 %v5616_v29  ;;  %v6198_v28 = vld [vmem:[#allocation3 + $0xe8] ss:$16 sps:$4 sm:$0xff]   ;;  %v6203_v29 = vld [vmem:[#allocation3 + $0x104] ss:$16 sps:$4 sm:$0xff]  }
 0x18b   : > { %2356 = vmatprep.subr.bf16.mxu1 %v5618_v30  ;;  %v6206_v30 = vld [vmem:[#allocation3 + $0x10c] ss:$16 sps:$4 sm:$0xff]  }
 0x18d   : > { %2271 = vmatpush1.bf16.msra.mxu0 %v5615_v36  ;;  %v6207_v36 = vld [vmem:[#allocation3 + $0x120] ss:$16 sps:$4 sm:$0xff]  }
 0x18e   : > { %2357 = vmatpush1.bf16.msra.mxu1 %v5617_v37  ;;  %2272 = vmatprep.subr.bf16.mxu0 %v5624_v38  ;;  %v6210_v37 = vld [vmem:[#allocation3 + $0x128] ss:$16 sps:$4 sm:$0xff]   ;;  %v6215_v38 = vld [vmem:[#allocation3 + $0x144] ss:$16 sps:$4 sm:$0xff]  }
 0x18f   : > { %2358 = vmatprep.subr.bf16.mxu1 %v5626_v39  ;;  %v6218_v39 = vld [vmem:[#allocation3 + $0x14c] ss:$16 sps:$4 sm:$0xff]  }
 0x191   : > { %2273 = vmatpush1.bf16.msra.mxu0 %v5623_v46  ;;  %v6219_v46 = vld [vmem:[#allocation3 + $0x160] ss:$16 sps:$4 sm:$0xff]  }
 0x192   : > { %2359 = vmatpush1.bf16.msra.mxu1 %v5625_v47  ;;  %2274 = vmatprep.subr.bf16.mxu0 %v5632_v48  ;;  %v6222_v47 = vld [vmem:[#allocation3 + $0x168] ss:$16 sps:$4 sm:$0xff]   ;;  %v6227_v48 = vld [vmem:[#allocation3 + $0x184] ss:$16 sps:$4 sm:$0xff]  }
 0x193   : > { %2360 = vmatprep.subr.bf16.mxu1 %v5634_v50  ;;  %v6230_v50 = vld [vmem:[#allocation3 + $0x18c] ss:$16 sps:$4 sm:$0xff]  }
 0x195   : > { %2275 = vmatpush1.bf16.msra.mxu0 %v5631_v13  ;;  %v6231_v13 = vld [vmem:[#allocation3 + $0x1a0] ss:$16 sps:$4 sm:$0xff]  }
 0x196   : > { %2361 = vmatpush1.bf16.msra.mxu1 %v5633_v55  ;;  %2276 = vmatprep.subr.bf16.mxu0 %v5640_v56  ;;  %v6234_v55 = vld [vmem:[#allocation3 + $0x1a8] ss:$16 sps:$4 sm:$0xff]   ;;  %v6239_v56 = vld [vmem:[#allocation3 + $0x1c4] ss:$16 sps:$4 sm:$0xff]  }
 0x197   : > { %2362 = vmatprep.subr.bf16.mxu1 %v5642_v57  ;;  %v6242_v57 = vld [vmem:[#allocation3 + $0x1cc] ss:$16 sps:$4 sm:$0xff]  }
 0x199   : > { %2277 = vmatpush1.bf16.msra.mxu0 %v5639_v58  ;;  %v6237_v58 = vld [vmem:[#allocation3 + $0x1c0] ss:$16 sps:$4 sm:$0xff]  }
 0x19a   : > { %2363 = vmatpush1.bf16.msra.mxu1 %v5641_v59  ;;  %3143 = vmatprep.subr.bf16.mxu0 %v6155_v60  ;;  %v6240_v59 = vld [vmem:[#allocation3 + $0x1c8] ss:$16 sps:$4 sm:$0xff]   ;;  %v6245_v60 = vld [vmem:[#allocation3 + $0x1e4] ss:$16 sps:$4 sm:$0xff]  }
 0x19b   : > { %3229 = vmatprep.subr.bf16.mxu1 %v6158_v61  ;;  %v6248_v61 = vld [vmem:[#allocation3 + $0x1ec] ss:$16 sps:$4 sm:$0xff]  }
 0x19c   : > { %2279 = vmatmul.mubr.bf16.vlgmr.msra.gmra.mrb[4].mxu0 %v6979_v41 }
 0x19d   : > { %2365 = vmatmul.mubr.bf16.vlgmr.msra.gmra.mrb[4].mxu1 %v6979_v41  ;;  %3144 = vmatpush1.bf16.msra.mxu0 %v6153_v0  ;;  %v6171_v41 = vld [vmem:[#allocation3 + $0x60] ss:$16 sps:$4 sm:$0xff]  }
 0x19e   : > { %3230 = vmatpush1.bf16.msra.mxu1 %v6156_v1  ;;  %3145 = vmatprep.subr.bf16.mxu0 %v6161_v2  ;;  %v447_v0 = vld [vmem:[%s6952_s17 + $0x60] sm:$0xff]  ;;  %v6246_v1 = vld [vmem:[#allocation3 + $0x1e8] ss:$16 sps:$4 sm:$0xff]  }
 0x19f   : > { %3231 = vmatprep.subr.bf16.mxu1 %v6164_v3  ;;  %3175 = vmatprep.mubr.bf16.mxu0 %v460_v4  ;;  %v6251_v2 = vld [vmem:[#allocation3 + $0x204] ss:$16 sps:$4 sm:$0xff]   ;;  %v6254_v3 = vld [vmem:[#allocation3 + $0x20c] ss:$16 sps:$4 sm:$0xff]  }
 0x1a0   : > { %3261 = vmatprep.mubr.bf16.mxu1 %v460_v4  ;;  %v459_v4 = vpack.c.bf16 %v447_v0, %v435_v63  ;;  %v6341_v63 = vld [vmem:[#allocation3 + $0x3e4] ss:$16 sps:$4 sm:$0xff]   ;;  %v6344_v0 = vld [vmem:[#allocation3 + $0x3ec] ss:$16 sps:$4 sm:$0xff]  }
 0x1a1   : > { %3146 = vmatpush1.bf16.msra.mxu0 %v6159_v33  ;;  %v6249_v33 = vld [vmem:[#allocation3 + $0x200] ss:$16 sps:$4 sm:$0xff]  }
 0x1a2   : > { %3232 = vmatpush1.bf16.msra.mxu1 %v6162_v5  ;;  %3147 = vmatprep.subr.bf16.mxu0 %v6167_v6  ;;  %v6252_v5 = vld [vmem:[#allocation3 + $0x208] ss:$16 sps:$4 sm:$0xff]   ;;  %v6257_v6 = vld [vmem:[#allocation3 + $0x224] ss:$16 sps:$4 sm:$0xff]  }
 0x1a3   : > { %3233 = vmatprep.subr.bf16.mxu1 %v6170_v40  ;;  %v6260_v40 = vld [vmem:[#allocation3 + $0x22c] ss:$16 sps:$4 sm:$0xff]  }
 0x1a5   : > { %3148 = vmatpush1.bf16.msra.mxu0 %v6165_v7  ;;  %v6255_v7 = vld [vmem:[#allocation3 + $0x220] ss:$16 sps:$4 sm:$0xff]  }
 0x1a6   : > { %3234 = vmatpush1.bf16.msra.mxu1 %v6168_v8  ;;  %3149 = vmatprep.subr.bf16.mxu0 %v6173_v9  ;;  %v6258_v8 = vld [vmem:[#allocation3 + $0x228] ss:$16 sps:$4 sm:$0xff]   ;;  %v6263_v9 = vld [vmem:[#allocation3 + $0x244] ss:$16 sps:$4 sm:$0xff]  }
 0x1a7   : > { %3235 = vmatprep.subr.bf16.mxu1 %v6176_v10  ;;  %v6266_v10 = vld [vmem:[#allocation3 + $0x24c] ss:$16 sps:$4 sm:$0xff]  }
 0x1a9   : > { %3150 = vmatpush1.bf16.msra.mxu0 %v6171_v41  ;;  %v6261_v41 = vld [vmem:[#allocation3 + $0x240] ss:$16 sps:$4 sm:$0xff]  }
 0x1aa   : > { %3236 = vmatpush1.bf16.msra.mxu1 %v6174_v49  ;;  %3151 = vmatprep.subr.bf16.mxu0 %v6179_v11  ;;  %v6264_v49 = vld [vmem:[#allocation3 + $0x248] ss:$16 sps:$4 sm:$0xff]   ;;  %v6269_v11 = vld [vmem:[#allocation3 + $0x264] ss:$16 sps:$4 sm:$0xff]  }
 0x1ab   : > { %3237 = vmatprep.subr.bf16.mxu1 %v6182_v12  ;;  %v6272_v12 = vld [vmem:[#allocation3 + $0x26c] ss:$16 sps:$4 sm:$0xff]  }
 0x1ad   : > { %3152 = vmatpush1.bf16.msra.mxu0 %v6177_v14  ;;  %v6267_v14 = vld [vmem:[#allocation3 + $0x260] ss:$16 sps:$4 sm:$0xff]  }
 0x1ae   : > { %3238 = vmatpush1.bf16.msra.mxu1 %v6180_v15  ;;  %3153 = vmatprep.subr.bf16.mxu0 %v6185_v16  ;;  %v6270_v15 = vld [vmem:[#allocation3 + $0x268] ss:$16 sps:$4 sm:$0xff]   ;;  %v6275_v16 = vld [vmem:[#allocation3 + $0x284] ss:$16 sps:$4 sm:$0xff]  }
 0x1af   : > { %3239 = vmatprep.subr.bf16.mxu1 %v6188_v17  ;;  %v6278_v17 = vld [vmem:[#allocation3 + $0x28c] ss:$16 sps:$4 sm:$0xff]  }
 0x1b1   : > { %3154 = vmatpush1.bf16.msra.mxu0 %v6183_v18  ;;  %v6273_v18 = vld [vmem:[#allocation3 + $0x280] ss:$16 sps:$4 sm:$0xff]  }
 0x1b2   : > { %3240 = vmatpush1.bf16.msra.mxu1 %v6186_v19  ;;  %3155 = vmatprep.subr.bf16.mxu0 %v6191_v20  ;;  %v6281_v19 = vld [vmem:[#allocation3 + $0x2a4] ss:$16 sps:$4 sm:$0xff]   ;;  %v6284_v20 = vld [vmem:[#allocation3 + $0x2ac] ss:$16 sps:$4 sm:$0xff]  }
 0x1b3   : > { %3241 = vmatprep.subr.bf16.mxu1 %v6194_v21  ;;  %v6279_v21 = vld [vmem:[#allocation3 + $0x2a0] ss:$16 sps:$4 sm:$0xff]  }
 0x1b5   : > { %3156 = vmatpush1.bf16.msra.mxu0 %v6189_v23  ;;  %v6282_v23 = vld [vmem:[#allocation3 + $0x2a8] ss:$16 sps:$4 sm:$0xff]  }
 0x1b6   : > { %3242 = vmatpush1.bf16.msra.mxu1 %v6192_v24  ;;  %3157 = vmatprep.subr.bf16.mxu0 %v6197_v25  ;;  %v6287_v24 = vld [vmem:[#allocation3 + $0x2c4] ss:$16 sps:$4 sm:$0xff]   ;;  %v6290_v25 = vld [vmem:[#allocation3 + $0x2cc] ss:$16 sps:$4 sm:$0xff]  }
 0x1b7   : > { %3243 = vmatprep.subr.bf16.mxu1 %v6200_v26  ;;  %v6285_v26 = vld [vmem:[#allocation3 + $0x2c0] ss:$16 sps:$4 sm:$0xff]  }
 0x1b9   : > { %3158 = vmatpush1.bf16.msra.mxu0 %v6195_v27  ;;  %v6288_v27 = vld [vmem:[#allocation3 + $0x2c8] ss:$16 sps:$4 sm:$0xff]  }
 0x1ba   : > { %3244 = vmatpush1.bf16.msra.mxu1 %v6198_v28  ;;  %3159 = vmatprep.subr.bf16.mxu0 %v6203_v29  ;;  %v6293_v28 = vld [vmem:[#allocation3 + $0x2e4] ss:$16 sps:$4 sm:$0xff]   ;;  %v6296_v29 = vld [vmem:[#allocation3 + $0x2ec] ss:$16 sps:$4 sm:$0xff]  }
 0x1bb   : > { %3245 = vmatprep.subr.bf16.mxu1 %v6206_v30  ;;  %v6291_v30 = vld [vmem:[#allocation3 + $0x2e0] ss:$16 sps:$4 sm:$0xff]  }
 0x1bd   : > { %3160 = vmatpush1.bf16.msra.mxu0 %v6201_v31  ;;  %v6294_v31 = vld [vmem:[#allocation3 + $0x2e8] ss:$16 sps:$4 sm:$0xff]  }
 0x1be   : > { %3246 = vmatpush1.bf16.msra.mxu1 %v6204_v32  ;;  %3161 = vmatprep.subr.bf16.mxu0 %v6209_v34  ;;  %v6299_v32 = vld [vmem:[#allocation3 + $0x304] ss:$16 sps:$4 sm:$0xff]   ;;  %v6302_v34 = vld [vmem:[#allocation3 + $0x30c] ss:$16 sps:$4 sm:$0xff]  }
 0x1bf   : > { %3247 = vmatprep.subr.bf16.mxu1 %v6212_v35  ;;  %v6297_v35 = vld [vmem:[#allocation3 + $0x300] ss:$16 sps:$4 sm:$0xff]  }
 0x1c1   : > { %3162 = vmatpush1.bf16.msra.mxu0 %v6207_v36  ;;  %v6300_v36 = vld [vmem:[#allocation3 + $0x308] ss:$16 sps:$4 sm:$0xff]  }
 0x1c2   : > { %3248 = vmatpush1.bf16.msra.mxu1 %v6210_v37  ;;  %3163 = vmatprep.subr.bf16.mxu0 %v6215_v38  ;;  %v6305_v37 = vld [vmem:[#allocation3 + $0x324] ss:$16 sps:$4 sm:$0xff]   ;;  %v6308_v38 = vld [vmem:[#allocation3 + $0x32c] ss:$16 sps:$4 sm:$0xff]  }
 0x1c3   : > { %3249 = vmatprep.subr.bf16.mxu1 %v6218_v39  ;;  %v6303_v39 = vld [vmem:[#allocation3 + $0x320] ss:$16 sps:$4 sm:$0xff]  }
 0x1c5   : > { %3164 = vmatpush1.bf16.msra.mxu0 %v6213_v42  ;;  %v6306_v42 = vld [vmem:[#allocation3 + $0x328] ss:$16 sps:$4 sm:$0xff]  }
 0x1c6   : > { %3250 = vmatpush1.bf16.msra.mxu1 %v6216_v43  ;;  %3165 = vmatprep.subr.bf16.mxu0 %v6221_v44  ;;  %v6311_v43 = vld [vmem:[#allocation3 + $0x344] ss:$16 sps:$4 sm:$0xff]   ;;  %v6314_v44 = vld [vmem:[#allocation3 + $0x34c] ss:$16 sps:$4 sm:$0xff]  }
 0x1c7   : > { %3251 = vmatprep.subr.bf16.mxu1 %v6224_v45  ;;  %v6309_v45 = vld [vmem:[#allocation3 + $0x340] ss:$16 sps:$4 sm:$0xff]  }
 0x1c9   : > { %3166 = vmatpush1.bf16.msra.mxu0 %v6219_v46  ;;  %v6312_v46 = vld [vmem:[#allocation3 + $0x348] ss:$16 sps:$4 sm:$0xff]  }
 0x1ca   : > { %3252 = vmatpush1.bf16.msra.mxu1 %v6222_v47  ;;  %3167 = vmatprep.subr.bf16.mxu0 %v6227_v48  ;;  %v6317_v47 = vld [vmem:[#allocation3 + $0x364] ss:$16 sps:$4 sm:$0xff]   ;;  %v6320_v48 = vld [vmem:[#allocation3 + $0x36c] ss:$16 sps:$4 sm:$0xff]  }
 0x1cb   : > { %3253 = vmatprep.subr.bf16.mxu1 %v6230_v50  ;;  %v6315_v50 = vld [vmem:[#allocation3 + $0x360] ss:$16 sps:$4 sm:$0xff]  }
 0x1cd   : > { %3168 = vmatpush1.bf16.msra.mxu0 %v6225_v51  ;;  %v6318_v51 = vld [vmem:[#allocation3 + $0x368] ss:$16 sps:$4 sm:$0xff]  }
 0x1ce   : > { %3254 = vmatpush1.bf16.msra.mxu1 %v6228_v52  ;;  %3169 = vmatprep.subr.bf16.mxu0 %v6233_v53  ;;  %v6323_v52 = vld [vmem:[#allocation3 + $0x384] ss:$16 sps:$4 sm:$0xff]   ;;  %v6326_v53 = vld [vmem:[#allocation3 + $0x38c] ss:$16 sps:$4 sm:$0xff]  }
 0x1cf   : > { %3255 = vmatprep.subr.bf16.mxu1 %v6236_v54  ;;  %v6321_v54 = vld [vmem:[#allocation3 + $0x380] ss:$16 sps:$4 sm:$0xff]  }
 0x1d1   : > { %3170 = vmatpush1.bf16.msra.mxu0 %v6231_v13  ;;  %v6324_v13 = vld [vmem:[#allocation3 + $0x388] ss:$16 sps:$4 sm:$0xff]  }
 0x1d2   : > { %3256 = vmatpush1.bf16.msra.mxu1 %v6234_v55  ;;  %3171 = vmatprep.subr.bf16.mxu0 %v6239_v56  ;;  %v6329_v55 = vld [vmem:[#allocation3 + $0x3a4] ss:$16 sps:$4 sm:$0xff]   ;;  %v6332_v56 = vld [vmem:[#allocation3 + $0x3ac] ss:$16 sps:$4 sm:$0xff]  }
 0x1d3   : > { %3257 = vmatprep.subr.bf16.mxu1 %v6242_v57  ;;  %v6327_v57 = vld [vmem:[#allocation3 + $0x3a0] ss:$16 sps:$4 sm:$0xff]  }
 0x1d5   : > { %3172 = vmatpush1.bf16.msra.mxu0 %v6237_v58  ;;  %v6330_v58 = vld [vmem:[#allocation3 + $0x3a8] ss:$16 sps:$4 sm:$0xff]  }
 0x1d6   : > { %3258 = vmatpush1.bf16.msra.mxu1 %v6240_v59  ;;  %3173 = vmatprep.subr.bf16.mxu0 %v6245_v60  ;;  %v6335_v59 = vld [vmem:[#allocation3 + $0x3c4] ss:$16 sps:$4 sm:$0xff]   ;;  %v6338_v60 = vld [vmem:[#allocation3 + $0x3cc] ss:$16 sps:$4 sm:$0xff]  }
 0x1d7   : > { %3259 = vmatprep.subr.bf16.mxu1 %v6248_v61  ;;  %v6333_v61 = vld [vmem:[#allocation3 + $0x3c0] ss:$16 sps:$4 sm:$0xff]  }
 0x1d9   : > { %3174 = vmatpush1.bf16.msra.mxu0 %v6243_v62  ;;  %v6336_v62 = vld [vmem:[#allocation3 + $0x3c8] ss:$16 sps:$4 sm:$0xff]  }
 0x1da   : > { %3260 = vmatpush1.bf16.msra.mxu1 %v6246_v1  ;;  %3186 = vmatprep.subr.bf16.mxu0 %v6251_v2  ;;  %v6339_v1 = vld [vmem:[#allocation3 + $0x3e0] ss:$16 sps:$4 sm:$0xff]  }
 0x1db   : > { %3272 = vmatprep.subr.bf16.mxu1 %v6254_v3  ;;  %v437_v2 = vld [vmem:[%s6952_s17 + $0x10] sm:$0xff] }
 0x1dc   : > { %3176 = vmatmul.mubr.bf16.vlgmr.msra.gmra.mrb[0].mxu0 %v459_v4  ;;  %v449_v3 = vld [vmem:[%s6952_s17 + $0x70] sm:$0xff] }
 0x1dd   : > { %3187 = vmatpush1.bf16.msra.mxu0 %v6249_v33  ;;  %3262 = vmatmul.mubr.bf16.vlgmr.msra.gmra.mrb[0].mxu1 %v459_v4  ;;  %v6342_v4 = vld [vmem:[#allocation3 + $0x3e8] ss:$16 sps:$4 sm:$0xff]   ;;  %v6347_v33 = vld [vmem:[#allocation5 + $0x4] ss:$16 sps:$4 sm:$0xff]  }
 0x1de   : > { %3273 = vmatpush1.bf16.msra.mxu1 %v6252_v5  ;;  %3188 = vmatprep.subr.bf16.mxu0 %v6257_v6  ;;  %v6350_v5 = vld [vmem:[#allocation5 + $0xc] ss:$16 sps:$4 sm:$0xff]   ;;  %v461_v6 = vpack.c.bf16 %v449_v3, %v437_v2  ;;  %v6429_v3 = vld [vmem:[#allocation5 + $0x1c0] ss:$16 sps:$4 sm:$0xff]  }
 0x1df   : > { %3274 = vmatprep.subr.bf16.mxu1 %v6260_v40  ;;  %3218 = vmatprep.mubr.bf16.mxu0 %v7006_v22  ;;  %v6345_v40 = vld [vmem:[#allocation5] ss:$16 sps:$4 sm:$0xff]   ;;  %v6434_v2 = vld [vmem:[#allocation5 + $0x1cc] ss:$16 sps:$4 sm:$0xff]  }
 0x1e0   : > { %3304 = vmatprep.mubr.bf16.mxu1 %v7006_v22  ;;  %v6276_v22 = vld [vmem:[#allocation3 + $0x288] ss:$16 sps:$4 sm:$0xff]  }
 0x1e1   : > { %3189 = vmatpush1.bf16.msra.mxu0 %v6255_v7  ;;  %v7025_v7 = vpop.permute.xlu0 %3481 }
 0x1e2   : > { %3275 = vmatpush1.bf16.msra.mxu1 %v6258_v8  ;;  %3190 = vmatprep.subr.bf16.mxu0 %v6263_v9  ;;  %v6348_v8 = vld [vmem:[#allocation5 + $0x8] ss:$16 sps:$4 sm:$0xff]   ;;  %v6353_v9 = vld [vmem:[#allocation5 + $0x24] ss:$16 sps:$4 sm:$0xff]  }
 0x1e3   : > { %3276 = vmatprep.subr.bf16.mxu1 %v6266_v10  ;;  %v6356_v10 = vld [vmem:[#allocation5 + $0x2c] ss:$16 sps:$4 sm:$0xff]  }
 0x1e5   : > { %3191 = vmatpush1.bf16.msra.mxu0 %v6261_v41  ;;  %v7027_v41 = vpop.permute.xlu1 %3479 }
 0x1e6   : > { %3277 = vmatpush1.bf16.msra.mxu1 %v6264_v49  ;;  %3192 = vmatprep.subr.bf16.mxu0 %v6269_v11  ;;  %v3489_v49 = vsel %vm3487_vm1, %v7027_v41, %v7025_v7  ;;  %v6351_v11 = vld [vmem:[#allocation5 + $0x20] ss:$16 sps:$4 sm:$0xff]  }
 0x1e7   : > { %3278 = vmatprep.subr.bf16.mxu1 %v6272_v12  ;;  %v6354_v12 = vld [vmem:[#allocation5 + $0x28] ss:$16 sps:$4 sm:$0xff]  }
 0x1e9   : > { %3193 = vmatpush1.bf16.msra.mxu0 %v6267_v14  ;;  %v6359_v14 = vld [vmem:[#allocation5 + $0x44] ss:$16 sps:$4 sm:$0xff]  }
 0x1ea   : > { %3279 = vmatpush1.bf16.msra.mxu1 %v6270_v15  ;;  %3194 = vmatprep.subr.bf16.mxu0 %v6275_v16  ;;  %v6362_v15 = vld [vmem:[#allocation5 + $0x4c] ss:$16 sps:$4 sm:$0xff]   ;;  %v6357_v16 = vld [vmem:[#allocation5 + $0x40] ss:$16 sps:$4 sm:$0xff]  }
 0x1eb   : > { %3280 = vmatprep.subr.bf16.mxu1 %v6278_v17  ;;  %v6360_v17 = vld [vmem:[#allocation5 + $0x48] ss:$16 sps:$4 sm:$0xff]  }
 0x1ed   : > { %3195 = vmatpush1.bf16.msra.mxu0 %v6273_v18  ;;  %v6365_v18 = vld [vmem:[#allocation5 + $0x64] ss:$16 sps:$4 sm:$0xff]  }
 0x1ee   : > { %3281 = vmatpush1.bf16.msra.mxu1 %v6276_v22  ;;  %3196 = vmatprep.subr.bf16.mxu0 %v6281_v19  ;;  %v6368_v22 = vld [vmem:[#allocation5 + $0x6c] ss:$16 sps:$4 sm:$0xff]   ;;  %v6363_v19 = vld [vmem:[#allocation5 + $0x60] ss:$16 sps:$4 sm:$0xff]  }
 0x1ef   : > { %3282 = vmatprep.subr.bf16.mxu1 %v6284_v20  ;;  %v6366_v20 = vld [vmem:[#allocation5 + $0x68] ss:$16 sps:$4 sm:$0xff]  }
 0x1f1   : > { %3197 = vmatpush1.bf16.msra.mxu0 %v6279_v21  ;;  %v6371_v21 = vld [vmem:[#allocation5 + $0x84] ss:$16 sps:$4 sm:$0xff]  }
 0x1f2   : > { %3283 = vmatpush1.bf16.msra.mxu1 %v6282_v23  ;;  %3198 = vmatprep.subr.bf16.mxu0 %v6287_v24  ;;  %v6374_v23 = vld [vmem:[#allocation5 + $0x8c] ss:$16 sps:$4 sm:$0xff]   ;;  %v6369_v24 = vld [vmem:[#allocation5 + $0x80] ss:$16 sps:$4 sm:$0xff]  }
 0x1f3   : > { %3284 = vmatprep.subr.bf16.mxu1 %v6290_v25  ;;  %v6372_v25 = vld [vmem:[#allocation5 + $0x88] ss:$16 sps:$4 sm:$0xff]  }
 0x1f5   : > { %3199 = vmatpush1.bf16.msra.mxu0 %v6285_v26  ;;  %v6377_v26 = vld [vmem:[#allocation5 + $0xa4] ss:$16 sps:$4 sm:$0xff]  }
 0x1f6   : > { %3285 = vmatpush1.bf16.msra.mxu1 %v6288_v27  ;;  %3200 = vmatprep.subr.bf16.mxu0 %v6293_v28  ;;  %v6380_v27 = vld [vmem:[#allocation5 + $0xac] ss:$16 sps:$4 sm:$0xff]   ;;  %v6375_v28 = vld [vmem:[#allocation5 + $0xa0] ss:$16 sps:$4 sm:$0xff]  }
 0x1f7   : > { %3286 = vmatprep.subr.bf16.mxu1 %v6296_v29  ;;  %v6378_v29 = vld [vmem:[#allocation5 + $0xa8] ss:$16 sps:$4 sm:$0xff]  }
 0x1f9   : > { %3201 = vmatpush1.bf16.msra.mxu0 %v6291_v30  ;;  %v6383_v30 = vld [vmem:[#allocation5 + $0xc4] ss:$16 sps:$4 sm:$0xff]  }
 0x1fa   : > { %3287 = vmatpush1.bf16.msra.mxu1 %v6294_v31  ;;  %3202 = vmatprep.subr.bf16.mxu0 %v6299_v32  ;;  %v6386_v31 = vld [vmem:[#allocation5 + $0xcc] ss:$16 sps:$4 sm:$0xff]   ;;  %v6381_v32 = vld [vmem:[#allocation5 + $0xc0] ss:$16 sps:$4 sm:$0xff]  }
 0x1fb   : > { %3288 = vmatprep.subr.bf16.mxu1 %v6302_v34  ;;  %v6384_v34 = vld [vmem:[#allocation5 + $0xc8] ss:$16 sps:$4 sm:$0xff]  }
 0x1fd   : > { %3203 = vmatpush1.bf16.msra.mxu0 %v6297_v35  ;;  %v6389_v35 = vld [vmem:[#allocation5 + $0xe4] ss:$16 sps:$4 sm:$0xff]  }
 0x1fe   : > { %3289 = vmatpush1.bf16.msra.mxu1 %v6300_v36  ;;  %3204 = vmatprep.subr.bf16.mxu0 %v6305_v37  ;;  %v6392_v36 = vld [vmem:[#allocation5 + $0xec] ss:$16 sps:$4 sm:$0xff]   ;;  %v6387_v37 = vld [vmem:[#allocation5 + $0xe0] ss:$16 sps:$4 sm:$0xff]  }
 0x1ff   : > { %3290 = vmatprep.subr.bf16.mxu1 %v6308_v38  ;;  %v6390_v38 = vld [vmem:[#allocation5 + $0xe8] ss:$16 sps:$4 sm:$0xff]  }
 0x201   : > { %3205 = vmatpush1.bf16.msra.mxu0 %v6303_v39  ;;  %v6395_v39 = vld [vmem:[#allocation5 + $0x104] ss:$16 sps:$4 sm:$0xff]  }
 0x202   : > { %3291 = vmatpush1.bf16.msra.mxu1 %v6306_v42  ;;  %3206 = vmatprep.subr.bf16.mxu0 %v6311_v43  ;;  %v6398_v42 = vld [vmem:[#allocation5 + $0x10c] ss:$16 sps:$4 sm:$0xff]   ;;  %v6393_v43 = vld [vmem:[#allocation5 + $0x100] ss:$16 sps:$4 sm:$0xff]  }
 0x203   : > { %3292 = vmatprep.subr.bf16.mxu1 %v6314_v44  ;;  %v6396_v44 = vld [vmem:[#allocation5 + $0x108] ss:$16 sps:$4 sm:$0xff]  }
 0x205   : > { %3207 = vmatpush1.bf16.msra.mxu0 %v6309_v45  ;;  %v6401_v45 = vld [vmem:[#allocation5 + $0x124] ss:$16 sps:$4 sm:$0xff]  }
 0x206   : > { %3293 = vmatpush1.bf16.msra.mxu1 %v6312_v46  ;;  %3208 = vmatprep.subr.bf16.mxu0 %v6317_v47  ;;  %v6404_v46 = vld [vmem:[#allocation5 + $0x12c] ss:$16 sps:$4 sm:$0xff]   ;;  %v6399_v47 = vld [vmem:[#allocation5 + $0x120] ss:$16 sps:$4 sm:$0xff]  }
 0x207   : > { %3294 = vmatprep.subr.bf16.mxu1 %v6320_v48  ;;  %v6402_v48 = vld [vmem:[#allocation5 + $0x128] ss:$16 sps:$4 sm:$0xff]  }
 0x209   : > { %3209 = vmatpush1.bf16.msra.mxu0 %v6315_v50  ;;  %v6407_v50 = vld [vmem:[#allocation5 + $0x144] ss:$16 sps:$4 sm:$0xff]  }
 0x20a   : > { %3295 = vmatpush1.bf16.msra.mxu1 %v6318_v51  ;;  %3210 = vmatprep.subr.bf16.mxu0 %v6323_v52  ;;  %v6410_v51 = vld [vmem:[#allocation5 + $0x14c] ss:$16 sps:$4 sm:$0xff]   ;;  %v6405_v52 = vld [vmem:[#allocation5 + $0x140] ss:$16 sps:$4 sm:$0xff]  }
 0x20b   : > { %3296 = vmatprep.subr.bf16.mxu1 %v6326_v53  ;;  %v6408_v53 = vld [vmem:[#allocation5 + $0x148] ss:$16 sps:$4 sm:$0xff]  }
 0x20d   : > { %3211 = vmatpush1.bf16.msra.mxu0 %v6321_v54  ;;  %v6413_v54 = vld [vmem:[#allocation5 + $0x164] ss:$16 sps:$4 sm:$0xff]  }
 0x20e   : > { %3297 = vmatpush1.bf16.msra.mxu1 %v6324_v13  ;;  %3212 = vmatprep.subr.bf16.mxu0 %v6329_v55  ;;  %v6416_v13 = vld [vmem:[#allocation5 + $0x16c] ss:$16 sps:$4 sm:$0xff]   ;;  %v6411_v55 = vld [vmem:[#allocation5 + $0x160] ss:$16 sps:$4 sm:$0xff]  }
 0x20f   : > { %3298 = vmatprep.subr.bf16.mxu1 %v6332_v56  ;;  %v6414_v56 = vld [vmem:[#allocation5 + $0x168] ss:$16 sps:$4 sm:$0xff]  }
 0x211   : > { %3213 = vmatpush1.bf16.msra.mxu0 %v6327_v57  ;;  %v6419_v57 = vld [vmem:[#allocation5 + $0x184] ss:$16 sps:$4 sm:$0xff]  }
 0x212   : > { %3299 = vmatpush1.bf16.msra.mxu1 %v6330_v58  ;;  %3214 = vmatprep.subr.bf16.mxu0 %v6335_v59  ;;  %v6422_v58 = vld [vmem:[#allocation5 + $0x18c] ss:$16 sps:$4 sm:$0xff]   ;;  %v6417_v59 = vld [vmem:[#allocation5 + $0x180] ss:$16 sps:$4 sm:$0xff]  }
 0x213   : > { %3300 = vmatprep.subr.bf16.mxu1 %v6338_v60  ;;  %v6420_v60 = vld [vmem:[#allocation5 + $0x188] ss:$16 sps:$4 sm:$0xff]  }
 0x215   : > { %3215 = vmatpush1.bf16.msra.mxu0 %v6333_v61  ;;  %v6425_v61 = vld [vmem:[#allocation5 + $0x1a4] ss:$16 sps:$4 sm:$0xff]  }
 0x216   : > { %3301 = vmatpush1.bf16.msra.mxu1 %v6336_v62  ;;  %3216 = vmatprep.subr.bf16.mxu0 %v6341_v63  ;;  %v6428_v62 = vld [vmem:[#allocation5 + $0x1ac] ss:$16 sps:$4 sm:$0xff]   ;;  %v6423_v63 = vld [vmem:[#allocation5 + $0x1a0] ss:$16 sps:$4 sm:$0xff]  }
 0x217   : > { %3302 = vmatprep.subr.bf16.mxu1 %v6344_v0  ;;  %v6426_v0 = vld [vmem:[#allocation5 + $0x1a8] ss:$16 sps:$4 sm:$0xff]  }
 0x219   : > { %3217 = vmatpush1.bf16.msra.mxu0 %v6339_v1  ;;  %v6431_v1 = vld [vmem:[#allocation5 + $0x1c4] ss:$16 sps:$4 sm:$0xff]  }
 0x21a   : > { %3303 = vmatpush1.bf16.msra.mxu1 %v6342_v4  ;;  %4136 = vmatprep.subr.bf16.mxu0 %v6347_v33  ;;  %v6432_v4 = vld [vmem:[#allocation5 + $0x1c8] ss:$16 sps:$4 sm:$0xff]   ;;  %v6437_v33 = vld [vmem:[#allocation5 + $0x1e4] ss:$16 sps:$4 sm:$0xff]  }
 0x21b   : > { %4222 = vmatprep.subr.bf16.mxu1 %v6350_v5  ;;  %v6440_v5 = vld [vmem:[#allocation5 + $0x1ec] ss:$16 sps:$4 sm:$0xff]  }
 0x21c   : > { %3219 = vmatmul.mubr.bf16.vlgmr.msra.gmra.mrb[0].mxu0 %v461_v6 }
 0x21d   : > { %3305 = vmatmul.mubr.bf16.vlgmr.msra.gmra.mrb[0].mxu1 %v461_v6  ;;  %4137 = vmatpush1.bf16.msra.mxu0 %v6345_v40  ;;  %v3478_v6 = vpop.permute.xlu1 %3477  ;;  %v6435_v40 = vld [vmem:[#allocation5 + $0x1e0] ss:$16 sps:$4 sm:$0xff]  }
 0x21e   : > { %4223 = vmatpush1.bf16.msra.mxu1 %v6348_v8  ;;  %4138 = vmatprep.subr.bf16.mxu0 %v6353_v9  ;;  %v6438_v8 = vld [vmem:[#allocation5 + $0x1e8] ss:$16 sps:$4 sm:$0xff]   ;;  %v6443_v9 = vld [vmem:[#allocation5 + $0x204] ss:$16 sps:$4 sm:$0xff]  }
 0x21f   : > { %4224 = vmatprep.subr.bf16.mxu1 %v6356_v10  ;;  %4168 = vmatprep.mubr.bf16.mxu0 %v3489_v49  ;;  %v6446_v10 = vld [vmem:[#allocation5 + $0x20c] ss:$16 sps:$4 sm:$0xff]  }
 0x220   : > { %4254 = vmatprep.mubr.bf16.mxu1 %v3489_v49  ;;  %v6441_v49 = vld [vmem:[#allocation5 + $0x200] ss:$16 sps:$4 sm:$0xff]  }
 0x221   : > { %4139 = vmatpush1.bf16.msra.mxu0 %v6351_v11  ;;  %v3486_v11 = vpop.permute.xlu1 %3485 }
 0x222   : > { %4225 = vmatpush1.bf16.msra.mxu1 %v6354_v12  ;;  %4140 = vmatprep.subr.bf16.mxu0 %v6359_v14  ;;  %v6444_v12 = vld [vmem:[#allocation5 + $0x208] ss:$16 sps:$4 sm:$0xff]   ;;  %v6449_v14 = vld [vmem:[#allocation5 + $0x224] ss:$16 sps:$4 sm:$0xff]  }
 0x223   : > { %4226 = vmatprep.subr.bf16.mxu1 %v6362_v15  ;;  %v3488_v15 = vsel %vm3487_vm1, %v3478_v6, %v7027_v41  ;;  %v6453_v41 = vld [vmem:[#allocation5 + $0x240] ss:$16 sps:$4 sm:$0xff]   ;;  %v6527_v6 = vld [vmem:[#allocation5 + $0x3c4] ss:$16 sps:$4 sm:$0xff]  }
 0x225   : > { %4141 = vmatpush1.bf16.msra.mxu0 %v6357_v16  ;;  %v7034_v16 = vpop.permute.xlu0 %3483 }
 0x226   : > { %4227 = vmatpush1.bf16.msra.mxu1 %v6360_v17  ;;  %4142 = vmatprep.subr.bf16.mxu0 %v6365_v18  ;;  %v6452_v17 = vld [vmem:[#allocation5 + $0x22c] ss:$16 sps:$4 sm:$0xff]   ;;  %v3491_v18 = vsel %vm3487_vm1, %v7034_v16, %v3486_v11  ;;  %v6531_v11 = vld [vmem:[#allocation5 + $0x3e0] ss:$16 sps:$4 sm:$0xff]  }
 0x227   : > { %4228 = vmatprep.subr.bf16.mxu1 %v6368_v22  ;;  %v6447_v22 = vld [vmem:[#allocation5 + $0x220] ss:$16 sps:$4 sm:$0xff]  }
 0x229   : > { %4143 = vmatpush1.bf16.msra.mxu0 %v6363_v19  ;;  %v6450_v19 = vld [vmem:[#allocation5 + $0x228] ss:$16 sps:$4 sm:$0xff]  }
 0x22a   : > { %4229 = vmatpush1.bf16.msra.mxu1 %v6366_v20  ;;  %4144 = vmatprep.subr.bf16.mxu0 %v6371_v21  ;;  %v6455_v20 = vld [vmem:[#allocation5 + $0x244] ss:$16 sps:$4 sm:$0xff]   ;;  %v6458_v21 = vld [vmem:[#allocation5 + $0x24c] ss:$16 sps:$4 sm:$0xff]  }
 0x22b   : > { %4230 = vmatprep.subr.bf16.mxu1 %v6374_v23  ;;  %v6456_v23 = vld [vmem:[#allocation5 + $0x248] ss:$16 sps:$4 sm:$0xff]  }
 0x22d   : > { %4145 = vmatpush1.bf16.msra.mxu0 %v6369_v24  ;;  %v6461_v24 = vld [vmem:[#allocation5 + $0x264] ss:$16 sps:$4 sm:$0xff]  }
 0x22e   : > { %4231 = vmatpush1.bf16.msra.mxu1 %v6372_v25  ;;  %4146 = vmatprep.subr.bf16.mxu0 %v6377_v26  ;;  %v6464_v25 = vld [vmem:[#allocation5 + $0x26c] ss:$16 sps:$4 sm:$0xff]   ;;  %v6459_v26 = vld [vmem:[#allocation5 + $0x260] ss:$16 sps:$4 sm:$0xff]  }
 0x22f   : > { %4232 = vmatprep.subr.bf16.mxu1 %v6380_v27  ;;  %v6462_v27 = vld [vmem:[#allocation5 + $0x268] ss:$16 sps:$4 sm:$0xff]  }
 0x231   : > { %4147 = vmatpush1.bf16.msra.mxu0 %v6375_v28  ;;  %v6467_v28 = vld [vmem:[#allocation5 + $0x284] ss:$16 sps:$4 sm:$0xff]  }
 0x232   : > { %4233 = vmatpush1.bf16.msra.mxu1 %v6378_v29  ;;  %4148 = vmatprep.subr.bf16.mxu0 %v6383_v30  ;;  %v6470_v29 = vld [vmem:[#allocation5 + $0x28c] ss:$16 sps:$4 sm:$0xff]   ;;  %v6465_v30 = vld [vmem:[#allocation5 + $0x280] ss:$16 sps:$4 sm:$0xff]  }
 0x233   : > { %4234 = vmatprep.subr.bf16.mxu1 %v6386_v31  ;;  %v6468_v31 = vld [vmem:[#allocation5 + $0x288] ss:$16 sps:$4 sm:$0xff]  }
 0x235   : > { %4149 = vmatpush1.bf16.msra.mxu0 %v6381_v32  ;;  %v6473_v32 = vld [vmem:[#allocation5 + $0x2a4] ss:$16 sps:$4 sm:$0xff]  }
 0x236   : > { %4235 = vmatpush1.bf16.msra.mxu1 %v6384_v34  ;;  %4150 = vmatprep.subr.bf16.mxu0 %v6389_v35  ;;  %v6476_v34 = vld [vmem:[#allocation5 + $0x2ac] ss:$16 sps:$4 sm:$0xff]   ;;  %v6471_v35 = vld [vmem:[#allocation5 + $0x2a0] ss:$16 sps:$4 sm:$0xff]  }
 0x237   : > { %4236 = vmatprep.subr.bf16.mxu1 %v6392_v36  ;;  %v6474_v36 = vld [vmem:[#allocation5 + $0x2a8] ss:$16 sps:$4 sm:$0xff]  }
 0x239   : > { %4151 = vmatpush1.bf16.msra.mxu0 %v6387_v37  ;;  %v6479_v37 = vld [vmem:[#allocation5 + $0x2c4] ss:$16 sps:$4 sm:$0xff]  }
 0x23a   : > { %4237 = vmatpush1.bf16.msra.mxu1 %v6390_v38  ;;  %4152 = vmatprep.subr.bf16.mxu0 %v6395_v39  ;;  %v6482_v38 = vld [vmem:[#allocation5 + $0x2cc] ss:$16 sps:$4 sm:$0xff]   ;;  %v6477_v39 = vld [vmem:[#allocation5 + $0x2c0] ss:$16 sps:$4 sm:$0xff]  }
 0x23b   : > { %4238 = vmatprep.subr.bf16.mxu1 %v6398_v42  ;;  %v6480_v42 = vld [vmem:[#allocation5 + $0x2c8] ss:$16 sps:$4 sm:$0xff]  }
 0x23d   : > { %4153 = vmatpush1.bf16.msra.mxu0 %v6393_v43  ;;  %v6485_v43 = vld [vmem:[#allocation5 + $0x2e4] ss:$16 sps:$4 sm:$0xff]  }
 0x23e   : > { %4239 = vmatpush1.bf16.msra.mxu1 %v6396_v44  ;;  %4154 = vmatprep.subr.bf16.mxu0 %v6401_v45  ;;  %v6488_v44 = vld [vmem:[#allocation5 + $0x2ec] ss:$16 sps:$4 sm:$0xff]   ;;  %v6483_v45 = vld [vmem:[#allocation5 + $0x2e0] ss:$16 sps:$4 sm:$0xff]  }
 0x23f   : > { %4240 = vmatprep.subr.bf16.mxu1 %v6404_v46  ;;  %v6486_v46 = vld [vmem:[#allocation5 + $0x2e8] ss:$16 sps:$4 sm:$0xff]  }
 0x241   : > { %4155 = vmatpush1.bf16.msra.mxu0 %v6399_v47  ;;  %v6491_v47 = vld [vmem:[#allocation5 + $0x304] ss:$16 sps:$4 sm:$0xff]  }
 0x242   : > { %4241 = vmatpush1.bf16.msra.mxu1 %v6402_v48  ;;  %4156 = vmatprep.subr.bf16.mxu0 %v6407_v50  ;;  %v6494_v48 = vld [vmem:[#allocation5 + $0x30c] ss:$16 sps:$4 sm:$0xff]   ;;  %v6489_v50 = vld [vmem:[#allocation5 + $0x300] ss:$16 sps:$4 sm:$0xff]  }
 0x243   : > { %4242 = vmatprep.subr.bf16.mxu1 %v6410_v51  ;;  %v6492_v51 = vld [vmem:[#allocation5 + $0x308] ss:$16 sps:$4 sm:$0xff]  }
 0x245   : > { %4157 = vmatpush1.bf16.msra.mxu0 %v6405_v52  ;;  %v6497_v52 = vld [vmem:[#allocation5 + $0x324] ss:$16 sps:$4 sm:$0xff]  }
 0x246   : > { %4243 = vmatpush1.bf16.msra.mxu1 %v6408_v53  ;;  %4158 = vmatprep.subr.bf16.mxu0 %v6413_v54  ;;  %v6500_v53 = vld [vmem:[#allocation5 + $0x32c] ss:$16 sps:$4 sm:$0xff]   ;;  %v6495_v54 = vld [vmem:[#allocation5 + $0x320] ss:$16 sps:$4 sm:$0xff]  }
 0x247   : > { %4244 = vmatprep.subr.bf16.mxu1 %v6416_v13  ;;  %v6498_v13 = vld [vmem:[#allocation5 + $0x328] ss:$16 sps:$4 sm:$0xff]  }
 0x249   : > { %4159 = vmatpush1.bf16.msra.mxu0 %v6411_v55  ;;  %v6503_v55 = vld [vmem:[#allocation5 + $0x344] ss:$16 sps:$4 sm:$0xff]  }
 0x24a   : > { %4245 = vmatpush1.bf16.msra.mxu1 %v6414_v56  ;;  %4160 = vmatprep.subr.bf16.mxu0 %v6419_v57  ;;  %v6506_v56 = vld [vmem:[#allocation5 + $0x34c] ss:$16 sps:$4 sm:$0xff]   ;;  %v6501_v57 = vld [vmem:[#allocation5 + $0x340] ss:$16 sps:$4 sm:$0xff]  }
 0x24b   : > { %4246 = vmatprep.subr.bf16.mxu1 %v6422_v58  ;;  %v6504_v58 = vld [vmem:[#allocation5 + $0x348] ss:$16 sps:$4 sm:$0xff]  }
 0x24d   : > { %4161 = vmatpush1.bf16.msra.mxu0 %v6417_v59  ;;  %v6509_v59 = vld [vmem:[#allocation5 + $0x364] ss:$16 sps:$4 sm:$0xff]  }
 0x24e   : > { %4247 = vmatpush1.bf16.msra.mxu1 %v6420_v60  ;;  %4162 = vmatprep.subr.bf16.mxu0 %v6425_v61  ;;  %v6512_v60 = vld [vmem:[#allocation5 + $0x36c] ss:$16 sps:$4 sm:$0xff]   ;;  %v6507_v61 = vld [vmem:[#allocation5 + $0x360] ss:$16 sps:$4 sm:$0xff]  }
 0x24f   : > { %4248 = vmatprep.subr.bf16.mxu1 %v6428_v62  ;;  %v6510_v62 = vld [vmem:[#allocation5 + $0x368] ss:$16 sps:$4 sm:$0xff]  }
 0x251   : > { %4163 = vmatpush1.bf16.msra.mxu0 %v6423_v63  ;;  %v6515_v63 = vld [vmem:[#allocation5 + $0x384] ss:$16 sps:$4 sm:$0xff]  }
 0x252   : > { %4249 = vmatpush1.bf16.msra.mxu1 %v6426_v0  ;;  %4164 = vmatprep.subr.bf16.mxu0 %v6431_v1  ;;  %v6518_v0 = vld [vmem:[#allocation5 + $0x38c] ss:$16 sps:$4 sm:$0xff]   ;;  %v6513_v1 = vld [vmem:[#allocation5 + $0x380] ss:$16 sps:$4 sm:$0xff]  }
 0x253   : > { %4250 = vmatprep.subr.bf16.mxu1 %v6434_v2  ;;  %v6516_v2 = vld [vmem:[#allocation5 + $0x388] ss:$16 sps:$4 sm:$0xff]  }
 0x255   : > { %4165 = vmatpush1.bf16.msra.mxu0 %v6429_v3  ;;  %v6521_v3 = vld [vmem:[#allocation5 + $0x3a4] ss:$16 sps:$4 sm:$0xff]  }
 0x256   : > { %4251 = vmatpush1.bf16.msra.mxu1 %v6432_v4  ;;  %4166 = vmatprep.subr.bf16.mxu0 %v6437_v33  ;;  %v6524_v4 = vld [vmem:[#allocation5 + $0x3ac] ss:$16 sps:$4 sm:$0xff]   ;;  %v6519_v33 = vld [vmem:[#allocation5 + $0x3a0] ss:$16 sps:$4 sm:$0xff]  }
 0x257   : > { %4252 = vmatprep.subr.bf16.mxu1 %v6440_v5  ;;  %v6522_v5 = vld [vmem:[#allocation5 + $0x3a8] ss:$16 sps:$4 sm:$0xff]  }
 0x259   : > { %4167 = vmatpush1.bf16.msra.mxu0 %v6435_v40  ;;  %v6530_v40 = vld [vmem:[#allocation5 + $0x3cc] ss:$16 sps:$4 sm:$0xff]  }
 0x25a   : > { %4253 = vmatpush1.bf16.msra.mxu1 %v6438_v8  ;;  %4179 = vmatprep.subr.bf16.mxu0 %v6443_v9  ;;  %v6525_v8 = vld [vmem:[#allocation5 + $0x3c0] ss:$16 sps:$4 sm:$0xff]   ;;  %v6528_v9 = vld [vmem:[#allocation5 + $0x3c8] ss:$16 sps:$4 sm:$0xff]  }
 0x25b   : > { %4265 = vmatprep.subr.bf16.mxu1 %v6446_v10  ;;  %v6533_v10 = vld [vmem:[#allocation5 + $0x3e4] ss:$16 sps:$4 sm:$0xff]  }
 0x25c   : > { %4169 = vmatmul.mubr.bf16.vlgmr.msra.gmra.mrb[4].mxu0 %v3488_v15 }
 0x25d   : > { %4255 = vmatmul.mubr.bf16.vlgmr.msra.gmra.mrb[4].mxu1 %v3488_v15  ;;  %4180 = vmatpush1.bf16.msra.mxu0 %v6441_v49  ;;  %v6536_v49 = vld [vmem:[#allocation5 + $0x3ec] ss:$16 sps:$4 sm:$0xff]  }
 0x25e   : > { %4266 = vmatpush1.bf16.msra.mxu1 %v6444_v12  ;;  %4181 = vmatprep.subr.bf16.mxu0 %v6449_v14  ;;  %v6534_v12 = vld [vmem:[#allocation5 + $0x3e8] ss:$16 sps:$4 sm:$0xff]   ;;  %v3490_v14 = vsel %vm3487_vm1, %v7025_v7, %v7034_v16  ;;  %v3315_v7 = vld [vmem:[%s7454_s4] sm:$0xf] }
 0x25f   : > { %4267 = vmatprep.subr.bf16.mxu1 %v6452_v17  ;;  %4211 = vmatprep.mubr.bf16.mxu0 %v3491_v18 }
 0x260   : > { %4297 = vmatprep.mubr.bf16.mxu1 %v3491_v18 }
 0x261   : > { %4182 = vmatpush1.bf16.msra.mxu0 %v6447_v22 }
 0x262   : > { %4268 = vmatpush1.bf16.msra.mxu1 %v6450_v19  ;;  %4183 = vmatprep.subr.bf16.mxu0 %v6455_v20 }
 0x263   : > { %4269 = vmatprep.subr.bf16.mxu1 %v6458_v21 }
 0x265   : > { %4184 = vmatpush1.bf16.msra.mxu0 %v6453_v41 }
 0x266   : > { %4270 = vmatpush1.bf16.msra.mxu1 %v6456_v23  ;;  %4185 = vmatprep.subr.bf16.mxu0 %v6461_v24  ;;  %v3317_v23 = vlaneseq }
 0x267   : > { %4271 = vmatprep.subr.bf16.mxu1 %v6464_v25 }
 0x268   : > { %v3318_v24 = vshrl.u32 %v3317_v23, 7  ;;  %v6541_v23 = vld [vmem:[%s7457_s7 + $0x48] sm:$0xff]  }
 0x269   : > { %4186 = vmatpush1.bf16.msra.mxu0 %v6459_v26 }
 0x26a   : > { %4272 = vmatpush1.bf16.msra.mxu1 %v6462_v27  ;;  %4187 = vmatprep.subr.bf16.mxu0 %v6467_v28  ;;  %v7041_v25 = vsub.s32 0, %v3318_v24  ;;  %v3327_v26 = vsub.s32 2, %v3318_v24  ;;  %v4308_v27 = vld [vmem:[%s7455_s5] sm:$0xf]  ;;  %v3323_v16 = vsub.s32 1, %v3318_v24  ;;  %v3331_v28 = vsub.s32 3, %v3318_v24 }
 0x26b   : > { %4273 = vmatprep.subr.bf16.mxu1 %v6470_v29  ;;  %v6542_v24 = vld [vmem:[%s7457_s7 + $0xc8] sm:$0xff]  }
 0x26c   : > { %v4313_v29 = vrot.slane %v4308_v27, %v7041_v25 }
 0x26d   : > { %4188 = vmatpush1.bf16.msra.mxu0 %v6465_v30  ;;  %v3320_v30 = vrot.slane %v3315_v7, %v7041_v25 }
 0x26e   : > { %4274 = vmatpush1.bf16.msra.mxu1 %v6468_v31  ;;  %4189 = vmatprep.subr.bf16.mxu0 %v6473_v32  ;;  %v3328_v31 = vrot.slane %v3315_v7, %v3327_v26  ;;  %v4321_v32 = vrot.slane %v4308_v27, %v3327_v26  ;;  %v6543_v26 = vld [vmem:[%s7457_s7 + $0x8] sm:$0xff]  }
 0x26f   : > { %4275 = vmatprep.subr.bf16.mxu1 %v6476_v34  ;;  %v4317_v34 = vrot.slane %v4308_v27, %v3323_v16 }
 0x271   : > { %4190 = vmatpush1.bf16.msra.mxu0 %v6471_v35  ;;  %v3324_v35 = vrot.slane %v3315_v7, %v3323_v16  ;;  %v6546_v16 = vld [vmem:[%s7457_s7 + $0xd0] sm:$0xff]  }
 0x272   : > { %4276 = vmatpush1.bf16.msra.mxu1 %v6474_v36  ;;  %4191 = vmatprep.subr.bf16.mxu0 %v6479_v37  ;;  %v3332_v36 = vrot.slane %v3315_v7, %v3331_v28  ;;  %v4325_v37 = vrot.slane %v4308_v27, %v3331_v28  ;;  %v6544_v27 = vld [vmem:[%s7457_s7 + $0x88] sm:$0xff]   ;;  %v6545_v7 = vld [vmem:[%s7457_s7 + $0x50] sm:$0xff]  }
 0x273   : > { %4277 = vmatprep.subr.bf16.mxu1 %v6482_v38  ;;  %v6547_v28 = vld [vmem:[%s7457_s7 + $0x10] sm:$0xff]  }
 0x275   : > { %4192 = vmatpush1.bf16.msra.mxu0 %v6477_v39 }
 0x276   : > { %4278 = vmatpush1.bf16.msra.mxu1 %v6480_v42  ;;  %4193 = vmatprep.subr.bf16.mxu0 %v6485_v43 }
 0x277   : > { %4279 = vmatprep.subr.bf16.mxu1 %v6488_v44 }
 0x279   : > { %4194 = vmatpush1.bf16.msra.mxu0 %v6483_v45 }
 0x27a   : > { %4280 = vmatpush1.bf16.msra.mxu1 %v6486_v46  ;;  %4195 = vmatprep.subr.bf16.mxu0 %v6491_v47 }
 0x27b   : > { %4281 = vmatprep.subr.bf16.mxu1 %v6494_v48 }
 0x27d   : > { %4196 = vmatpush1.bf16.msra.mxu0 %v6489_v50 }
 0x27e   : > { %4282 = vmatpush1.bf16.msra.mxu1 %v6492_v51  ;;  %4197 = vmatprep.subr.bf16.mxu0 %v6497_v52 }
 0x27f   : > { %4283 = vmatprep.subr.bf16.mxu1 %v6500_v53 }
 0x281   : > { %4198 = vmatpush1.bf16.msra.mxu0 %v6495_v54 }
 0x282   : > { %4284 = vmatpush1.bf16.msra.mxu1 %v6498_v13  ;;  %4199 = vmatprep.subr.bf16.mxu0 %v6503_v55 }
 0x283   : > { %4285 = vmatprep.subr.bf16.mxu1 %v6506_v56 }
 0x285   : > { %4200 = vmatpush1.bf16.msra.mxu0 %v6501_v57 }
 0x286   : > { %4286 = vmatpush1.bf16.msra.mxu1 %v6504_v58  ;;  %4201 = vmatprep.subr.bf16.mxu0 %v6509_v59 }
 0x287   : > { %4287 = vmatprep.subr.bf16.mxu1 %v6512_v60 }
 0x289   : > { %4202 = vmatpush1.bf16.msra.mxu0 %v6507_v61 }
 0x28a   : > { %4288 = vmatpush1.bf16.msra.mxu1 %v6510_v62  ;;  %4203 = vmatprep.subr.bf16.mxu0 %v6515_v63 }
 0x28b   : > { %4289 = vmatprep.subr.bf16.mxu1 %v6518_v0 }
 0x28d   : > { %4204 = vmatpush1.bf16.msra.mxu0 %v6513_v1 }
 0x28e   : > { %4290 = vmatpush1.bf16.msra.mxu1 %v6516_v2  ;;  %4205 = vmatprep.subr.bf16.mxu0 %v6521_v3 }
 0x28f   : > { %4291 = vmatprep.subr.bf16.mxu1 %v6524_v4 }
 0x291   : > { %4206 = vmatpush1.bf16.msra.mxu0 %v6519_v33 }
 0x292   : > { %4292 = vmatpush1.bf16.msra.mxu1 %v6522_v5  ;;  %4207 = vmatprep.subr.bf16.mxu0 %v6527_v6 }
 0x293   : > { %4293 = vmatprep.subr.bf16.mxu1 %v6530_v40 }
 0x295   : > { %4208 = vmatpush1.bf16.msra.mxu0 %v6525_v8 }
 0x296   : > { %4294 = vmatpush1.bf16.msra.mxu1 %v6528_v9  ;;  %4209 = vmatprep.subr.bf16.mxu0 %v6533_v10 }
 0x297   : > { %4295 = vmatprep.subr.bf16.mxu1 %v6536_v49  ;;  %v6645_v49 = vld [vmem:[%s6952_s17 + $0x20] sm:$0xff] }
 0x299   : > { %4210 = vmatpush1.bf16.msra.mxu0 %v6531_v11  ;;  %v6646_v11 = vld [vmem:[%s6952_s17 + $0x80] sm:$0xff] }
 0x29a   : > { %4296 = vmatpush1.bf16.msra.mxu1 %v6534_v12  ;;  %v6647_v12 = vld [vmem:[%s6952_s17 + $0x88] sm:$0xff] }
 0x29c   : > { %4212 = vmatmul.mubr.bf16.vlgmr.msra.gmra.mrb[4].mxu0 %v3490_v14 }
 0x29d   : > { %4298 = vmatmul.mubr.bf16.vlgmr.msra.gmra.mrb[4].mxu1 %v3490_v14  ;;  %v6648_v14 = vld [vmem:[%s6952_s17 + $0x28] sm:$0xff] }
 0x2ef   : > { %v3220_v15 = vpop.f32.mrb[0].mxu0 }
 0x2f0   : > { %v3306_v17 = vpop.f32.mrb[0].mxu1  ;;  %v3222_v18 = vpop.f32.mrb[1].mxu0  ;;  %v7053_v44 = vadd.f32 %v3320_v30, %v3220_v15  ;;  %v7108_v15 = vld [vmem:[%s6952_s17 + $0x78] sm:$0xff] }
 0x2f1   : > { %v3308_v22 = vpop.f32.mrb[1].mxu1  ;;  %v3224_v19 = vpop.f32.mrb[2].mxu0  ;;  %v7055_v45 = vadd.f32 %v3328_v31, %v3306_v17  ;;  %v7061_v51 = vadd.f32 %v3324_v35, %v3222_v18  ;;  %v7113_v17 = vld [vmem:[%s6952_s17 + $0x18] sm:$0xff] }
 0x2f2   : > { %v3310_v20 = vpop.f32.mrb[2].mxu1  ;;  %v3226_v21 = vpop.f32.mrb[3].mxu0  ;;  %v7063_v52 = vadd.f32 %v3332_v36, %v3308_v22  ;;  %v7075_v60 = vadd.f32 %v3320_v30, %v3224_v19  ;;  %v6651_v18 = vld [vmem:[%s6952_s17 + $0x38] sm:$0xff]  ;;  %v6652_v22 = vld [vmem:[%s6952_s17 + $0x30] sm:$0xff]  ;;  %v6537_v19 = vld [vmem:[%s7457_s7 + $0x40] sm:$0xff]  }
 0x2f3   : > { %v3312_v41 = vpop.f32.mrb[3].mxu1  ;;  %v4338_v63 = vmax.f32 %v7053_v44, %v7055_v45  ;;  %v7083_v0 = vadd.f32 %v3328_v31, %v3310_v20  ;;  %v7085_v1 = vadd.f32 %v3324_v35, %v3226_v21  ;;  %v6538_v20 = vld [vmem:[%s7457_s7 + $0xc0] sm:$0xff]   ;;  %5967 = vmatprep.subr.bf16.mxu0 %v6537_v19 }
 0x2f4   : > { %v4339_v3 = vmax.f32 %v7061_v51, %v7063_v52  ;;  %v7091_v4 = vadd.f32 %v3332_v36, %v3312_v41  ;;  %v6539_v21 = vld [vmem:[%s7457_s7] sm:$0xff]   ;;  %5989 = vmatprep.subr.bf16.mxu1 %v6538_v20 }
 0x2f5   : > { %v4343_v40 = vmax.f32 %v7075_v60, %v7083_v0  ;;  %v6540_v41 = vld [vmem:[%s7457_s7 + $0x80] sm:$0xff]   ;;  %5968 = vmatpush3.bf16.msra.mxu0 %v6539_v21 }
 0x2f6   : > { %v4344_v8 = vmax.f32 %v7085_v1, %v7091_v4  ;;  %v4340_v9 = vmax.f32 %v4338_v63, %v4339_v3  ;;  %5990 = vmatpush3.bf16.msra.mxu1 %v6540_v41  ;;  %5969 = vmatprep.subr.bf16.mxu0 %v6541_v23  ;;  %v6555_v19 = vld [vmem:[%s7457_s7 + $0x20] sm:$0xff]  }
 0x2f7   : > { %5991 = vmatprep.subr.bf16.mxu1 %v6542_v24  ;;  %v6556_v20 = vld [vmem:[%s7457_s7 + $0xa0] sm:$0xff]  }
 0x2f8   : > { %v4345_v10 = vmax.f32 %v4343_v40, %v4344_v8 }
 0x2f9   : > { %5970 = vmatpush3.bf16.msra.mxu0 %v6543_v26 }
 0x2fa   : > { %5992 = vmatpush3.bf16.msra.mxu1 %v6544_v27  ;;  %5971 = vmatprep.subr.bf16.mxu0 %v6545_v7  ;;  %v6654_v7 = vld [vmem:[%s6952_s17 + $0x90] sm:$0xff] }
 0x2fb   : > { %5993 = vmatprep.subr.bf16.mxu1 %v6546_v16  ;;  %v6557_v16 = vld [vmem:[%s7457_s7 + $0x68] sm:$0xff]  }
 0x2fd   : > { %5972 = vmatpush3.bf16.msra.mxu0 %v6547_v28 }
 0x36f   : > { %v4213_v38 = vpop.f32.mrb[4].mxu0 }
 0x370   : > { %v7051_v39 = vadd.f32 %v4313_v29, %v4213_v38  ;;  %v4299_v42 = vpop.f32.mrb[4].mxu1  ;;  %v4215_v43 = vpop.f32.mrb[5].mxu0 }
 0x371   : > { %v7057_v46 = vadd.f32 %v4321_v32, %v4299_v42  ;;  %v7059_v47 = vadd.f32 %v4317_v34, %v4215_v43  ;;  %v4301_v48 = vpop.f32.mrb[5].mxu1  ;;  %v4217_v50 = vpop.f32.mrb[6].mxu0 }
 0x372   : > { %v7065_v53 = vadd.f32 %v4325_v37, %v4301_v48  ;;  %v7067_v54 = vadd.f32 %v4313_v29, %v4217_v50  ;;  %v4303_v13 = vpop.f32.mrb[6].mxu1  ;;  %v4219_v55 = vpop.f32.mrb[7].mxu0  ;;  %v6548_v29 = vld [vmem:[%s7457_s7 + $0x90] sm:$0xff]  }
 0x373   : > { %v4392_v56 = vmax.f32 %v7051_v39, %v7057_v46  ;;  %v7071_v57 = vadd.f32 %v4321_v32, %v4303_v13  ;;  %v7073_v58 = vadd.f32 %v4317_v34, %v4219_v55  ;;  %v4305_v59 = vpop.f32.mrb[7].mxu1  ;;  %5994 = vmatpush3.bf16.msra.mxu1 %v6548_v29 }
 0x374   : > { %v4393_v61 = vmax.f32 %v7059_v47, %v7065_v53  ;;  %v7079_v62 = vadd.f32 %v4325_v37, %v4305_v59 }
 0x375   : > { %v4397_v2 = vmax.f32 %v7067_v54, %v7071_v57 }
 0x376   : > { %v4398_v33 = vmax.f32 %v7073_v58, %v7079_v62  ;;  %v4394_v5 = vmax.f32 %v4392_v56, %v4393_v61 }
 0x378   : > { %4395 = vmax.xlane.f32.xlu0 %v4394_v5  ;;  %v4399_v6 = vmax.f32 %v4397_v2, %v4398_v33 }
 0x37a   : > { %4400 = vmax.xlane.f32.xlu1 %v4399_v6 }
 0x37c   : > { %4341 = vmax.xlane.f32.xlu0 %v4340_v9  ;;  %v6549_v9 = vld [vmem:[%s7457_s7 + $0x58] sm:$0xff]  }
 0x37d   : > { %5973 = vmatprep.subr.bf16.mxu0 %v6549_v9 }
 0x380   : > { %4346 = vmax.xlane.f32.xlu0 %v4345_v10  ;;  %v6550_v10 = vld [vmem:[%s7457_s7 + $0xd8] sm:$0xff]  }
 0x381   : > { %5995 = vmatprep.subr.bf16.mxu1 %v6550_v10 }
 0x38b   : > { %4470 = vrot.lane.b32.xlu1 %v6645_v49, %s6769_s26  ;;  %v6551_v49 = vld [vmem:[%s7457_s7 + $0x18] sm:$0xff]  }
 0x38c   : > { %5974 = vmatpush3.bf16.msra.mxu0 %v6551_v49 }
 0x38f   : > { %4480 = vrot.lane.b32.xlu1 %v6646_v11, %s6769_s26  ;;  %v6552_v11 = vld [vmem:[%s7457_s7 + $0x98] sm:$0xff]  }
 0x390   : > { %5996 = vmatpush3.bf16.msra.mxu1 %v6552_v11 }
 0x393   : > { %4482 = vrot.lane.b32.xlu1 %v6647_v12, %s6769_s26  ;;  %v6653_v12 = vld [vmem:[%s6952_s17 + $0x98] sm:$0xff] }
 0x396   : > { %4472 = vrot.lane.b32.xlu0 %v6648_v14, %s6769_s26 }
 0x397   : > { %4478 = vrot.lane.b32.xlu1 %v7108_v15, %s6769_s26 }
 0x39a   : > { %4468 = vrot.lane.b32.xlu0 %v7113_v17, %s6769_s26 }
 0x39b   : > { %4476 = vrot.lane.b32.xlu1 %v6651_v18, %s6769_s26  ;;  %v6553_v18 = vld [vmem:[%s7457_s7 + $0x60] sm:$0xff]  }
 0x39c   : > { %5975 = vmatprep.subr.bf16.mxu0 %v6553_v18 }
 0x39d   : > { %5976 = vmatpush3.bf16.msra.mxu0 %v6555_v19 }
 0x39e   : > { %4474 = vrot.lane.b32.xlu0 %v6652_v22, %s6769_s26  ;;  %v6554_v22 = vld [vmem:[%s7457_s7 + $0xe0] sm:$0xff]   ;;  %5977 = vmatprep.subr.bf16.mxu0 %v6557_v16 }
 0x39f   : > { %5997 = vmatprep.subr.bf16.mxu1 %v6554_v22 }
 0x3a0   : > { %5998 = vmatpush3.bf16.msra.mxu1 %v6556_v20 }
 0x405   : > { %v4396_v30 = vpop.xlane.xlu0 %4395 }
 0x406   : > { %v4402_v31 = vsub.f32 %v7051_v39, %v4396_v30  ;;  %v4403_v32 = vsub.f32 %v7059_v47, %v4396_v30  ;;  %v4404_v34 = vsub.f32 %v7057_v46, %v4396_v30  ;;  %v4405_v35 = vsub.f32 %v7065_v53, %v4396_v30  ;;  %v6561_v30 = vld [vmem:[%s7457_s7 + $0x70] sm:$0xff]  }
 0x407   : > { %v4401_v36 = vpop.xlane.xlu1 %4400 }
 0x408   : > { %v4410_v37 = vmul.f32 1.442695, %v4402_v31  ;;  %v4412_v38 = vmul.f32 1.442695, %v4403_v32  ;;  %v4414_v42 = vmul.f32 1.442695, %v4404_v34  ;;  %v4406_v43 = vsub.f32 %v7067_v54, %v4401_v36 }
 0x409   : > { %v4416_v48 = vmul.f32 1.442695, %v4405_v35  ;;  %v4407_v50 = vsub.f32 %v7073_v58, %v4401_v36  ;;  %v4408_v13 = vsub.f32 %v7071_v57, %v4401_v36  ;;  %v4409_v39 = vsub.f32 %v7079_v62, %v4401_v36  ;;  %v7189_v8 = vpop.xlane.xlu0 %4341  ;;  %v6562_v31 = vld [vmem:[%s7457_s7 + $0xf0] sm:$0xff]  }
 0x40a   : > { %6601 = vpow2.f32 %v4410_v37  ;;  %v4418_v55 = vmul.f32 1.442695, %v4406_v43  ;;  %v4348_v23 = vsub.f32 %v7053_v44, %v7189_v8  ;;  %v4349_v26 = vsub.f32 %v7061_v51, %v7189_v8  ;;  %v6559_v44 = vld [vmem:[%s7457_s7 + $0x28] sm:$0xff]   ;;  %v6564_v34 = vld [vmem:[%s7457_s7 + $0xb0] sm:$0xff]   ;;  %v6566_v37 = vld [vmem:[%s7457_s7 + $0xf8] sm:$0xff]  }
 0x40b   : > { %6603 = vpow2.f32 %v4412_v38  ;;  %v4420_v47 = vmul.f32 1.442695, %v4407_v50  ;;  %v4422_v46 = vmul.f32 1.442695, %v4408_v13  ;;  %v4424_v53 = vmul.f32 1.442695, %v4409_v39  ;;  %5978 = vmatpush3.bf16.msra.mxu0 %v6559_v44  ;;  %v4471_v49 = vpop.permute.xlu1 %4470 }
 0x40c   : > { %6605 = vpow2.f32 %v4414_v42  ;;  %v6560_v51 = vld [vmem:[%s7457_s7 + $0xa8] sm:$0xff]   ;;  %v4356_v28 = vmul.f32 1.442695, %v4348_v23  ;;  %v4358_v29 = vmul.f32 1.442695, %v4349_v26  ;;  %v4350_v32 = vsub.f32 %v7055_v45, %v7189_v8  ;;  %5979 = vmatprep.subr.bf16.mxu0 %v6561_v30  ;;  %v6565_v45 = vld [vmem:[%s7457_s7 + $0x78] sm:$0xff]  }
 0x40d   : > { %6607 = vpow2.f32 %v4416_v48  ;;  %v4347_v14 = vpop.xlane.xlu0 %4346  ;;  %v6567_v38 = vld [vmem:[%s7457_s7 + $0x38] sm:$0xff]   ;;  %v4351_v43 = vsub.f32 %v7063_v52, %v7189_v8  ;;  %v6569_v50 = vld [vmem:[%s7456_s6 + $0x40] sm:$0xff]  }
 0x40e   : > { %6609 = vpow2.f32 %v4418_v55  ;;  %v4352_v21 = vsub.f32 %v7075_v60, %v4347_v14  ;;  %v4353_v41 = vsub.f32 %v7085_v1, %v4347_v14  ;;  %v6558_v60 = vld [vmem:[%s7457_s7 + $0xe8] sm:$0xff]   ;;  %v4354_v1 = vsub.f32 %v7083_v0, %v4347_v14  ;;  %v6563_v0 = vld [vmem:[%s7457_s7 + $0x30] sm:$0xff]   ;;  %v6570_v13 = vld [vmem:[%s7456_s6 + $0xc0] sm:$0xff]  }
 0x40f   : > { %6611 = vpow2.f32 %v4420_v47  ;;  %5999 = vmatprep.subr.bf16.mxu1 %v6558_v60  ;;  %v4355_v35 = vsub.f32 %v7091_v4, %v4347_v14  ;;  %5980 = vmatpush3.bf16.msra.mxu0 %v6563_v0  ;;  %v6568_v4 = vld [vmem:[%s7457_s7 + $0xb8] sm:$0xff]   ;;  %v4360_v42 = vmul.f32 1.442695, %v4350_v32  ;;  %v4362_v52 = vmul.f32 1.442695, %v4351_v43  ;;  %v4481_v11 = vpop.permute.xlu1 %4480 }
 0x410   : > { %6613 = vpow2.f32 %v4422_v46  ;;  %v4364_v24 = vmul.f32 1.442695, %v4352_v21  ;;  %v4366_v27 = vmul.f32 1.442695, %v4353_v41  ;;  %6000 = vmatpush3.bf16.msra.mxu1 %v6560_v51  ;;  %v4368_v36 = vmul.f32 1.442695, %v4354_v1  ;;  %5981 = vmatprep.subr.bf16.mxu0 %v6565_v45 }
 0x411   : > { %6615 = vpow2.f32 %v4424_v53  ;;  %6001 = vmatprep.subr.bf16.mxu1 %v6562_v31  ;;  %v4370_v48 = vmul.f32 1.442695, %v4355_v35  ;;  %v4473_v14 = vpop.permute.xlu0 %4472 }
 0x412   : > { %6617 = vpow2.f32 %v4364_v24  ;;  %v4490_v60 = vsel %vm3487_vm1, %v4471_v49, %v4473_v14 }
 0x413   : > { %6619 = vpow2.f32 %v4366_v27  ;;  %5982 = vmatpush3.bf16.msra.mxu0 %v6567_v38 }
 0x414   : > { %v7165_v54 = vpop.eup %6601  ;;  %6621 = vpow2.f32 %v4356_v28  ;;  %6002 = vmatpush3.bf16.msra.mxu1 %v6564_v34  ;;  %6011 = vmatprep.subr.bf16.mxu0 %v6569_v50 }
 0x415   : > { %v7167_v56 = vpop.eup %6603  ;;  %6623 = vpow2.f32 %v4358_v29  ;;  %6003 = vmatprep.subr.bf16.mxu1 %v6566_v37  ;;  %v4469_v22 = vpop.permute.xlu0 %4468 }
 0x416   : > { %v7169_v58 = vpop.eup %6605  ;;  %v4426_v57 = vadd.f32 %v7167_v56, %v7165_v54  ;;  %6625 = vpow2.f32 %v4368_v36  ;;  %v4489_v51 = vsel %vm3487_vm1, %v4469_v22, %v4471_v49  ;;  %v6582_v49 = vld [vmem:[%s7456_s6 + $0xd8] sm:$0xff]   ;;  %v6587_v22 = vld [vmem:[%s7456_s6 + $0x20] sm:$0xff]  }
 0x417   : > { %v7173_v59 = vpop.eup %6607  ;;  %6627 = vpow2.f32 %v4360_v42 }
 0x418   : > { %v7175_v61 = vpop.eup %6609  ;;  %v4427_v62 = vadd.f32 %v7169_v58, %v4426_v57  ;;  %6004 = vmatpush3.bf16.msra.mxu1 %v6568_v4  ;;  %6629 = vpow2.f32 %v4370_v48 }
 0x419   : > { %v7178_v63 = vpop.eup %6611  ;;  %6033 = vmatprep.subr.bf16.mxu1 %v6570_v13  ;;  %6631 = vpow2.f32 %v4362_v52  ;;  %v4475_v20 = vpop.permute.xlu0 %4474  ;;  %v6575_v52 = vld [vmem:[%s7456_s6 + $0x8] sm:$0xff]  }
 0x41a   : > { %v4428_v2 = vadd.f32 %v7173_v59, %v4427_v62  ;;  %v4431_v3 = vadd.f32 %v7178_v63, %v7175_v61  ;;  %v7183_v33 = vpop.eup %6613  ;;  %v4491_v30 = vsel %vm3487_vm1, %v4473_v14, %v4475_v20  ;;  %v6585_v14 = vld [vmem:[%s7456_s6 + $0x60] sm:$0xff]  }
 0x41b   : > { %v7186_v6 = vpop.eup %6615 }
 0x41c   : > { %4429 = vadd.xlane.f32.xlu1 %v4428_v2  ;;  %v4432_v5 = vadd.f32 %v7183_v33, %v4431_v3  ;;  %v7273_v55 = vpop.eup %6617 }
 0x41d   : > { %v7275_v39 = vpop.eup %6619 }
 0x41e   : > { %v4433_v40 = vadd.f32 %v7186_v6, %v4432_v5  ;;  %v7277_v47 = vpop.eup %6621  ;;  %v4377_v46 = vadd.f32 %v7275_v39, %v7273_v55 }
 0x41f   : > { %v7281_v53 = vpop.eup %6623 }
 0x420   : > { %4434 = vadd.xlane.f32.xlu0 %v4433_v40  ;;  %v7283_v57 = vpop.eup %6625  ;;  %v4372_v2 = vadd.f32 %v7281_v53, %v7277_v47 }
 0x421   : > { %v4378_v62 = vadd.f32 %v7283_v57, %v4377_v46  ;;  %v7288_v3 = vpop.eup %6627  ;;  %v6576_v46 = vld [vmem:[%s7456_s6 + $0x88] sm:$0xff]  }
 0x422   : > { %v7290_v5 = vpop.eup %6629  ;;  %v4373_v8 = vadd.f32 %v7288_v3, %v4372_v2  ;;  %v6578_v2 = vld [vmem:[%s7456_s6 + $0xd0] sm:$0xff]  }
 0x423   : > { %v4379_v40 = vadd.f32 %v7290_v5, %v4378_v62  ;;  %v7294_v9 = vpop.eup %6631  ;;  %v6577_v62 = vld [vmem:[%s7456_s6 + $0x50] sm:$0xff]  }
 0x424   : > { %v4374_v10 = vadd.f32 %v7294_v9, %v4373_v8  ;;  %v6580_v8 = vld [vmem:[%s7456_s6 + $0x90] sm:$0xff]  }
 0x42d   : > { %4486 = vrot.lane.b32.xlu1 %v6653_v12, %s6769_s26  ;;  %v4483_v12 = vpop.permute.xlu1 %4482 }
 0x42e   : > { %v4494_v44 = vsel %vm3487_vm1, %v4481_v11, %v4483_v12 }
 0x431   : > { %v4479_v18 = vpop.permute.xlu1 %4478 }
 0x432   : > { %v4493_v1 = vsel %vm3487_vm1, %v4479_v18, %v4481_v11  ;;  %v6583_v11 = vld [vmem:[%s7456_s6 + $0x18] sm:$0xff]   ;;  %v6586_v18 = vld [vmem:[%s7456_s6 + $0xe0] sm:$0xff]  }
 0x435   : > { %v4477_v19 = vpop.permute.xlu1 %4476 }
 0x436   : > { %4484 = vrot.lane.b32.xlu0 %v6654_v7, %s6769_s26  ;;  %s433_s26 = scalar_lea.vmem %s7461_s11, %s7468_s20 }
 0x451   : > { %4380 = vadd.xlane.f32.xlu1 %v4379_v40  ;;  %v6579_v40 = vld [vmem:[%s7456_s6 + $0x10] sm:$0xff]  }
 0x455   : > { %4375 = vadd.xlane.f32.xlu0 %v4374_v10  ;;  %v6581_v10 = vld [vmem:[%s7456_s6 + $0x58] sm:$0xff]  }
 0x4a9   : > { %v4430_v21 = vpop.xlane.xlu1 %4429 }
 0x4aa   : > { %6633 = vrcp.f32 %v4430_v21  ;;  %v6590_v21 = vld [vmem:[%s7456_s6 + $0xe8] sm:$0xff]  }
 0x4ad   : > { %v4435_v41 = vpop.xlane.xlu0 %4434  ;;  %v4487_v28 = vpop.permute.xlu1 %4486 }
 0x4ae   : > { %6635 = vrcp.f32 %v4435_v41  ;;  %v6591_v41 = vld [vmem:[%s7456_s6 + $0x28] sm:$0xff]  }
 0x4b1   : > { %v4485_v24 = vpop.permute.xlu0 %4484 }
 0x4b4   : > { %v6634_v23 = vpop.eup %6633 }
 0x4b5   : > { %v4439_v26 = vmul.f32 %v6634_v23, %v7169_v58  ;;  %v4438_v27 = vmul.f32 %v6634_v23, %v7167_v56  ;;  %v4440_v7 = vmul.f32 %v6634_v23, %v7173_v59  ;;  %v4437_v16 = vmul.f32 %v6634_v23, %v7165_v54  ;;  %v6592_v23 = vld [vmem:[%s7456_s6 + $0xa8] sm:$0xff]  }
 0x4b6   : > { %v4492_v58 = vsel %vm3487_vm1, %v4475_v20, %v4477_v19  ;;  %v4495_v56 = vsel %vm3487_vm1, %v4483_v12, %v4485_v24  ;;  %v4496_v59 = vsel %vm3487_vm1, %v4485_v24, %v4487_v28  ;;  %v6584_v12 = vld [vmem:[%s7456_s6 + $0x98] sm:$0xff]   ;;  %v6588_v19 = vld [vmem:[%s7456_s6 + $0xa0] sm:$0xff]   ;;  %v6589_v20 = vld [vmem:[%s7456_s6 + $0x68] sm:$0xff]  }
 0x4b7   : > { %v4507_v34 = vmul.f32 %v4491_v30, %v4439_v26  ;;  %v4506_v35 = vmul.f32 %v4490_v60, %v4438_v27  ;;  %v4508_v36 = vmul.f32 %v4492_v58, %v4440_v7  ;;  %v4505_v45 = vmul.f32 %v4489_v51, %v4437_v16  ;;  %v6593_v24 = vld [vmem:[%s7456_s6 + $0x70] sm:$0xff]   ;;  %v6597_v16 = vld [vmem:[%s7456_s6 + $0x78] sm:$0xff]  }
 0x4b8   : > { %v6636_v29 = vpop.eup %6635  ;;  %v6594_v26 = vld [vmem:[%s7456_s6 + $0xf0] sm:$0xff]   ;;  %v6598_v60 = vld [vmem:[%s7456_s6 + $0xf8] sm:$0xff]  }
 0x4b9   : > { %v4444_v54 = vmul.f32 %v6636_v29, %v7183_v33  ;;  %v4445_v31 = vmul.f32 %v6636_v29, %v7186_v6  ;;  %v4443_v32 = vmul.f32 %v6636_v29, %v7178_v63  ;;  %v4442_v0 = vmul.f32 %v6636_v29, %v7175_v61  ;;  %v6571_v33 = vld [vmem:[%s7456_s6] sm:$0xff]   ;;  %v6573_v63 = vld [vmem:[%s7456_s6 + $0x48] sm:$0xff]   ;;  %v6595_v27 = vld [vmem:[%s7456_s6 + $0x30] sm:$0xff]  }
 0x4ba   : > { %v6572_v61 = vld [vmem:[%s7456_s6 + $0x80] sm:$0xff]   ;;  %v6574_v6 = vld [vmem:[%s7456_s6 + $0xc8] sm:$0xff]   ;;  %v6596_v7 = vld [vmem:[%s7456_s6 + $0xb0] sm:$0xff]  }
 0x4bb   : > { %v4511_v37 = vmul.f32 %v4495_v56, %v4444_v54  ;;  %v4512_v38 = vmul.f32 %v4496_v59, %v4445_v31  ;;  %v4510_v4 = vmul.f32 %v4494_v44, %v4443_v32  ;;  %v4509_v42 = vmul.f32 %v4493_v1, %v4442_v0  ;;  %v6599_v44 = vld [vmem:[%s7456_s6 + $0x38] sm:$0xff]  }
 0x4bc   : > { %v6600_v51 = vld [vmem:[%s7456_s6 + $0xb8] sm:$0xff]  }
 0x4bd   : > { %v4515_v43 = vpack.c.bf16 %v4511_v37, %v4507_v34  ;;  %v4514_v48 = vpack.c.bf16 %v4510_v4, %v4506_v35  ;;  %v4516_v50 = vpack.c.bf16 %v4512_v38, %v4508_v36  ;;  %v4513_v13 = vpack.c.bf16 %v4509_v42, %v4505_v45  ;;  %v6655_v35 = vld [vmem:[%s6952_s17 + $0x68] sm:$0xff] }
 0x4bf   : > { %4869 = vmatprep.mubr.bf16.mxu0 %v4514_v48  ;;  %4910 = vmatprep.mubr.bf16.mxu1 %v4516_v50 }
 0x4c0   : > { %4870 = vmatmul.mubr.bf16.vlgmr.msra.gmra.mrb[8].mxu0 %v4513_v13  ;;  %4911 = vmatmul.mubr.bf16.vlgmr.msra.gmra.mrb[8].mxu1 %v4515_v43  ;;  %v6660_v43 = vld [vmem:[%s6952_s17 + $0x10] sm:$0xff]  ;;  %v6770_v13 = vmov 0  }
 0x4c1   : > { %6012 = vmatpush3.bf16.msra.mxu0 %v6571_v33  ;;  %6034 = vmatpush3.bf16.msra.mxu1 %v6572_v61 }
 0x4c2   : > { %6013 = vmatprep.subr.bf16.mxu0 %v6573_v63  ;;  %6035 = vmatprep.subr.bf16.mxu1 %v6574_v6 }
 0x4c3   : > { %6151 = vset.pattern.permute.xlu1 %v6770_v13 }
 0x4c5   : > { %6014 = vmatpush3.bf16.msra.mxu0 %v6575_v52  ;;  %6036 = vmatpush3.bf16.msra.mxu1 %v6576_v46 }
 0x4c6   : > { %6015 = vmatprep.subr.bf16.mxu0 %v6577_v62  ;;  %6037 = vmatprep.subr.bf16.mxu1 %v6578_v2 }
 0x4c9   : > { %6016 = vmatpush3.bf16.msra.mxu0 %v6579_v40  ;;  %6038 = vmatpush3.bf16.msra.mxu1 %v6580_v8 }
 0x4ca   : > { %6017 = vmatprep.subr.bf16.mxu0 %v6581_v10  ;;  %6039 = vmatprep.subr.bf16.mxu1 %v6582_v49 }
 0x4cd   : > { %6018 = vmatpush3.bf16.msra.mxu0 %v6583_v11  ;;  %6040 = vmatpush3.bf16.msra.mxu1 %v6584_v12 }
 0x4ce   : > { %6019 = vmatprep.subr.bf16.mxu0 %v6585_v14  ;;  %6041 = vmatprep.subr.bf16.mxu1 %v6586_v18 }
 0x4d1   : > { %6020 = vmatpush3.bf16.msra.mxu0 %v6587_v22  ;;  %6042 = vmatpush3.bf16.msra.mxu1 %v6588_v19 }
 0x4d2   : > { %6021 = vmatprep.subr.bf16.mxu0 %v6589_v20  ;;  %6043 = vmatprep.subr.bf16.mxu1 %v6590_v21 }
 0x4d5   : > { %6022 = vmatpush3.bf16.msra.mxu0 %v6591_v41  ;;  %6044 = vmatpush3.bf16.msra.mxu1 %v6592_v23 }
 0x4d6   : > { %6023 = vmatprep.subr.bf16.mxu0 %v6593_v24  ;;  %6045 = vmatprep.subr.bf16.mxu1 %v6594_v26 }
 0x4d9   : > { %6024 = vmatpush3.bf16.msra.mxu0 %v6595_v27  ;;  %6046 = vmatpush3.bf16.msra.mxu1 %v6596_v7 }
 0x4da   : > { %6025 = vmatprep.subr.bf16.mxu0 %v6597_v16  ;;  %6047 = vmatprep.subr.bf16.mxu1 %v6598_v60  ;;  %v5963_v16 = vld [vmem:[%s7458_s8] ss:$0 sm:$0xff] }
 0x4dd   : > { %6026 = vmatpush3.bf16.msra.mxu0 %v6599_v44  ;;  %6048 = vmatpush3.bf16.msra.mxu1 %v6600_v51 }
 0x4de   : > { %v4381_v1 = vpop.xlane.xlu1 %4380 }
 0x4df   : > { %6637 = vrcp.f32 %v4381_v1 }
 0x4e2   : > { %v4376_v28 = vpop.xlane.xlu0 %4375 }
 0x4e3   : > { %6639 = vrcp.f32 %v4376_v28 }
 0x4e9   : > { %v6638_v29 = vpop.eup %6637 }
 0x4ea   : > { %v4389_v30 = vmul.f32 %v6638_v29, %v7275_v39  ;;  %v4391_v58 = vmul.f32 %v6638_v29, %v7290_v5  ;;  %v4388_v56 = vmul.f32 %v6638_v29, %v7273_v55  ;;  %v4390_v59 = vmul.f32 %v6638_v29, %v7283_v57  ;;  %v6656_v5 = vld [vmem:[%s6952_s17 + $0x60] sm:$0xff]  ;;  %v6657_v55 = vld [vmem:[%s6952_s17 + $0x70] sm:$0xff]  ;;  %v6658_v57 = vld [vmem:[%s6952_s17 + $0x8] sm:$0xff] }
 0x4eb   : > { %v5964_v29 = vld [vmem:[%s7459_s9] ss:$0 sm:$0xff] }
 0x4ec   : > { %v4451_v39 = vmul.f32 %v6655_v35, %v4389_v30  ;;  %v4453_v36 = vmul.f32 %v7108_v15, %v4391_v58  ;;  %v4450_v45 = vmul.f32 %v6656_v5, %v4388_v56  ;;  %v4452_v37 = vmul.f32 %v6657_v55, %v4390_v59  ;;  %v5283_v15 = vld [vmem:[#allocation2] sm:$0x1] }
 0x4ed   : > { %v6640_v54 = vpop.eup %6639  ;;  %5286 = vperm.xlu1 %6151, %v5283_v15  }
 0x4ee   : > { %v4384_v31 = vmul.f32 %v6640_v54, %v7281_v53  ;;  %v4386_v32 = vmul.f32 %v6640_v54, %v7294_v9  ;;  %v4383_v0 = vmul.f32 %v6640_v54, %v7277_v47  ;;  %v4385_v34 = vmul.f32 %v6640_v54, %v7288_v3  ;;  %v6659_v53 = vld [vmem:[%s6952_s17] sm:$0xff] }
 0x4f0   : > { %v4447_v38 = vmul.f32 %v6658_v57, %v4384_v31  ;;  %v4449_v4 = vmul.f32 %v7113_v17, %v4386_v32  ;;  %v4446_v42 = vmul.f32 %v6659_v53, %v4383_v0  ;;  %v4448_v9 = vmul.f32 %v6660_v43, %v4385_v34 }
 0x4f2   : > { %v4455_v48 = vpack.c.bf16 %v4451_v39, %v4447_v38  ;;  %v4457_v47 = vpack.c.bf16 %v4453_v36, %v4449_v4  ;;  %v4454_v50 = vpack.c.bf16 %v4450_v45, %v4446_v42  ;;  %v4456_v3 = vpack.c.bf16 %v4452_v37, %v4448_v9 }
 0x4f4   : > { %5143 = vmatprep.mubr.bf16.mxu0 %v4455_v48  ;;  %5184 = vmatprep.mubr.bf16.mxu1 %v4457_v47 }
 0x4f5   : > { %5144 = vmatmul.mubr.bf16.vlgmr.msra.gmra.mrb[12].mxu0 %v4454_v50  ;;  %5185 = vmatmul.mubr.bf16.vlgmr.msra.gmra.mrb[12].mxu1 %v4456_v3 }
 0x593   : > { %v5983_v33 = vpop.f32.mrb[8].mxu0  ;;  %v6005_v61 = vpop.f32.mrb[8].mxu1 }
 0x594   : > { %v5984_v63 = vpop.f32.mrb[9].mxu0  ;;  %v6006_v17 = vpop.f32.mrb[9].mxu1 }
 0x595   : > { %v5985_v6 = vadd.f32 %v5984_v63, %v5983_v33  ;;  %v6007_v52 = vadd.f32 %v6006_v17, %v6005_v61  ;;  %v5986_v46 = vpop.f32.mrb[10].mxu0  ;;  %v6008_v62 = vpop.f32.mrb[10].mxu1 }
 0x596   : > { %v5987_v2 = vpop.f32.mrb[11].mxu0  ;;  %v6009_v40 = vpop.f32.mrb[11].mxu1 }
 0x597   : > { %v4913_v8 = vadd.f32 %v6007_v52, %v5985_v6  ;;  %v5988_v10 = vadd.f32 %v5987_v2, %v5986_v46  ;;  %v6010_v49 = vadd.f32 %v6009_v40, %v6008_v62 }
 0x599   : > { %v4916_v11 = vadd.f32 %v6010_v49, %v5988_v10 }
 0x5c8   : > { %v6027_v12 = vpop.f32.mrb[12].mxu0  ;;  %v6049_v14 = vpop.f32.mrb[12].mxu1 }
 0x5c9   : > { %v6028_v18 = vpop.f32.mrb[13].mxu0  ;;  %v6050_v22 = vpop.f32.mrb[13].mxu1 }
 0x5ca   : > { %v6029_v19 = vadd.f32 %v6028_v18, %v6027_v12  ;;  %v6051_v20 = vadd.f32 %v6050_v22, %v6049_v14  ;;  %v6030_v21 = vpop.f32.mrb[14].mxu0  ;;  %v6052_v41 = vpop.f32.mrb[14].mxu1 }
 0x5cb   : > { %v6031_v23 = vpop.f32.mrb[15].mxu0  ;;  %v6053_v24 = vpop.f32.mrb[15].mxu1 }
 0x5cc   : > { %v5146_v26 = vadd.f32 %v6029_v19, %v4913_v8  ;;  %v6032_v27 = vadd.f32 %v6031_v23, %v6030_v21  ;;  %v6054_v7 = vadd.f32 %v6053_v24, %v6052_v41 }
 0x5ce   : > { %v5187_v60 = vadd.f32 %v6051_v20, %v5146_v26  ;;  %v5149_v44 = vadd.f32 %v6032_v27, %v4916_v11  ;;  %v5287_v27 = vpop.permute.xlu1 %5286 }
 0x5d0   : > { %v5200_v51 = vadd.f32 %v5963_v16, %v5187_v60  ;;  %v5190_v1 = vadd.f32 %v6054_v7, %v5149_v44  ;;  %v5292_v60 = vrot.slane %v5287_v27, %v7041_v25 }
 0x5d2   : > { %6641 = vtanh.f32 %v5200_v51  ;;  %v5201_v28 = vadd.f32 %v5963_v16, %v5190_v1 }
 0x5d4   : > { %6643 = vtanh.f32 %v5201_v28 }
 0x5dc   : > { %v6642_v30 = vpop.eup %6641 }
 0x5dd   : > { %v5211_v58 = vmul.f32 %v6642_v30, %v5964_v29 }
 0x5de   : > { %v6644_v56 = vpop.eup %6643 }
 0x5df   : > { %5213 = vxpose.xlu0.b32.start [1/2] (short) %v5211_v58, 128  ;;  %v5212_v59 = vmul.f32 %v6644_v56, %v5964_v29 }
 0x5e3   : > { %5214 = vxpose.xlu0.b32.end [2/2] (short) %v5212_v59, 128 }
 0x60c   : > { %6152 = vset.pattern.permute.xlu0 %v6770_v13 }
 0x65f   : > { %v5229_v54 = vpop.trf.xlu0 }
 0x660   : > { %v5246_v55 = vsel %vm5245_vm2, %v5229_v54, 0.0 }
 0x663   : > { %v5230_v31 = vpop.trf.xlu0 }
 0x664   : > { %v5247_v5 = vsel %vm5245_vm2, %v5230_v31, 0.0 }
 0x665   : > { %v5248_v57 = vadd.f32 %v5247_v5, %v5246_v55 }
 0x667   : > { %v5231_v32 = vpop.trf.xlu0 }
 0x668   : > { %v5249_v37 = vsel %vm5245_vm2, %v5231_v32, 0.0 }
 0x669   : > { %v5250_v4 = vadd.f32 %v5249_v37, %v5248_v57 }
 0x66b   : > { %v5232_v0 = vpop.trf.xlu0 }
 0x66c   : > { %v5251_v38 = vsel %vm5245_vm2, %v5232_v0, 0.0 }
 0x66d   : > { %v5252_v43 = vadd.f32 %v5251_v38, %v5250_v4 }
 0x66f   : > { %v5233_v34 = vpop.trf.xlu0 }
 0x670   : > { %v5253_v42 = vsel %vm5245_vm2, %v5233_v34, 0.0 }
 0x671   : > { %v5254_v48 = vadd.f32 %v5253_v42, %v5252_v43 }
 0x673   : > { %v5234_v35 = vpop.trf.xlu0 }
 0x674   : > { %v5255_v9 = vsel %vm5245_vm2, %v5234_v35, 0.0 }
 0x675   : > { %v5256_v3 = vadd.f32 %v5255_v9, %v5254_v48 }
 0x677   : > { %v5235_v39 = vpop.trf.xlu0 }
 0x678   : > { %v5257_v50 = vsel %vm5245_vm2, %v5235_v39, 0.0 }
 0x679   : > { %v5258_v13 = vadd.f32 %v5257_v50, %v5256_v3 }
 0x67b   : > { %v5236_v36 = vpop.trf.xlu0 }
 0x67c   : > { %v5259_v15 = vsel %vm5245_vm2, %v5236_v36, 0.0 }
 0x67d   : > { %v5260_v63 = vadd.f32 %v5259_v15, %v5258_v13 }
 0x67f   : > { %v5237_v45 = vpop.trf.xlu0 }
 0x680   : > { %v5261_v61 = vsel %vm5245_vm2, %v5237_v45, 0.0 }
 0x681   : > { %v5262_v6 = vadd.f32 %v5261_v61, %v5260_v63 }
 0x683   : > { %v5238_v53 = vpop.trf.xlu0 }
 0x684   : > { %v5263_v17 = vsel %vm5245_vm2, %v5238_v53, 0.0 }
 0x685   : > { %v5264_v62 = vadd.f32 %v5263_v17, %v5262_v6 }
 0x687   : > { %v5239_v47 = vpop.trf.xlu0 }
 0x688   : > { %v5265_v46 = vsel %vm5245_vm2, %v5239_v47, 0.0 }
 0x689   : > { %v5266_v40 = vadd.f32 %v5265_v46, %v5264_v62 }
 0x68b   : > { %v5240_v33 = vpop.trf.xlu0 }
 0x68c   : > { %v5267_v2 = vsel %vm5245_vm2, %v5240_v33, 0.0 }
 0x68d   : > { %v5268_v49 = vadd.f32 %v5267_v2, %v5266_v40 }
 0x68f   : > { %v5241_v52 = vpop.trf.xlu0 }
 0x690   : > { %v5269_v10 = vsel %vm5245_vm2, %v5241_v52, 0.0 }
 0x691   : > { %v5270_v12 = vadd.f32 %v5269_v10, %v5268_v49 }
 0x693   : > { %v5242_v8 = vpop.trf.xlu0 }
 0x694   : > { %v5271_v11 = vsel %vm5245_vm2, %v5242_v8, 0.0 }
 0x695   : > { %v5272_v22 = vadd.f32 %v5271_v11, %v5270_v12 }
 0x697   : > { %v5243_v14 = vpop.trf.xlu0 }
 0x698   : > { %v5273_v18 = vsel %vm5245_vm2, %v5243_v14, 0.0 }
 0x699   : > { %v5274_v19 = vadd.f32 %v5273_v18, %v5272_v22 }
 0x69b   : > { %v5244_v20 = vpop.trf.xlu0 }
 0x69c   : > { %v5275_v21 = vsel %vm5245_vm2, %v5244_v20, 0.0 }
 0x69d   : > { %v5276_v41 = vadd.f32 %v5275_v21, %v5274_v19 }
 0x69f   : > { %v5277_v23 = vrot.slane %v5276_v41, 4 }
 0x6a1   : > { %v5278_v24 = vadd.f32 %v5277_v23, %v5276_v41 }
 0x6a3   : > { %v5279_v26 = vrot.slane %v5278_v24, 2 }
 0x6a5   : > { %v5280_v7 = vadd.f32 %v5279_v26, %v5278_v24 }
 0x6a7   : > { %v5281_v16 = vrot.slane %v5280_v7, 1 }
 0x6a9   : > { %v5282_v44 = vadd.f32 %v5281_v16, %v5280_v7 }
 0x6ab   : > { %v5293_v51 = vadd.f32 %v5292_v60, %v5282_v44 }
 0x6ad   : > { %5295 = vst.msk [vmem:[%s433_s26] sm:$0x1] %vm5294_vm3, %v5293_v51 }
 0x6ae PF: > { %s25_s19 = sadd.s32 1, %s6759_s19  }
 0x6af   : > { %p22_p3 = scmp.ge.s32.totalorder %s25_s19, 4  }
 0x6b1   :  { %24 = sbr.rel (!%p22_p3) target bundleno = 5 (0x5), region = 107 }
 0x6b8   :  { %5313 = vsyncpa [#allocation4], 1 }
 0x6b9   :  { %5315 = vsyncpa [#allocation4 + $0x1], 1 }
 0x6ba   :  { %5316 = vsyncpa [#allocation6], 1 }

</bundles_post_ra>
